<compile_context>
chip_gen: v6e
topology: v6e:2x2x1
jax: 0.10.0
libtpu: 0.0.40
codegen_flags: <defaults>
</compile_context>

<pallas_src>
import functools
import math

import jax
import jax.numpy as jnp
from jax.experimental import pallas as pl
from jax.experimental.pallas import tpu as pltpu


# ----------------------------------------------------------------------------
# Pallas kernel: bf16 GEMM (resident weight) + fused bias / activation epilogue
# ----------------------------------------------------------------------------
def _mm_bias_act_kernel(x_ref, w_ref, b_ref, o_ref, *, act):
    y = jnp.dot(x_ref[...], w_ref[...], preferred_element_type=jnp.float32)
    y = y + b_ref[...]  # (tm, Np) + (1, Np), f32 epilogue
    if act == "leaky_relu":
        # PyTorch F.leaky_relu default negative_slope = 0.01
        y = jnp.where(y >= 0, y, 0.01 * y)
    elif act == "tanh":
        y = jnp.tanh(y)
    o_ref[...] = y.astype(o_ref.dtype)


def _round_up(v, m):
    return (v + m - 1) // m * m


def _pick_tm(M, K, Np, out_bytes):
    """Largest M tile that keeps (x + resident weight + out) tiles in budget."""
    Mp8 = _round_up(M, 8)
    budget = 24 * 2**20                      # headroom under v7x's 32 MiB scoped VMEM
    w_bytes = 2 * K * Np * 2 + 2 * Np * 4    # resident weight + bias (double-buffered)
    per_row = 2 * K * 2 + 2 * Np * out_bytes  # double-buffered x row + out row
    cap = (budget - w_bytes) // per_row
    cap = max(256, min(1024, cap // 256 * 256))
    if K >= 4096:                             # conv5 / t_conv5: be conservative on v7x
        cap = min(cap, 512)
    return min(Mp8, cap)


def matmul_bias_act(xm, wm, bp, act, out_dtype):
    """out = act(xm @ wm + bp).

    xm: (M, K) activations (cast to bf16 here)
    wm: (K, Np) bf16 pre-baked weight (Np multiple of 128)
    bp: (1, Np) f32 pre-baked bias row
    returns (M, Np) out_dtype
    """
    M, K = xm.shape
    Kw, Np = wm.shape
    assert K == Kw and Np % 128 == 0

    out_bytes = jnp.dtype(out_dtype).itemsize
    tm = _pick_tm(M, K, Np, out_bytes)
    Mp = _round_up(M, tm)

    if xm.dtype != jnp.bfloat16:
        xm = xm.astype(jnp.bfloat16)
    if Mp != M:
        xm = jnp.pad(xm, ((0, Mp - M), (0, 0)))

    vmem_bytes = (2 * tm * K * 2          # x tile, double-buffered (bf16)
                  + 2 * K * Np * 2        # weight, (double-buffered, resident)
                  + 2 * Np * 4            # bias
                  + 2 * tm * Np * out_bytes)
    vmem_limit = int(vmem_bytes + 8 * 2**20)   # explicit, never blindly 64 MiB

    out = pl.pallas_call(
        functools.partial(_mm_bias_act_kernel, act=act),
        out_shape=jax.ShapeDtypeStruct((Mp, Np), out_dtype),
        grid=(Mp // tm,),
        in_specs=[
            pl.BlockSpec((tm, K), lambda i: (i, 0)),
            pl.BlockSpec((K, Np), lambda i: (0, 0)),   # constant -> stays resident
            pl.BlockSpec((1, Np), lambda i: (0, 0)),
        ],
        out_specs=pl.BlockSpec((tm, Np), lambda i: (i, 0)),
        compiler_params=pltpu.CompilerParams(
            dimension_semantics=("parallel",),
            vmem_limit_bytes=vmem_limit,
        ),
    )(xm, wm, bp)

    if Mp != M:
        out = out[:M]
    return out


# ----------------------------------------------------------------------------
# im2col glue (pure JAX; feeds the Pallas GEMM)
# ----------------------------------------------------------------------------
def _im2col(x, k, stride, padding, dilation):
    """x: (N,H,W,C) -> (N,Ho,Wo, k*k*C) with [kh, kw, C] column ordering."""
    N, H, W, C = x.shape
    if padding > 0:
        x = jnp.pad(x, ((0, 0), (padding, padding), (padding, padding), (0, 0)))
    Ho = (H + 2 * padding - dilation * (k - 1) - 1) // stride + 1
    Wo = (W + 2 * padding - dilation * (k - 1) - 1) // stride + 1
    cols = []
    for i in range(k):
        for j in range(k):
            patch = x[
                :,
                i * dilation : i * dilation + stride * (Ho - 1) + 1 : stride,
                j * dilation : j * dilation + stride * (Wo - 1) + 1 : stride,
                :,
            ]
            cols.append(patch)
    patches = jnp.stack(cols, axis=3)  # (N, Ho, Wo, k*k, C)
    return patches.reshape(N, Ho, Wo, k * k * C), Ho, Wo


# ----------------------------------------------------------------------------
# Conv layers built on the Pallas GEMM
# ----------------------------------------------------------------------------
def conv2d_block(x, prm, *, stride=1, padding=0, dilation=1,
                 act="leaky_relu", out_dtype=jnp.bfloat16):
    """x: (N,H,W,Cin) bf16; prm holds the pre-baked GEMM weight/bias."""
    N, H, W, C = x.shape
    cin = prm["cin"]
    if C < cin:  # conv1: pad channels once (weight was baked for cin channels)
        x = jnp.pad(x, ((0, 0), (0, 0), (0, 0), (0, cin - C)))
    k = prm["k"]
    patches, Ho, Wo = _im2col(x, k, stride, padding, dilation)
    xm = patches.reshape(N * Ho * Wo, k * k * cin)
    y = matmul_bias_act(xm, prm["wm"], prm["b"], act, out_dtype)
    cout = prm["cout"]
    if y.shape[1] != cout:
        y = y[:, :cout]
    return y.reshape(N, Ho, Wo, cout)


def _conv_transpose_separate(x, prm, *, act, out_dtype):
    """ConvTranspose2d(k=4,s=2,p=1) via 4 sub-pixel phase convs (2x2 kernels)."""
    N, H, W, Cin = x.shape
    cout = prm["cout"]
    xp = jnp.pad(x, ((0, 0), (1, 1), (1, 1), (0, 0)))
    phases = []
    for ry in (0, 1):
        for rx in (0, 1):
            xs = xp[:, ry : ry + H + 1, rx : rx + W + 1, :]   # (N, H+1, W+1, Cin)
            patches, _, _ = _im2col(xs, 2, 1, 0, 1)           # Ho=H, Wo=W
            xm = patches.reshape(N * H * W, 4 * Cin)
            y = matmul_bias_act(xm, prm["wms"][ry * 2 + rx], prm["b"],
                                act, out_dtype)
            phases.append(y[:, :cout].reshape(N, H, W, cout))
    st = jnp.stack(phases, axis=3).reshape(N, H, W, 2, 2, cout)
    st = jnp.transpose(st, (0, 1, 3, 2, 4, 5))                # (N, H, ry, W, rx, C)
    return st.reshape(N, 2 * H, 2 * W, cout)


def _conv_transpose_packed(x, prm, *, act, out_dtype):
    """ConvTranspose2d(k=4,s=2,p=1) with all 4 phases fused into ONE GEMM.

    Shared 3x3 im2col of the 1-padded input (K = 9*Cin); each phase's 2x2
    sub-kernel is zero-embedded at its 4 tap rows of the packed weight, and
    the 4 phase outputs are packed along N (4*cout <= 128).
    """
    N, H, W, Cin = x.shape
    cout = prm["cout"]
    patches, _, _ = _im2col(x, 3, 1, 1, 1)                    # Ho=H, Wo=W
    xm = patches.reshape(N * H * W, 9 * Cin)
    y = matmul_bias_act(xm, prm["wm"], prm["b"], act, out_dtype)
    y = y[:, : 4 * cout].reshape(N, H, W, 2, 2, cout)         # (n,h,w,ry,rx,c)
    y = jnp.transpose(y, (0, 1, 3, 2, 4, 5))                  # (n,h,ry,w,rx,c)
    return y.reshape(N, 2 * H, 2 * W, cout)


def conv_transpose2d_block(x, prm, *, act="leaky_relu", out_dtype=jnp.bfloat16):
    if prm["packed"]:
        return _conv_transpose_packed(x, prm, act=act, out_dtype=out_dtype)
    return _conv_transpose_separate(x, prm, act=act, out_dtype=out_dtype)


# ----------------------------------------------------------------------------
# Parameter init (PyTorch-style) and one-time GEMM prep (bf16, N-padded)
# ----------------------------------------------------------------------------
def _init_conv(key, cout, cin, k):
    kw, kb = jax.random.split(key)
    fan_in = cin * k * k
    bound = 1.0 / math.sqrt(fan_in)
    w = jax.random.uniform(kw, (cout, cin, k, k), jnp.float32, -bound, bound)
    b = jax.random.uniform(kb, (cout,), jnp.float32, -bound, bound)
    return w, b


def _init_tconv(key, cin, cout, k):
    kw, kb = jax.random.split(key)
    fan_in = cout * k * k  # torch ConvTranspose2d fan_in convention
    bound = 1.0 / math.sqrt(fan_in)
    w = jax.random.uniform(kw, (cin, cout, k, k), jnp.float32, -bound, bound)
    b = jax.random.uniform(kb, (cout,), jnp.float32, -bound, bound)
    return w, b


def init_colorizer_v6_raw_params(key, inputs=1, outputs=2):
    ks = jax.random.split(key, 10)
    p = {}
    p["conv1"] = _init_conv(ks[0], 32, inputs, 4)
    p["conv2"] = _init_conv(ks[1], 64, 32, 4)
    p["conv3"] = _init_conv(ks[2], 128, 64, 4)
    p["conv4"] = _init_conv(ks[3], 256, 128, 4)
    p["conv5"] = _init_conv(ks[4], 512, 256, 4)
    p["t_conv5"] = _init_conv(ks[5], 256, 512, 4)
    p["t_conv4"] = _init_tconv(ks[6], 256, 128, 4)
    p["t_conv3"] = _init_tconv(ks[7], 128, 64, 4)
    p["t_conv2"] = _init_tconv(ks[8], 64, 32, 4)
    p["t_conv1"] = _init_tconv(ks[9], 32, outputs, 4)
    return p


def _prep_conv(w, b, cin_pad=None):
    """torch Conv2d weight (Cout,Cin,k,k) -> bf16 (k*k*cin_eff, Np) GEMM matrix."""
    cout, cin, k, _ = w.shape
    cin_eff = cin if cin_pad is None else max(cin, cin_pad)
    Np = _round_up(cout, 128)
    wt = jnp.transpose(w, (2, 3, 1, 0))                   # (kh, kw, Cin, Cout)
    if cin_eff != cin:
        wt = jnp.pad(wt, ((0, 0), (0, 0), (0, cin_eff - cin), (0, 0)))
    wm = wt.reshape(k * k * cin_eff, cout).astype(jnp.bfloat16)
    if Np != cout:
        wm = jnp.pad(wm, ((0, 0), (0, Np - cout)))
    bp = jnp.pad(b.astype(jnp.float32), (0, Np - cout)).reshape(1, Np)
    return {"wm": wm, "b": bp, "cout": cout, "cin": cin_eff, "k": k}


def _prep_tconv_separate(w, b):
    """torch ConvTranspose2d weight (Cin,Cout,4,4) -> four bf16 (4*Cin, Np)
    sub-kernel GEMM matrices (one per output phase)."""
    cin, cout, k, _ = w.shape
    assert k == 4
    Np = _round_up(cout, 128)
    wt = jnp.transpose(w, (2, 3, 0, 1))                   # (kh, kw, Cin, Cout)
    wms = []
    for ry in (0, 1):
        for rx in (0, 1):
            ki = jnp.array([3 - ry, 1 - ry])              # tap dy -> kernel row
            kj = jnp.array([3 - rx, 1 - rx])              # tap dx -> kernel col
            sub = wt[ki][:, kj]                           # (2, 2, Cin, Cout)
            wm = sub.reshape(4 * cin, cout).astype(jnp.bfloat16)
            if Np != cout:
                wm = jnp.pad(wm, ((0, 0), (0, Np - cout)))
            wms.append(wm)
    bp = jnp.pad(b.astype(jnp.float32), (0, Np - cout)).reshape(1, Np)
    return {"wms": wms, "b": bp, "cout": cout, "packed": False}


def _prep_tconv_packed(w, b):
    """torch ConvTranspose2d weight (Cin,Cout,4,4) -> ONE bf16 (9*Cin, Np)
    weight with the 4 phase sub-kernels zero-embedded and packed along N."""
    cin, cout, k, _ = w.shape
    assert k == 4 and 4 * cout <= 128
    Ntrue = 4 * cout
    Np = _round_up(Ntrue, 128)
    wt = jnp.transpose(w, (2, 3, 0, 1))                   # (kh, kw, Cin, Cout)
    wp = jnp.zeros((3, 3, cin, 4, cout), jnp.float32)
    for ry in (0, 1):
        for rx in (0, 1):
            p = ry * 2 + rx
            for dy in (ry, ry + 1):
                for dx in (rx, rx + 1):
                    kidx = 3 + ry - 2 * dy                # same tap mapping as
                    kjdx = 3 + rx - 2 * dx                # the separate path
                    wp = wp.at[dy, dx, :, p, :].set(wt[kidx, kjdx])
    wm = wp.reshape(9 * cin, Ntrue).astype(jnp.bfloat16)
    if Np != Ntrue:
        wm = jnp.pad(wm, ((0, 0), (0, Np - Ntrue)))
    bfull = jnp.tile(b.astype(jnp.float32), 4)            # same bias per phase
    bp = jnp.pad(bfull, (0, Np - Ntrue)).reshape(1, Np)
    return {"wm": wm, "b": bp, "cout": cout, "packed": True}


def prepare_params(raw):
    p = {}
    # conv1: bake the weight for 8 input channels so K = 4*4*8 = 128 and the
    # per-forward K-padding copy disappears (input is channel-padded once).
    p["conv1"] = _prep_conv(*raw["conv1"], cin_pad=8)
    for name in ("conv2", "conv3", "conv4", "conv5", "t_conv5"):
        p[name] = _prep_conv(*raw[name])
    for name in ("t_conv4", "t_conv3", "t_conv2", "t_conv1"):
        cout = raw[name][0].shape[1]
        if 4 * cout <= 128:
            p[name] = _prep_tconv_packed(*raw[name])      # t_conv2, t_conv1
        else:
            p[name] = _prep_tconv_separate(*raw[name])    # t_conv4, t_conv3
    return p


# ----------------------------------------------------------------------------
# Forward pass (mirrors ColorizerV6.forward)
# ----------------------------------------------------------------------------
def colorizer_v6_forward(params, x_nchw, return_latent=False):
    x = jnp.transpose(x_nchw, (0, 2, 3, 1)).astype(jnp.bfloat16)  # NCHW -> NHWC

    out1 = conv2d_block(x, params["conv1"], stride=2, padding=1)
    out2 = conv2d_block(out1, params["conv2"], stride=2, padding=1)
    out3 = conv2d_block(out2, params["conv3"], stride=2, padding=1)
    out4 = conv2d_block(out3, params["conv4"], stride=2, padding=1)
    out5 = conv2d_block(out4, params["conv5"], stride=1, padding=3, dilation=2)
    if return_latent:
        return jnp.transpose(out5.astype(jnp.float32), (0, 3, 1, 2))

    out6 = conv2d_block(out5, params["t_conv5"], stride=1, padding=3, dilation=2)
    out7 = conv_transpose2d_block(out6, params["t_conv4"])
    out8 = conv_transpose2d_block(out7, params["t_conv3"])
    out9 = conv_transpose2d_block(out8, params["t_conv2"])
    out = conv_transpose2d_block(out9, params["t_conv1"],
                                 act="tanh", out_dtype=jnp.float32)

    return jnp.transpose(out, (0, 3, 1, 2))  # NHWC -> NCHW


if __name__ == "__main__":
    key = jax.random.PRNGKey(0)
    k_params, k_x = jax.random.split(key)

    raw_params = init_colorizer_v6_raw_params(k_params, inputs=1, outputs=2)
    params = prepare_params(raw_params)  # one-time weight prep (outside forward)

    x = jax.random.normal(k_x, (2, 1, 16, 16), jnp.float32)  # NCHW like PyTorch

    fwd = jax.jit(functools.partial(colorizer_v6_forward, params))
    y = jax.block_until_ready(fwd(x))

    assert y.shape == (2, 2, 16, 16), y.shape
    assert bool(jnp.all(jnp.isfinite(y)))
    assert bool(jnp.all(jnp.abs(y) <= 1.0 + 1e-6))  # final tanh
    print("KERNEL_OK")
</pallas_src>

<mosaic_0001>
module attributes {stable_mosaic.version = 11 : i64} {
  func.func @_mm_bias_act_kernel(%arg0: i32, %arg1: memref<8x8192xbf16, #tpu.memory_space<vmem>>, %arg2: memref<8192x256xbf16, #tpu.memory_space<vmem>>, %arg3: memref<1x256xf32, #tpu.memory_space<vmem>>, %arg4: memref<8x256xbf16, #tpu.memory_space<vmem>>) attributes {dimension_semantics = [#tpu.dimension_semantics<parallel>], iteration_bounds = array<i64: 1>, scalar_prefetch = 0 : i64, scratch_operands = 0 : i64, tpu.core_type = #tpu.core_type<tc>, window_params = [{transform_indices = @transform_0, window_bounds = array<i64: 8, 8192>}, {pipeline_mode = #tpu.pipeline_mode<synchronous>, transform_indices = @transform_1, window_bounds = array<i64: 8192, 256>}, {pipeline_mode = #tpu.pipeline_mode<synchronous>, transform_indices = @transform_2, window_bounds = array<i64: 1, 256>}, {transform_indices = @transform_3, window_bounds = array<i64: 8, 256>}]} {
    %c0 = arith.constant 0 : index
    %c0_0 = arith.constant 0 : index
    %0 = vector.load %arg1[%c0, %c0_0] : memref<8x8192xbf16, #tpu.memory_space<vmem>>, vector<8x8192xbf16>
    %c0_1 = arith.constant 0 : index
    %c0_2 = arith.constant 0 : index
    %1 = vector.load %arg2[%c0_1, %c0_2] : memref<8192x256xbf16, #tpu.memory_space<vmem>>, vector<8192x256xbf16>
    %cst = arith.constant dense<0.000000e+00> : vector<8x256xf32>
    %2 = tpu.matmul %0, %1, %cst {dimension_numbers = #tpu.dot_dimension_numbers<[1], [0], [0], [1], [0, 0, 1, 1], [], []>} : vector<8x8192xbf16>, vector<8192x256xbf16>, vector<8x256xf32> -> vector<8x256xf32>
    %c0_3 = arith.constant 0 : index
    %c0_4 = arith.constant 0 : index
    %3 = vector.load %arg3[%c0_3, %c0_4] : memref<1x256xf32, #tpu.memory_space<vmem>>, vector<1x256xf32>
    %4 = vector.broadcast %3 : vector<1x256xf32> to vector<8x256xf32>
    %5 = arith.addf %2, %4 : vector<8x256xf32>
    %cst_5 = arith.constant 0.000000e+00 : f32
    %6 = vector.broadcast %cst_5 : f32 to vector<8x256xf32>
    %7 = arith.cmpf oge, %5, %6 : vector<8x256xf32>
    %cst_6 = arith.constant 0.00999999977 : f32
    %8 = vector.broadcast %cst_6 : f32 to vector<8x256xf32>
    %9 = arith.mulf %8, %5 : vector<8x256xf32>
    %10 = arith.select %7, %5, %9 : vector<8x256xi1>, vector<8x256xf32>
    %11 = arith.truncf %10 : vector<8x256xf32> to vector<8x256xbf16>
    %c0_7 = arith.constant 0 : index
    %c0_8 = arith.constant 0 : index
    %12 = vector.load %arg4[%c0_7, %c0_8] : memref<8x256xbf16, #tpu.memory_space<vmem>>, vector<8x256xbf16>
    tpu.vector_store %arg4[%c0_7, %c0_8], %11 {strides = array<i32>} : memref<8x256xbf16, #tpu.memory_space<vmem>>, vector<8x256xbf16>,
    return
  }
  func.func @transform_0(%arg0: i32) -> (i32, i32) {
    %c0_i32 = arith.constant 0 : i32
    %c0_i32_0 = arith.constant 0 : i32
    return %arg0, %c0_i32 : i32, i32
  }
  func.func @transform_1(%arg0: i32) -> (i32, i32) {
    %c0_i32 = arith.constant 0 : i32
    %c0_i32_0 = arith.constant 0 : i32
    %c0_i32_1 = arith.constant 0 : i32
    return %c0_i32, %c0_i32_0 : i32, i32
  }
  func.func @transform_2(%arg0: i32) -> (i32, i32) {
    %c0_i32 = arith.constant 0 : i32
    %c0_i32_0 = arith.constant 0 : i32
    %c0_i32_1 = arith.constant 0 : i32
    return %c0_i32, %c0_i32_0 : i32, i32
  }
  func.func @transform_3(%arg0: i32) -> (i32, i32) {
    %c0_i32 = arith.constant 0 : i32
    %c0_i32_0 = arith.constant 0 : i32
    return %arg0, %c0_i32 : i32, i32
  }
}

module attributes {stable_mosaic.version = 11 : i64} {
  func.func @_mm_bias_act_kernel(%arg0: i32, %arg1: memref<8x1024xbf16, #tpu.memory_space<vmem>>, %arg2: memref<1024x128xbf16, #tpu.memory_space<vmem>>, %arg3: memref<1x128xf32, #tpu.memory_space<vmem>>, %arg4: memref<8x128xbf16, #tpu.memory_space<vmem>>) attributes {dimension_semantics = [#tpu.dimension_semantics<parallel>], iteration_bounds = array<i64: 1>, scalar_prefetch = 0 : i64, scratch_operands = 0 : i64, tpu.core_type = #tpu.core_type<tc>, window_params = [{transform_indices = @transform_0, window_bounds = array<i64: 8, 1024>}, {pipeline_mode = #tpu.pipeline_mode<synchronous>, transform_indices = @transform_1, window_bounds = array<i64: 1024, 128>}, {pipeline_mode = #tpu.pipeline_mode<synchronous>, transform_indices = @transform_2, window_bounds = array<i64: 1, 128>}, {transform_indices = @transform_3, window_bounds = array<i64: 8, 128>}]} {
    %c0 = arith.constant 0 : index
    %c0_0 = arith.constant 0 : index
    %0 = vector.load %arg1[%c0, %c0_0] : memref<8x1024xbf16, #tpu.memory_space<vmem>>, vector<8x1024xbf16>
    %c0_1 = arith.constant 0 : index
    %c0_2 = arith.constant 0 : index
    %1 = vector.load %arg2[%c0_1, %c0_2] : memref<1024x128xbf16, #tpu.memory_space<vmem>>, vector<1024x128xbf16>
    %cst = arith.constant dense<0.000000e+00> : vector<8x128xf32>
    %2 = tpu.matmul %0, %1, %cst {dimension_numbers = #tpu.dot_dimension_numbers<[1], [0], [0], [1], [0, 0, 1, 1], [], []>} : vector<8x1024xbf16>, vector<1024x128xbf16>, vector<8x128xf32> -> vector<8x128xf32>
    %c0_3 = arith.constant 0 : index
    %c0_4 = arith.constant 0 : index
    %3 = vector.load %arg3[%c0_3, %c0_4] : memref<1x128xf32, #tpu.memory_space<vmem>>, vector<1x128xf32>
    %4 = vector.broadcast %3 : vector<1x128xf32> to vector<8x128xf32>
    %5 = arith.addf %2, %4 : vector<8x128xf32>
    %cst_5 = arith.constant 0.000000e+00 : f32
    %6 = vector.broadcast %cst_5 : f32 to vector<8x128xf32>
    %7 = arith.cmpf oge, %5, %6 : vector<8x128xf32>
    %cst_6 = arith.constant 0.00999999977 : f32
    %8 = vector.broadcast %cst_6 : f32 to vector<8x128xf32>
    %9 = arith.mulf %8, %5 : vector<8x128xf32>
    %10 = arith.select %7, %5, %9 : vector<8x128xi1>, vector<8x128xf32>
    %11 = arith.truncf %10 : vector<8x128xf32> to vector<8x128xbf16>
    %c0_7 = arith.constant 0 : index
    %c0_8 = arith.constant 0 : index
    %12 = vector.load %arg4[%c0_7, %c0_8] : memref<8x128xbf16, #tpu.memory_space<vmem>>, vector<8x128xbf16>
    tpu.vector_store %arg4[%c0_7, %c0_8], %11 {strides = array<i32>} : memref<8x128xbf16, #tpu.memory_space<vmem>>, vector<8x128xbf16>,
    return
  }
  func.func @transform_0(%arg0: i32) -> (i32, i32) {
    %c0_i32 = arith.constant 0 : i32
    %c0_i32_0 = arith.constant 0 : i32
    return %arg0, %c0_i32 : i32, i32
  }
  func.func @transform_1(%arg0: i32) -> (i32, i32) {
    %c0_i32 = arith.constant 0 : i32
    %c0_i32_0 = arith.constant 0 : i32
    %c0_i32_1 = arith.constant 0 : i32
    return %c0_i32, %c0_i32_0 : i32, i32
  }
  func.func @transform_2(%arg0: i32) -> (i32, i32) {
    %c0_i32 = arith.constant 0 : i32
    %c0_i32_0 = arith.constant 0 : i32
    %c0_i32_1 = arith.constant 0 : i32
    return %c0_i32, %c0_i32_0 : i32, i32
  }
  func.func @transform_3(%arg0: i32) -> (i32, i32) {
    %c0_i32 = arith.constant 0 : i32
    %c0_i32_0 = arith.constant 0 : i32
    return %arg0, %c0_i32 : i32, i32
  }
}

module attributes {stable_mosaic.version = 11 : i64} {
  func.func @_mm_bias_act_kernel(%arg0: i32, %arg1: memref<8x512xbf16, #tpu.memory_space<vmem>>, %arg2: memref<512x128xbf16, #tpu.memory_space<vmem>>, %arg3: memref<1x128xf32, #tpu.memory_space<vmem>>, %arg4: memref<8x128xbf16, #tpu.memory_space<vmem>>) attributes {dimension_semantics = [#tpu.dimension_semantics<parallel>], iteration_bounds = array<i64: 1>, scalar_prefetch = 0 : i64, scratch_operands = 0 : i64, tpu.core_type = #tpu.core_type<tc>, window_params = [{transform_indices = @transform_0, window_bounds = array<i64: 8, 512>}, {pipeline_mode = #tpu.pipeline_mode<synchronous>, transform_indices = @transform_1, window_bounds = array<i64: 512, 128>}, {pipeline_mode = #tpu.pipeline_mode<synchronous>, transform_indices = @transform_2, window_bounds = array<i64: 1, 128>}, {transform_indices = @transform_3, window_bounds = array<i64: 8, 128>}]} {
    %c0 = arith.constant 0 : index
    %c0_0 = arith.constant 0 : index
    %0 = vector.load %arg1[%c0, %c0_0] : memref<8x512xbf16, #tpu.memory_space<vmem>>, vector<8x512xbf16>
    %c0_1 = arith.constant 0 : index
    %c0_2 = arith.constant 0 : index
    %1 = vector.load %arg2[%c0_1, %c0_2] : memref<512x128xbf16, #tpu.memory_space<vmem>>, vector<512x128xbf16>
    %cst = arith.constant dense<0.000000e+00> : vector<8x128xf32>
    %2 = tpu.matmul %0, %1, %cst {dimension_numbers = #tpu.dot_dimension_numbers<[1], [0], [0], [1], [0, 0, 1, 1], [], []>} : vector<8x512xbf16>, vector<512x128xbf16>, vector<8x128xf32> -> vector<8x128xf32>
    %c0_3 = arith.constant 0 : index
    %c0_4 = arith.constant 0 : index
    %3 = vector.load %arg3[%c0_3, %c0_4] : memref<1x128xf32, #tpu.memory_space<vmem>>, vector<1x128xf32>
    %4 = vector.broadcast %3 : vector<1x128xf32> to vector<8x128xf32>
    %5 = arith.addf %2, %4 : vector<8x128xf32>
    %cst_5 = arith.constant 0.000000e+00 : f32
    %6 = vector.broadcast %cst_5 : f32 to vector<8x128xf32>
    %7 = arith.cmpf oge, %5, %6 : vector<8x128xf32>
    %cst_6 = arith.constant 0.00999999977 : f32
    %8 = vector.broadcast %cst_6 : f32 to vector<8x128xf32>
    %9 = arith.mulf %8, %5 : vector<8x128xf32>
    %10 = arith.select %7, %5, %9 : vector<8x128xi1>, vector<8x128xf32>
    %11 = arith.truncf %10 : vector<8x128xf32> to vector<8x128xbf16>
    %c0_7 = arith.constant 0 : index
    %c0_8 = arith.constant 0 : index
    %12 = vector.load %arg4[%c0_7, %c0_8] : memref<8x128xbf16, #tpu.memory_space<vmem>>, vector<8x128xbf16>
    tpu.vector_store %arg4[%c0_7, %c0_8], %11 {strides = array<i32>} : memref<8x128xbf16, #tpu.memory_space<vmem>>, vector<8x128xbf16>,
    return
  }
  func.func @transform_0(%arg0: i32) -> (i32, i32) {
    %c0_i32 = arith.constant 0 : i32
    %c0_i32_0 = arith.constant 0 : i32
    return %arg0, %c0_i32 : i32, i32
  }
  func.func @transform_1(%arg0: i32) -> (i32, i32) {
    %c0_i32 = arith.constant 0 : i32
    %c0_i32_0 = arith.constant 0 : i32
    %c0_i32_1 = arith.constant 0 : i32
    return %c0_i32, %c0_i32_0 : i32, i32
  }
  func.func @transform_2(%arg0: i32) -> (i32, i32) {
    %c0_i32 = arith.constant 0 : i32
    %c0_i32_0 = arith.constant 0 : i32
    %c0_i32_1 = arith.constant 0 : i32
    return %c0_i32, %c0_i32_0 : i32, i32
  }
  func.func @transform_3(%arg0: i32) -> (i32, i32) {
    %c0_i32 = arith.constant 0 : i32
    %c0_i32_0 = arith.constant 0 : i32
    return %arg0, %c0_i32 : i32, i32
  }
}

module attributes {stable_mosaic.version = 11 : i64} {
  func.func @_mm_bias_act_kernel(%arg0: i32, %arg1: memref<32x576xbf16, #tpu.memory_space<vmem>>, %arg2: memref<576x128xbf16, #tpu.memory_space<vmem>>, %arg3: memref<1x128xf32, #tpu.memory_space<vmem>>, %arg4: memref<32x128xbf16, #tpu.memory_space<vmem>>) attributes {dimension_semantics = [#tpu.dimension_semantics<parallel>], iteration_bounds = array<i64: 1>, scalar_prefetch = 0 : i64, scratch_operands = 0 : i64, tpu.core_type = #tpu.core_type<tc>, window_params = [{transform_indices = @transform_0, window_bounds = array<i64: 32, 576>}, {pipeline_mode = #tpu.pipeline_mode<synchronous>, transform_indices = @transform_1, window_bounds = array<i64: 576, 128>}, {pipeline_mode = #tpu.pipeline_mode<synchronous>, transform_indices = @transform_2, window_bounds = array<i64: 1, 128>}, {transform_indices = @transform_3, window_bounds = array<i64: 32, 128>}]} {
    %c0 = arith.constant 0 : index
    %c0_0 = arith.constant 0 : index
    %0 = vector.load %arg1[%c0, %c0_0] : memref<32x576xbf16, #tpu.memory_space<vmem>>, vector<32x576xbf16>
    %c0_1 = arith.constant 0 : index
    %c0_2 = arith.constant 0 : index
    %1 = vector.load %arg2[%c0_1, %c0_2] : memref<576x128xbf16, #tpu.memory_space<vmem>>, vector<576x128xbf16>
    %cst = arith.constant dense<0.000000e+00> : vector<32x128xf32>
    %2 = tpu.matmul %0, %1, %cst {dimension_numbers = #tpu.dot_dimension_numbers<[1], [0], [0], [1], [0, 0, 1, 1], [], []>} : vector<32x576xbf16>, vector<576x128xbf16>, vector<32x128xf32> -> vector<32x128xf32>
    %c0_3 = arith.constant 0 : index
    %c0_4 = arith.constant 0 : index
    %3 = vector.load %arg3[%c0_3, %c0_4] : memref<1x128xf32, #tpu.memory_space<vmem>>, vector<1x128xf32>
    %4 = vector.broadcast %3 : vector<1x128xf32> to vector<32x128xf32>
    %5 = arith.addf %2, %4 : vector<32x128xf32>
    %cst_5 = arith.constant 0.000000e+00 : f32
    %6 = vector.broadcast %cst_5 : f32 to vector<32x128xf32>
    %7 = arith.cmpf oge, %5, %6 : vector<32x128xf32>
    %cst_6 = arith.constant 0.00999999977 : f32
    %8 = vector.broadcast %cst_6 : f32 to vector<32x128xf32>
    %9 = arith.mulf %8, %5 : vector<32x128xf32>
    %10 = arith.select %7, %5, %9 : vector<32x128xi1>, vector<32x128xf32>
    %11 = arith.truncf %10 : vector<32x128xf32> to vector<32x128xbf16>
    %c0_7 = arith.constant 0 : index
    %c0_8 = arith.constant 0 : index
    %12 = vector.load %arg4[%c0_7, %c0_8] : memref<32x128xbf16, #tpu.memory_space<vmem>>, vector<32x128xbf16>
    tpu.vector_store %arg4[%c0_7, %c0_8], %11 {strides = array<i32>} : memref<32x128xbf16, #tpu.memory_space<vmem>>, vector<32x128xbf16>,
    return
  }
  func.func @transform_0(%arg0: i32) -> (i32, i32) {
    %c0_i32 = arith.constant 0 : i32
    %c0_i32_0 = arith.constant 0 : i32
    return %arg0, %c0_i32 : i32, i32
  }
  func.func @transform_1(%arg0: i32) -> (i32, i32) {
    %c0_i32 = arith.constant 0 : i32
    %c0_i32_0 = arith.constant 0 : i32
    %c0_i32_1 = arith.constant 0 : i32
    return %c0_i32, %c0_i32_0 : i32, i32
  }
  func.func @transform_2(%arg0: i32) -> (i32, i32) {
    %c0_i32 = arith.constant 0 : i32
    %c0_i32_0 = arith.constant 0 : i32
    %c0_i32_1 = arith.constant 0 : i32
    return %c0_i32, %c0_i32_0 : i32, i32
  }
  func.func @transform_3(%arg0: i32) -> (i32, i32) {
    %c0_i32 = arith.constant 0 : i32
    %c0_i32_0 = arith.constant 0 : i32
    return %arg0, %c0_i32 : i32, i32
  }
}

module attributes {stable_mosaic.version = 11 : i64} {
  func.func @_mm_bias_act_kernel(%arg0: i32, %arg1: memref<128x288xbf16, #tpu.memory_space<vmem>>, %arg2: memref<288x128xbf16, #tpu.memory_space<vmem>>, %arg3: memref<1x128xf32, #tpu.memory_space<vmem>>, %arg4: memref<128x128xf32, #tpu.memory_space<vmem>>) attributes {dimension_semantics = [#tpu.dimension_semantics<parallel>], iteration_bounds = array<i64: 1>, scalar_prefetch = 0 : i64, scratch_operands = 0 : i64, tpu.core_type = #tpu.core_type<tc>, window_params = [{transform_indices = @transform_0, window_bounds = array<i64: 128, 288>}, {pipeline_mode = #tpu.pipeline_mode<synchronous>, transform_indices = @transform_1, window_bounds = array<i64: 288, 128>}, {pipeline_mode = #tpu.pipeline_mode<synchronous>, transform_indices = @transform_2, window_bounds = array<i64: 1, 128>}, {transform_indices = @transform_3, window_bounds = array<i64: 128, 128>}]} {
    %c0 = arith.constant 0 : index
    %c0_0 = arith.constant 0 : index
    %0 = vector.load %arg1[%c0, %c0_0] : memref<128x288xbf16, #tpu.memory_space<vmem>>, vector<128x288xbf16>
    %c0_1 = arith.constant 0 : index
    %c0_2 = arith.constant 0 : index
    %1 = vector.load %arg2[%c0_1, %c0_2] : memref<288x128xbf16, #tpu.memory_space<vmem>>, vector<288x128xbf16>
    %cst = arith.constant dense<0.000000e+00> : vector<128x128xf32>
    %2 = tpu.matmul %0, %1, %cst {dimension_numbers = #tpu.dot_dimension_numbers<[1], [0], [0], [1], [0, 0, 1, 1], [], []>} : vector<128x288xbf16>, vector<288x128xbf16>, vector<128x128xf32> -> vector<128x128xf32>
    %c0_3 = arith.constant 0 : index
    %c0_4 = arith.constant 0 : index
    %3 = vector.load %arg3[%c0_3, %c0_4] : memref<1x128xf32, #tpu.memory_space<vmem>>, vector<1x128xf32>
    %4 = vector.broadcast %3 : vector<1x128xf32> to vector<128x128xf32>
    %5 = arith.addf %2, %4 : vector<128x128xf32>
    %6 = math.tanh %5 : vector<128x128xf32>
    %c0_5 = arith.constant 0 : index
    %c0_6 = arith.constant 0 : index
    %7 = vector.load %arg4[%c0_5, %c0_6] : memref<128x128xf32, #tpu.memory_space<vmem>>, vector<128x128xf32>
    tpu.vector_store %arg4[%c0_5, %c0_6], %6 {strides = array<i32>} : memref<128x128xf32, #tpu.memory_space<vmem>>, vector<128x128xf32>,
    return
  }
  func.func @transform_0(%arg0: i32) -> (i32, i32) {
    %c0_i32 = arith.constant 0 : i32
    %c0_i32_0 = arith.constant 0 : i32
    return %arg0, %c0_i32 : i32, i32
  }
  func.func @transform_1(%arg0: i32) -> (i32, i32) {
    %c0_i32 = arith.constant 0 : i32
    %c0_i32_0 = arith.constant 0 : i32
    %c0_i32_1 = arith.constant 0 : i32
    return %c0_i32, %c0_i32_0 : i32, i32
  }
  func.func @transform_2(%arg0: i32) -> (i32, i32) {
    %c0_i32 = arith.constant 0 : i32
    %c0_i32_0 = arith.constant 0 : i32
    %c0_i32_1 = arith.constant 0 : i32
    return %c0_i32, %c0_i32_0 : i32, i32
  }
  func.func @transform_3(%arg0: i32) -> (i32, i32) {
    %c0_i32 = arith.constant 0 : i32
    %c0_i32_0 = arith.constant 0 : i32
    return %arg0, %c0_i32 : i32, i32
  }
}

</mosaic_0001>

<bundles_post_ra>
// kernel: colorizer_v6_forward.19
= control target key start
LH: loop header
LB: loop body
LE: loop exit
PB: predicated region body
PF: predicated region fallthrough
CT: control target
= control target key end

     0   :  { %s1198_s1 = inlined_call_operand.vmem [shape: bf16[1024,128], index: 1, kind: input, shape index: {}]   ;;  %s1199_s0 = inlined_call_operand.vmem [shape: bf16[8,1024], index: 0, kind: input, shape index: {}]   ;;  %s1200_s2 = inlined_call_operand.vmem [shape: f32[1,128], index: 2, kind: input, shape index: {}]   ;;  %s1201_s3 = inlined_call_operand.vmem [shape: bf16[8,128], index: 3, kind: output, shape index: {}]  }
   0x1   :  { %v896_v0 = vld [vmem:[%s1198_s1 + $0x78] sm:$0xff]   ;;  %v900_v4 = vld [vmem:[%s1198_s1 + $0x70] sm:$0xff]   ;;  %v904_v8 = vld [vmem:[%s1198_s1 + $0x68] sm:$0xff]  }
   0x2   :  { %v897_v1 = vld [vmem:[%s1198_s1 + $0xf8] sm:$0xff]   ;;  %808 = vmatprep.subr.bf16.mxu0 %v896_v0  ;;  %v901_v5 = vld [vmem:[%s1198_s1 + $0xf0] sm:$0xff]   ;;  %v905_v9 = vld [vmem:[%s1198_s1 + $0xe8] sm:$0xff]  }
   0x3   :  { %v898_v2 = vld [vmem:[%s1198_s1 + $0x38] sm:$0xff]   ;;  %830 = vmatprep.subr.bf16.mxu1 %v897_v1  ;;  %v902_v6 = vld [vmem:[%s1198_s1 + $0x30] sm:$0xff]   ;;  %v906_v10 = vld [vmem:[%s1198_s1 + $0x28] sm:$0xff]  }
   0x4   :  { %v899_v3 = vld [vmem:[%s1198_s1 + $0xb8] sm:$0xff]   ;;  %809 = vmatpush3.bf16.msra.mxu0 %v898_v2  ;;  %v903_v7 = vld [vmem:[%s1198_s1 + $0xb0] sm:$0xff]   ;;  %v907_v11 = vld [vmem:[%s1198_s1 + $0xa8] sm:$0xff]  }
   0x5   :  { %831 = vmatpush3.bf16.msra.mxu1 %v899_v3  ;;  %810 = vmatprep.subr.bf16.mxu0 %v900_v4  ;;  %v908_v12 = vld [vmem:[%s1198_s1 + $0x60] sm:$0xff]   ;;  %v912_v16 = vld [vmem:[%s1198_s1 + $0x58] sm:$0xff]   ;;  %v916_v20 = vld [vmem:[%s1198_s1 + $0x50] sm:$0xff]  }
   0x6   :  { %832 = vmatprep.subr.bf16.mxu1 %v901_v5  ;;  %v909_v13 = vld [vmem:[%s1198_s1 + $0xe0] sm:$0xff]   ;;  %v913_v17 = vld [vmem:[%s1198_s1 + $0xd8] sm:$0xff]   ;;  %v917_v21 = vld [vmem:[%s1198_s1 + $0xd0] sm:$0xff]  }
   0x7   :  { %v910_v14 = vld [vmem:[%s1198_s1 + $0x20] sm:$0xff]   ;;  %v914_v18 = vld [vmem:[%s1198_s1 + $0x18] sm:$0xff]   ;;  %v918_v22 = vld [vmem:[%s1198_s1 + $0x10] sm:$0xff]  }
   0x8   :  { %811 = vmatpush3.bf16.msra.mxu0 %v902_v6  ;;  %v911_v15 = vld [vmem:[%s1198_s1 + $0xa0] sm:$0xff]   ;;  %v915_v19 = vld [vmem:[%s1198_s1 + $0x98] sm:$0xff]   ;;  %v919_v23 = vld [vmem:[%s1198_s1 + $0x90] sm:$0xff]  }
   0x9   :  { %833 = vmatpush3.bf16.msra.mxu1 %v903_v7  ;;  %812 = vmatprep.subr.bf16.mxu0 %v904_v8  ;;  %v920_v24 = vld [vmem:[%s1198_s1 + $0x48] sm:$0xff]   ;;  %v924_v28 = vld [vmem:[%s1198_s1 + $0x40] sm:$0xff]   ;;  %v932_v38 = vld [vmem:[%s1198_s1 + $0x178] sm:$0xff]  }
   0xa   :  { %834 = vmatprep.subr.bf16.mxu1 %v905_v9  ;;  %v921_v25 = vld [vmem:[%s1198_s1 + $0xc8] sm:$0xff]   ;;  %v925_v29 = vld [vmem:[%s1198_s1 + $0xc0] sm:$0xff]   ;;  %v933_v39 = vld [vmem:[%s1198_s1 + $0x1f8] sm:$0xff]  }
   0xb   :  { %v922_v26 = vld [vmem:[%s1198_s1 + $0x8] sm:$0xff]   ;;  %v926_v30 = vld [vmem:[%s1198_s1] sm:$0xff]   ;;  %v934_v40 = vld [vmem:[%s1198_s1 + $0x138] sm:$0xff]  }
   0xc   :  { %813 = vmatpush3.bf16.msra.mxu0 %v906_v10  ;;  %v923_v27 = vld [vmem:[%s1198_s1 + $0x88] sm:$0xff]   ;;  %v927_v31 = vld [vmem:[%s1198_s1 + $0x80] sm:$0xff]   ;;  %v935_v41 = vld [vmem:[%s1198_s1 + $0x1b8] sm:$0xff]  }
   0xd   :  { %835 = vmatpush3.bf16.msra.mxu1 %v907_v11  ;;  %814 = vmatprep.subr.bf16.mxu0 %v908_v12  ;;  %v15_v32 = vld [vmem:[%s1199_s0] sm:$0xff]  ;;  %v16_v33 = vld [vmem:[%s1199_s0 + $0x8] sm:$0xff]  ;;  %v936_v42 = vld [vmem:[%s1198_s1 + $0x170] sm:$0xff]  }
   0xe   :  { %836 = vmatprep.subr.bf16.mxu1 %v909_v13  ;;  %v736_v34 = vcombine.low %v15_v32, %v15_v32  ;;  %v737_v35 = vcombine.high %v15_v32, %v15_v32  ;;  %v738_v36 = vcombine.low %v16_v33, %v16_v33  ;;  %v739_v37 = vcombine.high %v16_v33, %v16_v33  ;;  %v937_v43 = vld [vmem:[%s1198_s1 + $0x1f0] sm:$0xff]   ;;  %v940_v46 = vld [vmem:[%s1198_s1 + $0x168] sm:$0xff]   ;;  %v944_v50 = vld [vmem:[%s1198_s1 + $0x160] sm:$0xff]  }
   0xf   :  { %v938_v44 = vld [vmem:[%s1198_s1 + $0x130] sm:$0xff]   ;;  %v941_v47 = vld [vmem:[%s1198_s1 + $0x1e8] sm:$0xff]   ;;  %v945_v51 = vld [vmem:[%s1198_s1 + $0x1e0] sm:$0xff]  }
  0x10   :  { %815 = vmatpush3.bf16.msra.mxu0 %v910_v14  ;;  %598 = vmatprep.mubr.bf16.mxu0 %v737_v35  ;;  %v939_v45 = vld [vmem:[%s1198_s1 + $0x1b0] sm:$0xff]   ;;  %v942_v48 = vld [vmem:[%s1198_s1 + $0x128] sm:$0xff]   ;;  %v946_v52 = vld [vmem:[%s1198_s1 + $0x120] sm:$0xff]  }
  0x11   :  { %837 = vmatpush3.bf16.msra.mxu1 %v911_v15  ;;  %816 = vmatprep.subr.bf16.mxu0 %v912_v16  ;;  %v943_v49 = vld [vmem:[%s1198_s1 + $0x1a8] sm:$0xff]   ;;  %v947_v53 = vld [vmem:[%s1198_s1 + $0x1a0] sm:$0xff]   ;;  %v948_v54 = vld [vmem:[%s1198_s1 + $0x158] sm:$0xff]  }
  0x12   :  { %838 = vmatprep.subr.bf16.mxu1 %v913_v17  ;;  %638 = vmatprep.mubr.bf16.mxu1 %v739_v37  ;;  %v949_v55 = vld [vmem:[%s1198_s1 + $0x1d8] sm:$0xff]   ;;  %v952_v58 = vld [vmem:[%s1198_s1 + $0x150] sm:$0xff]   ;;  %v956_v62 = vld [vmem:[%s1198_s1 + $0x148] sm:$0xff]  }
  0x13   :  { %v950_v56 = vld [vmem:[%s1198_s1 + $0x118] sm:$0xff]   ;;  %v953_v59 = vld [vmem:[%s1198_s1 + $0x1d0] sm:$0xff]   ;;  %v957_v63 = vld [vmem:[%s1198_s1 + $0x1c8] sm:$0xff]  }
  0x14   :  { %817 = vmatpush3.bf16.msra.mxu0 %v914_v18  ;;  %v951_v57 = vld [vmem:[%s1198_s1 + $0x198] sm:$0xff]   ;;  %v954_v60 = vld [vmem:[%s1198_s1 + $0x110] sm:$0xff]   ;;  %v958_v0 = vld [vmem:[%s1198_s1 + $0x108] sm:$0xff]  }
  0x15   :  { %839 = vmatpush3.bf16.msra.mxu1 %v915_v19  ;;  %818 = vmatprep.subr.bf16.mxu0 %v916_v20  ;;  %v955_v61 = vld [vmem:[%s1198_s1 + $0x190] sm:$0xff]   ;;  %v959_v1 = vld [vmem:[%s1198_s1 + $0x188] sm:$0xff]   ;;  %v960_v2 = vld [vmem:[%s1198_s1 + $0x140] sm:$0xff]  }
  0x16   :  { %840 = vmatprep.subr.bf16.mxu1 %v917_v21  ;;  %v961_v3 = vld [vmem:[%s1198_s1 + $0x1c0] sm:$0xff]   ;;  %v17_v6 = vld [vmem:[%s1199_s0 + $0x10] sm:$0xff]  ;;  %v18_v9 = vld [vmem:[%s1199_s0 + $0x18] sm:$0xff] }
  0x17   :  { %v962_v4 = vld [vmem:[%s1198_s1 + $0x100] sm:$0xff]   ;;  %v740_v7 = vcombine.low %v17_v6, %v17_v6  ;;  %v741_v8 = vcombine.high %v17_v6, %v17_v6  ;;  %v742_v10 = vcombine.low %v18_v9, %v18_v9  ;;  %v743_v11 = vcombine.high %v18_v9, %v18_v9 }
  0x18   :  { %819 = vmatpush3.bf16.msra.mxu0 %v918_v22  ;;  %v963_v5 = vld [vmem:[%s1198_s1 + $0x180] sm:$0xff]  }
  0x19   :  { %841 = vmatpush3.bf16.msra.mxu1 %v919_v23  ;;  %820 = vmatprep.subr.bf16.mxu0 %v920_v24  ;;  %v735_v21 = vld [vmem:[%s1200_s2] ss:$0 sm:$0xff] }
  0x1a   :  { %842 = vmatprep.subr.bf16.mxu1 %v921_v25 }
  0x1c   :  { %821 = vmatpush3.bf16.msra.mxu0 %v922_v26 }
  0x1d   :  { %843 = vmatpush3.bf16.msra.mxu1 %v923_v27  ;;  %822 = vmatprep.subr.bf16.mxu0 %v924_v28 }
  0x1e   :  { %844 = vmatprep.subr.bf16.mxu1 %v925_v29 }
  0x20   :  { %823 = vmatpush3.bf16.msra.mxu0 %v926_v30 }
  0x21   :  { %845 = vmatpush3.bf16.msra.mxu1 %v927_v31  ;;  %852 = vmatprep.subr.bf16.mxu0 %v932_v38 }
  0x22   :  { %874 = vmatprep.subr.bf16.mxu1 %v933_v39 }
  0x23   :  { %599 = vmatmul.mubr.bf16.vlgmr.msra.gmra.mxu0 %v736_v34 }
  0x24   :  { %639 = vmatmul.mubr.bf16.vlgmr.msra.gmra.mxu1 %v738_v36  ;;  %853 = vmatpush3.bf16.msra.mxu0 %v934_v40 }
  0x25   :  { %875 = vmatpush3.bf16.msra.mxu1 %v935_v41  ;;  %854 = vmatprep.subr.bf16.mxu0 %v936_v42 }
  0x26   :  { %876 = vmatprep.subr.bf16.mxu1 %v937_v43  ;;  %678 = vmatprep.mubr.bf16.mxu0 %v741_v8 }
  0x27   :  { %718 = vmatprep.mubr.bf16.mxu1 %v743_v11 }
  0x28   :  { %855 = vmatpush3.bf16.msra.mxu0 %v938_v44 }
  0x29   :  { %877 = vmatpush3.bf16.msra.mxu1 %v939_v45  ;;  %856 = vmatprep.subr.bf16.mxu0 %v940_v46 }
  0x2a   :  { %878 = vmatprep.subr.bf16.mxu1 %v941_v47 }
  0x2c   :  { %857 = vmatpush3.bf16.msra.mxu0 %v942_v48 }
  0x2d   :  { %879 = vmatpush3.bf16.msra.mxu1 %v943_v49  ;;  %858 = vmatprep.subr.bf16.mxu0 %v944_v50 }
  0x2e   :  { %880 = vmatprep.subr.bf16.mxu1 %v945_v51 }
  0x30   :  { %859 = vmatpush3.bf16.msra.mxu0 %v946_v52 }
  0x31   :  { %881 = vmatpush3.bf16.msra.mxu1 %v947_v53  ;;  %860 = vmatprep.subr.bf16.mxu0 %v948_v54 }
  0x32   :  { %882 = vmatprep.subr.bf16.mxu1 %v949_v55 }
  0x34   :  { %861 = vmatpush3.bf16.msra.mxu0 %v950_v56 }
  0x35   :  { %883 = vmatpush3.bf16.msra.mxu1 %v951_v57  ;;  %862 = vmatprep.subr.bf16.mxu0 %v952_v58 }
  0x36   :  { %884 = vmatprep.subr.bf16.mxu1 %v953_v59 }
  0x38   :  { %863 = vmatpush3.bf16.msra.mxu0 %v954_v60 }
  0x39   :  { %885 = vmatpush3.bf16.msra.mxu1 %v955_v61  ;;  %864 = vmatprep.subr.bf16.mxu0 %v956_v62 }
  0x3a   :  { %886 = vmatprep.subr.bf16.mxu1 %v957_v63 }
  0x3c   :  { %865 = vmatpush3.bf16.msra.mxu0 %v958_v0 }
  0x3d   :  { %887 = vmatpush3.bf16.msra.mxu1 %v959_v1  ;;  %866 = vmatprep.subr.bf16.mxu0 %v960_v2 }
  0x3e   :  { %888 = vmatprep.subr.bf16.mxu1 %v961_v3 }
  0x40   :  { %867 = vmatpush3.bf16.msra.mxu0 %v962_v4 }
  0x41   :  { %889 = vmatpush3.bf16.msra.mxu1 %v963_v5 }
  0x43   :  { %679 = vmatmul.mubr.bf16.vlgmr.msra.gmra.mxu0 %v740_v7 }
  0x44   :  { %719 = vmatmul.mubr.bf16.vlgmr.msra.gmra.mxu1 %v742_v10 }
  0xe3   :  { %v824_v12 = vpop.f32.mrf.mxu0 }
  0xe4   :  { %v846_v13 = vpop.f32.mrf.mxu1 }
  0xe5   :  { %v825_v14 = vpop.f32.mrf.mxu0 }
  0xe6   :  { %v847_v15 = vpop.f32.mrf.mxu1  ;;  %v826_v20 = vadd.f32 %v825_v14, %v824_v12 }
  0xe7   :  { %v827_v16 = vpop.f32.mrf.mxu0  ;;  %v848_v23 = vadd.f32 %v847_v15, %v846_v13 }
  0xe8   :  { %v849_v17 = vpop.f32.mrf.mxu1  ;;  %v601_v22 = vadd.f32 %v826_v20, %v735_v21 }
  0xe9   :  { %v828_v18 = vpop.f32.mrf.mxu0 }
  0xea   :  { %v850_v19 = vpop.f32.mrf.mxu1  ;;  %v641_v28 = vadd.f32 %v848_v23, %v601_v22 }
 0x103   :  { %v868_v24 = vpop.f32.mrf.mxu0 }
 0x104   :  { %v890_v25 = vpop.f32.mrf.mxu1 }
 0x105   :  { %v869_v26 = vpop.f32.mrf.mxu0 }
 0x106   :  { %v891_v27 = vpop.f32.mrf.mxu1  ;;  %v870_v29 = vadd.f32 %v869_v26, %v868_v24 }
 0x107   :  { %v871_v30 = vpop.f32.mrf.mxu0  ;;  %v892_v33 = vadd.f32 %v891_v27, %v890_v25 }
 0x108   :  { %v893_v31 = vpop.f32.mrf.mxu1  ;;  %v681_v32 = vadd.f32 %v870_v29, %v641_v28 }
 0x109   :  { %v872_v34 = vpop.f32.mrf.mxu0 }
 0x10a   :  { %v894_v35 = vpop.f32.mrf.mxu1  ;;  %v721_v36 = vadd.f32 %v892_v33, %v681_v32 }
 0x10c   :  { %vm726_vm0 = vcmp.ge.f32.partialorder %v721_v36, 0.0  ;;  %v727_v37 = vmul.f32 0.01, %v721_v36 }
 0x10e   :  { %v728_v38 = vsel %vm726_vm0, %v721_v36, %v727_v37 }
 0x10f   :  { %v729_v39 = vpack.c.bf16 %v728_v38, %v728_v38 }
 0x111   :  { %730 = vst [vmem:[%s1201_s3] sm:$0xf] %v729_v39 }

// kernel: colorizer_v6_forward.21
= control target key start
LH: loop header
LB: loop body
LE: loop exit
PB: predicated region body
PF: predicated region fallthrough
CT: control target
= control target key end

     0   :  { %s628_s1 = inlined_call_operand.vmem [shape: bf16[512,128], index: 1, kind: input, shape index: {}]   ;;  %s629_s0 = inlined_call_operand.vmem [shape: bf16[8,512], index: 0, kind: input, shape index: {}]   ;;  %s630_s2 = inlined_call_operand.vmem [shape: f32[1,128], index: 2, kind: input, shape index: {}]   ;;  %s631_s3 = inlined_call_operand.vmem [shape: bf16[8,128], index: 3, kind: output, shape index: {}]  }
   0x1   :  { %v464_v0 = vld [vmem:[%s628_s1 + $0x78] sm:$0xff]   ;;  %v468_v4 = vld [vmem:[%s628_s1 + $0x70] sm:$0xff]   ;;  %v472_v8 = vld [vmem:[%s628_s1 + $0x68] sm:$0xff]  }
   0x2   :  { %v465_v1 = vld [vmem:[%s628_s1 + $0xf8] sm:$0xff]   ;;  %420 = vmatprep.subr.bf16.mxu0 %v464_v0  ;;  %v469_v5 = vld [vmem:[%s628_s1 + $0xf0] sm:$0xff]   ;;  %v473_v9 = vld [vmem:[%s628_s1 + $0xe8] sm:$0xff]  }
   0x3   :  { %v466_v2 = vld [vmem:[%s628_s1 + $0x38] sm:$0xff]   ;;  %442 = vmatprep.subr.bf16.mxu1 %v465_v1  ;;  %v470_v6 = vld [vmem:[%s628_s1 + $0x30] sm:$0xff]   ;;  %v474_v10 = vld [vmem:[%s628_s1 + $0x28] sm:$0xff]  }
   0x4   :  { %v467_v3 = vld [vmem:[%s628_s1 + $0xb8] sm:$0xff]   ;;  %421 = vmatpush3.bf16.msra.mxu0 %v466_v2  ;;  %v471_v7 = vld [vmem:[%s628_s1 + $0xb0] sm:$0xff]   ;;  %v475_v11 = vld [vmem:[%s628_s1 + $0xa8] sm:$0xff]  }
   0x5   :  { %443 = vmatpush3.bf16.msra.mxu1 %v467_v3  ;;  %422 = vmatprep.subr.bf16.mxu0 %v468_v4  ;;  %v476_v12 = vld [vmem:[%s628_s1 + $0x60] sm:$0xff]   ;;  %v480_v16 = vld [vmem:[%s628_s1 + $0x58] sm:$0xff]   ;;  %v484_v20 = vld [vmem:[%s628_s1 + $0x50] sm:$0xff]  }
   0x6   :  { %444 = vmatprep.subr.bf16.mxu1 %v469_v5  ;;  %v477_v13 = vld [vmem:[%s628_s1 + $0xe0] sm:$0xff]   ;;  %v481_v17 = vld [vmem:[%s628_s1 + $0xd8] sm:$0xff]   ;;  %v485_v21 = vld [vmem:[%s628_s1 + $0xd0] sm:$0xff]  }
   0x7   :  { %v478_v14 = vld [vmem:[%s628_s1 + $0x20] sm:$0xff]   ;;  %v482_v18 = vld [vmem:[%s628_s1 + $0x18] sm:$0xff]   ;;  %v486_v22 = vld [vmem:[%s628_s1 + $0x10] sm:$0xff]  }
   0x8   :  { %423 = vmatpush3.bf16.msra.mxu0 %v470_v6  ;;  %v479_v15 = vld [vmem:[%s628_s1 + $0xa0] sm:$0xff]   ;;  %v483_v19 = vld [vmem:[%s628_s1 + $0x98] sm:$0xff]   ;;  %v487_v23 = vld [vmem:[%s628_s1 + $0x90] sm:$0xff]  }
   0x9   :  { %445 = vmatpush3.bf16.msra.mxu1 %v471_v7  ;;  %424 = vmatprep.subr.bf16.mxu0 %v472_v8  ;;  %v488_v24 = vld [vmem:[%s628_s1 + $0x48] sm:$0xff]   ;;  %v492_v28 = vld [vmem:[%s628_s1 + $0x40] sm:$0xff]  }
   0xa   :  { %446 = vmatprep.subr.bf16.mxu1 %v473_v9  ;;  %v489_v25 = vld [vmem:[%s628_s1 + $0xc8] sm:$0xff]   ;;  %v493_v29 = vld [vmem:[%s628_s1 + $0xc0] sm:$0xff]  }
   0xb   :  { %v490_v26 = vld [vmem:[%s628_s1 + $0x8] sm:$0xff]   ;;  %v494_v30 = vld [vmem:[%s628_s1] sm:$0xff]  }
   0xc   :  { %425 = vmatpush3.bf16.msra.mxu0 %v474_v10  ;;  %v491_v27 = vld [vmem:[%s628_s1 + $0x88] sm:$0xff]   ;;  %v495_v31 = vld [vmem:[%s628_s1 + $0x80] sm:$0xff]  }
   0xd   :  { %447 = vmatpush3.bf16.msra.mxu1 %v475_v11  ;;  %426 = vmatprep.subr.bf16.mxu0 %v476_v12  ;;  %v15_v32 = vld [vmem:[%s629_s0] sm:$0xff]  ;;  %v16_v33 = vld [vmem:[%s629_s0 + $0x8] sm:$0xff] }
   0xe   :  { %448 = vmatprep.subr.bf16.mxu1 %v477_v13  ;;  %v384_v34 = vcombine.low %v15_v32, %v15_v32  ;;  %v385_v35 = vcombine.high %v15_v32, %v15_v32  ;;  %v386_v36 = vcombine.low %v16_v33, %v16_v33  ;;  %v387_v37 = vcombine.high %v16_v33, %v16_v33  ;;  %v383_v40 = vld [vmem:[%s630_s2] ss:$0 sm:$0xff] }
  0x10   :  { %427 = vmatpush3.bf16.msra.mxu0 %v478_v14  ;;  %326 = vmatprep.mubr.bf16.mxu0 %v385_v35 }
  0x11   :  { %449 = vmatpush3.bf16.msra.mxu1 %v479_v15  ;;  %428 = vmatprep.subr.bf16.mxu0 %v480_v16 }
  0x12   :  { %450 = vmatprep.subr.bf16.mxu1 %v481_v17  ;;  %366 = vmatprep.mubr.bf16.mxu1 %v387_v37 }
  0x14   :  { %429 = vmatpush3.bf16.msra.mxu0 %v482_v18 }
  0x15   :  { %451 = vmatpush3.bf16.msra.mxu1 %v483_v19  ;;  %430 = vmatprep.subr.bf16.mxu0 %v484_v20 }
  0x16   :  { %452 = vmatprep.subr.bf16.mxu1 %v485_v21 }
  0x18   :  { %431 = vmatpush3.bf16.msra.mxu0 %v486_v22 }
  0x19   :  { %453 = vmatpush3.bf16.msra.mxu1 %v487_v23  ;;  %432 = vmatprep.subr.bf16.mxu0 %v488_v24 }
  0x1a   :  { %454 = vmatprep.subr.bf16.mxu1 %v489_v25 }
  0x1c   :  { %433 = vmatpush3.bf16.msra.mxu0 %v490_v26 }
  0x1d   :  { %455 = vmatpush3.bf16.msra.mxu1 %v491_v27  ;;  %434 = vmatprep.subr.bf16.mxu0 %v492_v28 }
  0x1e   :  { %456 = vmatprep.subr.bf16.mxu1 %v493_v29 }
  0x20   :  { %435 = vmatpush3.bf16.msra.mxu0 %v494_v30 }
  0x21   :  { %457 = vmatpush3.bf16.msra.mxu1 %v495_v31 }
  0x23   :  { %327 = vmatmul.mubr.bf16.vlgmr.msra.gmra.mxu0 %v384_v34 }
  0x24   :  { %367 = vmatmul.mubr.bf16.vlgmr.msra.gmra.mxu1 %v386_v36 }
  0xe3   :  { %v436_v38 = vpop.f32.mrf.mxu0 }
  0xe4   :  { %v458_v39 = vpop.f32.mrf.mxu1 }
  0xe5   :  { %v437_v41 = vpop.f32.mrf.mxu0 }
  0xe6   :  { %v459_v42 = vpop.f32.mrf.mxu1  ;;  %v438_v43 = vadd.f32 %v437_v41, %v436_v38 }
  0xe7   :  { %v439_v44 = vpop.f32.mrf.mxu0  ;;  %v460_v47 = vadd.f32 %v459_v42, %v458_v39 }
  0xe8   :  { %v461_v45 = vpop.f32.mrf.mxu1  ;;  %v329_v46 = vadd.f32 %v438_v43, %v383_v40 }
  0xe9   :  { %v440_v48 = vpop.f32.mrf.mxu0 }
  0xea   :  { %v462_v49 = vpop.f32.mrf.mxu1  ;;  %v369_v50 = vadd.f32 %v460_v47, %v329_v46 }
  0xec   :  { %vm374_vm0 = vcmp.ge.f32.partialorder %v369_v50, 0.0  ;;  %v375_v51 = vmul.f32 0.01, %v369_v50 }
  0xee   :  { %v376_v52 = vsel %vm374_vm0, %v369_v50, %v375_v51 }
  0xef   :  { %v377_v53 = vpack.c.bf16 %v376_v52, %v376_v52 }
  0xf1   :  { %378 = vst [vmem:[%s631_s3] sm:$0xf] %v377_v53 }

// kernel: colorizer_v6_forward.25
= control target key start
LH: loop header
LB: loop body
LE: loop exit
PB: predicated region body
PF: predicated region fallthrough
CT: control target
= control target key end

     0   :  { %vm372_vm0 = vcmask 523264   ;;  %s921_s1 = inlined_call_operand.vmem [shape: bf16[576,128], index: 1, kind: input, shape index: {}]   ;;  %s922_s0 = inlined_call_operand.vmem [shape: bf16[32,576], index: 0, kind: input, shape index: {}]   ;;  %s923_s2 = inlined_call_operand.vmem [shape: f32[1,128], index: 2, kind: input, shape index: {}]   ;;  %s924_s3 = inlined_call_operand.vmem [shape: bf16[32,128], index: 3, kind: output, shape index: {}]  }
   0x1   :  { %v704_v0 = vld [vmem:[%s921_s1 + $0x78] sm:$0xff]   ;;  %v708_v4 = vld [vmem:[%s921_s1 + $0x70] sm:$0xff]   ;;  %v712_v8 = vld [vmem:[%s921_s1 + $0x68] sm:$0xff]  }
   0x2   :  { %v705_v1 = vld [vmem:[%s921_s1 + $0xf8] sm:$0xff]   ;;  %630 = vmatprep.subr.bf16.mxu0 %v704_v0  ;;  %v709_v5 = vld [vmem:[%s921_s1 + $0xf0] sm:$0xff]   ;;  %v713_v9 = vld [vmem:[%s921_s1 + $0xe8] sm:$0xff]  }
   0x3   :  { %v706_v2 = vld [vmem:[%s921_s1 + $0x38] sm:$0xff]   ;;  %658 = vmatprep.subr.bf16.mxu1 %v705_v1  ;;  %v710_v6 = vld [vmem:[%s921_s1 + $0x30] sm:$0xff]   ;;  %v714_v10 = vld [vmem:[%s921_s1 + $0x28] sm:$0xff]  }
   0x4   :  { %v707_v3 = vld [vmem:[%s921_s1 + $0xb8] sm:$0xff]   ;;  %631 = vmatpush3.bf16.msra.mxu0 %v706_v2  ;;  %v711_v7 = vld [vmem:[%s921_s1 + $0xb0] sm:$0xff]   ;;  %v715_v11 = vld [vmem:[%s921_s1 + $0xa8] sm:$0xff]  }
   0x5   :  { %659 = vmatpush3.bf16.msra.mxu1 %v707_v3  ;;  %632 = vmatprep.subr.bf16.mxu0 %v708_v4  ;;  %v716_v12 = vld [vmem:[%s921_s1 + $0x60] sm:$0xff]   ;;  %v720_v16 = vld [vmem:[%s921_s1 + $0x58] sm:$0xff]   ;;  %v724_v20 = vld [vmem:[%s921_s1 + $0x50] sm:$0xff]  }
   0x6   :  { %660 = vmatprep.subr.bf16.mxu1 %v709_v5  ;;  %v717_v13 = vld [vmem:[%s921_s1 + $0xe0] sm:$0xff]   ;;  %v721_v17 = vld [vmem:[%s921_s1 + $0xd8] sm:$0xff]   ;;  %v725_v21 = vld [vmem:[%s921_s1 + $0xd0] sm:$0xff]  }
   0x7   :  { %v718_v14 = vld [vmem:[%s921_s1 + $0x20] sm:$0xff]   ;;  %v722_v18 = vld [vmem:[%s921_s1 + $0x18] sm:$0xff]   ;;  %v726_v22 = vld [vmem:[%s921_s1 + $0x10] sm:$0xff]  }
   0x8   :  { %633 = vmatpush3.bf16.msra.mxu0 %v710_v6  ;;  %v719_v15 = vld [vmem:[%s921_s1 + $0xa0] sm:$0xff]   ;;  %v723_v19 = vld [vmem:[%s921_s1 + $0x98] sm:$0xff]   ;;  %v727_v23 = vld [vmem:[%s921_s1 + $0x90] sm:$0xff]  }
   0x9   :  { %661 = vmatpush3.bf16.msra.mxu1 %v711_v7  ;;  %634 = vmatprep.subr.bf16.mxu0 %v712_v8  ;;  %v728_v24 = vld [vmem:[%s921_s1 + $0x48] sm:$0xff]   ;;  %v732_v28 = vld [vmem:[%s921_s1 + $0x40] sm:$0xff]   ;;  %v742_v36 = vld [vmem:[%s921_s1 + $0x118] sm:$0xff]  }
   0xa   :  { %662 = vmatprep.subr.bf16.mxu1 %v713_v9  ;;  %v729_v25 = vld [vmem:[%s921_s1 + $0xc8] sm:$0xff]   ;;  %v733_v29 = vld [vmem:[%s921_s1 + $0xc0] sm:$0xff]   ;;  %v743_v37 = vld [vmem:[%s921_s1 + $0x110] sm:$0xff]  }
   0xb   :  { %v730_v26 = vld [vmem:[%s921_s1 + $0x8] sm:$0xff]   ;;  %v734_v30 = vld [vmem:[%s921_s1] sm:$0xff]  }
   0xc   :  { %635 = vmatpush3.bf16.msra.mxu0 %v714_v10  ;;  %v731_v27 = vld [vmem:[%s921_s1 + $0x88] sm:$0xff]   ;;  %v735_v31 = vld [vmem:[%s921_s1 + $0x80] sm:$0xff]  }
   0xd   :  { %663 = vmatpush3.bf16.msra.mxu1 %v715_v11  ;;  %636 = vmatprep.subr.bf16.mxu0 %v716_v12  ;;  %v736_v32 = vld [vmem:[%s922_s0] ss:$20 sps:$4 sm:$0xff]   ;;  %v738_v33 = vld [vmem:[%s922_s0 + $0x4] ss:$20 sps:$4 sm:$0xff]   ;;  %v739_v34 = vld [vmem:[%s922_s0 + $0x8] ss:$20 sps:$4 sm:$0xff]  }
   0xe   :  { %664 = vmatprep.subr.bf16.mxu1 %v717_v13  ;;  %v741_v35 = vld [vmem:[%s922_s0 + $0xc] ss:$20 sps:$4 sm:$0xff]   ;;  %411 = vmatprep.mubr.bf16.mxu0 %v738_v33  ;;  %v746_v39 = vld [vmem:[%s922_s0 + $0x34] ss:$20 sps:$4 sm:$0xff]   ;;  %v749_v42 = vld [vmem:[%s922_s0 + $0x30] ss:$20 sps:$4 sm:$0xff]  }
   0xf   :  { %460 = vmatprep.mubr.bf16.mxu1 %v741_v35  ;;  %v744_v38 = vld [vmem:[%s922_s0 + $0x2c] ss:$20 sps:$4 sm:$0xff]   ;;  %v748_v40 = vld [vmem:[%s922_s0 + $0x28] ss:$20 sps:$4 sm:$0xff]   ;;  %v752_v43 = vld [vmem:[%s922_s0 + $0x10] ss:$20 sps:$4 sm:$0xff]  }
  0x10   :  { %637 = vmatpush3.bf16.msra.mxu0 %v718_v14  ;;  %v750_v41 = vld [vmem:[%s921_s1 + $0x108] sm:$0xff]   ;;  %v751_v44 = vld [vmem:[%s921_s1 + $0x100] sm:$0xff]  }
  0x11   :  { %665 = vmatpush3.bf16.msra.mxu1 %v719_v15  ;;  %638 = vmatprep.subr.bf16.mxu0 %v720_v16  ;;  %v753_v45 = vld [vmem:[%s922_s0 + $0x38] ss:$20 sps:$4 sm:$0xff]   ;;  %v562_v58 = vld [vmem:[%s923_s2] ss:$0 sm:$0xff] }
  0x12   :  { %666 = vmatprep.subr.bf16.mxu1 %v721_v17 }
  0x14   :  { %639 = vmatpush3.bf16.msra.mxu0 %v722_v18 }
  0x15   :  { %667 = vmatpush3.bf16.msra.mxu1 %v723_v19  ;;  %640 = vmatprep.subr.bf16.mxu0 %v724_v20 }
  0x16   :  { %668 = vmatprep.subr.bf16.mxu1 %v725_v21 }
  0x18   :  { %641 = vmatpush3.bf16.msra.mxu0 %v726_v22 }
  0x19   :  { %669 = vmatpush3.bf16.msra.mxu1 %v727_v23  ;;  %642 = vmatprep.subr.bf16.mxu0 %v728_v24 }
  0x1a   :  { %670 = vmatprep.subr.bf16.mxu1 %v729_v25 }
  0x1c   :  { %643 = vmatpush3.bf16.msra.mxu0 %v730_v26 }
  0x1d   :  { %671 = vmatpush3.bf16.msra.mxu1 %v731_v27  ;;  %644 = vmatprep.subr.bf16.mxu0 %v732_v28 }
  0x1e   :  { %672 = vmatprep.subr.bf16.mxu1 %v733_v29 }
  0x20   :  { %645 = vmatpush3.bf16.msra.mxu0 %v734_v30 }
  0x21   :  { %673 = vmatpush3.bf16.msra.mxu1 %v735_v31  ;;  %692 = vmatprep.subr.bf16.mxu0 %v742_v36 }
  0x23   :  { %412 = vmatmul.mubr.bf16.vlgmr.msra.gmra.mxu0 %v736_v32 }
  0x24   :  { %461 = vmatmul.mubr.bf16.vlgmr.msra.gmra.mxu1 %v739_v34  ;;  %693 = vmatpush3.bf16.msra.mxu0 %v742_v36 }
  0x25   :  { %694 = vmatprep.subr.bf16.mxu0 %v743_v37  ;;  %419 = vmatprep.mubr.bf16.mxu0 %v744_v38 }
  0x26   :  { %468 = vmatprep.mubr.bf16.mxu1 %v746_v39 }
  0x28   :  { %695 = vmatpush3.bf16.msra.mxu0 %v743_v37 }
  0x29   :  { %696 = vmatprep.subr.bf16.mxu0 %v750_v41 }
  0x2b   :  { %420 = vmatmul.mubr.bf16.gmra.mxu0 %v748_v40 }
  0x2c   :  { %469 = vmatmul.mubr.bf16.gmra.mxu1 %v749_v42  ;;  %700 = vmatprep.mubr.msk.bf16.mxu0 %vm372_vm0, %v752_v43 }
  0x2d   :  { %697 = vmatpush3.bf16.msra.mxu0 %v750_v41 }
  0x2e   :  { %698 = vmatprep.subr.bf16.mxu0 %v751_v44 }
  0x31   :  { %699 = vmatpush3.bf16.msra.mxu0 %v751_v44 }
  0x34   :  { %701 = vmatmul.mubr.msk.bf16.vlgmr.msra.gmra.mxu0 %vm372_vm0, %v753_v45 }
  0xe3   :  { %v646_v46 = vpop.f32.mrf.mxu0 }
  0xe4   :  { %v674_v47 = vpop.f32.mrf.mxu1 }
  0xe5   :  { %v647_v48 = vpop.f32.mrf.mxu0 }
  0xe6   :  { %v675_v49 = vpop.f32.mrf.mxu1  ;;  %v648_v56 = vadd.f32 %v647_v48, %v646_v46 }
  0xe7   :  { %v649_v50 = vpop.f32.mrf.mxu0  ;;  %v676_v2 = vadd.f32 %v675_v49, %v674_v47 }
  0xe8   :  { %v677_v51 = vpop.f32.mrf.mxu1  ;;  %v414_v1 = vadd.f32 %v648_v56, %v562_v58 }
  0xe9   :  { %v650_v52 = vpop.f32.mrf.mxu0 }
  0xea   :  { %v678_v53 = vpop.f32.mrf.mxu1  ;;  %v651_v3 = vadd.f32 %v650_v52, %v649_v50  ;;  %v463_v13 = vadd.f32 %v676_v2, %v414_v1 }
  0xeb   :  { %v652_v54 = vpop.f32.mrf.mxu0  ;;  %v679_v16 = vadd.f32 %v678_v53, %v677_v51 }
  0xec   :  { %v680_v55 = vpop.f32.mrf.mxu1  ;;  %v417_v11 = vadd.f32 %v651_v3, %v562_v58 }
  0xed   :  { %v653_v57 = vpop.f32.mrf.mxu0 }
  0xee   :  { %v654_v59 = vadd.f32 %v653_v57, %v652_v54  ;;  %v681_v60 = vpop.f32.mrf.mxu1  ;;  %v466_v21 = vadd.f32 %v679_v16, %v417_v11 }
  0xef   :  { %v682_v61 = vadd.f32 %v681_v60, %v680_v55  ;;  %v655_v62 = vpop.f32.mrf.mxu0 }
  0xf0   :  { %v422_v63 = vadd.f32 %v654_v59, %v562_v58  ;;  %v683_v0 = vpop.f32.mrf.mxu1 }
  0xf1   :  { %v656_v4 = vpop.f32.mrf.mxu0 }
  0xf2   :  { %v657_v5 = vadd.f32 %v656_v4, %v655_v62  ;;  %v684_v6 = vpop.f32.mrf.mxu1  ;;  %v471_v7 = vadd.f32 %v682_v61, %v422_v63 }
  0xf3   :  { %v685_v9 = vadd.f32 %v684_v6, %v683_v0 }
  0xf4   :  { %v425_v8 = vadd.f32 %v657_v5, %v562_v58  ;;  %v702_v10 = vpop.f32.mrf.mxu0 }
  0xf5   :  { %v520_v12 = vadd.f32 %v702_v10, %v471_v7 }
  0xf6   :  { %v511_v14 = vpop.f32.mrf.mxu0  ;;  %v474_v15 = vadd.f32 %v685_v9, %v425_v8 }
  0xf7   :  { %v512_v17 = vadd.f32 %v511_v14, %v463_v13  ;;  %v532_v19 = vmul.f32 0.01, %v520_v12  ;;  %vm528_vm1 = vcmp.ge.f32.partialorder %v520_v12, 0.0 }
  0xf8   :  { %v703_v18 = vpop.f32.mrf.mxu0 }
  0xf9   :  { %v523_v20 = vadd.f32 %v703_v18, %v474_v15  ;;  %v530_v23 = vmul.f32 0.01, %v512_v17  ;;  %vm526_vm3 = vcmp.ge.f32.partialorder %v512_v17, 0.0  ;;  %v536_v26 = vsel %vm528_vm1, %v520_v12, %v532_v19 }
  0xfa   :  { %v514_v22 = vpop.f32.mrf.mxu0 }
  0xfb   :  { %vm529_vm2 = vcmp.ge.f32.partialorder %v523_v20, 0.0  ;;  %v533_v24 = vmul.f32 0.01, %v523_v20  ;;  %v515_v25 = vadd.f32 %v514_v22, %v466_v21  ;;  %v534_v30 = vsel %vm526_vm3, %v512_v17, %v530_v23 }
  0xfd   :  { %v537_v27 = vsel %vm529_vm2, %v523_v20, %v533_v24  ;;  %vm527_vm4 = vcmp.ge.f32.partialorder %v515_v25, 0.0  ;;  %v531_v28 = vmul.f32 0.01, %v515_v25 }
  0xfe   :  { %v627_v29 = vpack.c.bf16 %v537_v27, %v536_v26 }
  0xff   :  { %v535_v31 = vsel %vm527_vm4, %v515_v25, %v531_v28 }
 0x100   :  { %629 = vst [vmem:[%s924_s3 + $0x8] sm:$0xff] %v627_v29   ;;  %v622_v32 = vpack.c.bf16 %v535_v31, %v534_v30 }
 0x102   :  { %623 = vst [vmem:[%s924_s3] sm:$0xff] %v622_v32  }

// kernel: colorizer_v6_forward.26
= control target key start
LH: loop header
LB: loop body
LE: loop exit
PB: predicated region body
PF: predicated region fallthrough
CT: control target
= control target key end

     0   :  { %vm318_vm0 = vcmask 261120   ;;  %s1060_s1 = inlined_call_operand.vmem [shape: bf16[288,128], index: 1, kind: input, shape index: {}]   ;;  %s1061_s0 = inlined_call_operand.vmem [shape: bf16[128,288], index: 0, kind: input, shape index: {}]   ;;  %s1062_s2 = inlined_call_operand.vmem [shape: f32[1,128], index: 2, kind: input, shape index: {}]   ;;  %s1063_s3 = inlined_call_operand.vmem [shape: f32[128,128], index: 3, kind: output, shape index: {}]  }
   0x1   :  { %v734_v0 = vld [vmem:[%s1060_s1 + $0x78] sm:$0xff]   ;;  %v736_v2 = vld [vmem:[%s1060_s1 + $0x70] sm:$0xff]   ;;  %v738_v4 = vld [vmem:[%s1060_s1 + $0x68] sm:$0xff]  }
   0x2   :  { %v735_v1 = vld [vmem:[%s1060_s1 + $0x38] sm:$0xff]   ;;  %624 = vmatprep.subr.bf16.mxu0 %v734_v0  ;;  %718 = vmatprep.subr.bf16.mxu1 %v734_v0  ;;  %v737_v3 = vld [vmem:[%s1060_s1 + $0x30] sm:$0xff]   ;;  %v739_v5 = vld [vmem:[%s1060_s1 + $0x28] sm:$0xff]  }
   0x3   :  { %625 = vmatpush3.bf16.msra.mxu0 %v735_v1  ;;  %726 = vmatpush3.bf16.msra.mxu1 %v735_v1  ;;  %v740_v6 = vld [vmem:[%s1060_s1 + $0x60] sm:$0xff]   ;;  %v742_v8 = vld [vmem:[%s1060_s1 + $0x58] sm:$0xff]   ;;  %v744_v10 = vld [vmem:[%s1060_s1 + $0x50] sm:$0xff]  }
   0x4   :  { %626 = vmatprep.subr.bf16.mxu0 %v736_v2  ;;  %719 = vmatprep.subr.bf16.mxu1 %v736_v2  ;;  %v741_v7 = vld [vmem:[%s1060_s1 + $0x20] sm:$0xff]   ;;  %v743_v9 = vld [vmem:[%s1060_s1 + $0x18] sm:$0xff]   ;;  %v745_v13 = vld [vmem:[%s1060_s1 + $0x10] sm:$0xff]  }
   0x5   :  { %v752_v11 = vld [vmem:[%s1061_s0 + $0x4] ss:$12 sps:$4 sm:$0xff]   ;;  %v755_v12 = vld [vmem:[%s1061_s0 + $0x94] ss:$12 sps:$4 sm:$0xff]   ;;  %v746_v14 = vld [vmem:[%s1060_s1 + $0x48] sm:$0xff]  }
   0x6   :  { %375 = vmatprep.mubr.bf16.mxu0 %v752_v11  ;;  %423 = vmatprep.mubr.bf16.mxu1 %v755_v12  ;;  %v747_v15 = vld [vmem:[%s1060_s1 + $0x8] sm:$0xff]   ;;  %v748_v16 = vld [vmem:[%s1060_s1 + $0x40] sm:$0xff]   ;;  %v753_v20 = vld [vmem:[%s1061_s0 + $0x90] ss:$12 sps:$4 sm:$0xff]  }
   0x7   :  { %627 = vmatpush3.bf16.msra.mxu0 %v737_v3  ;;  %727 = vmatpush3.bf16.msra.mxu1 %v737_v3  ;;  %v749_v17 = vld [vmem:[%s1060_s1] sm:$0xff]   ;;  %v756_v19 = vld [vmem:[%s1060_s1 + $0x88] sm:$0xff]   ;;  %v767_v28 = vld [vmem:[%s1061_s0 + $0x30] ss:$12 sps:$4 sm:$0xff]  }
   0x8   :  { %628 = vmatprep.subr.bf16.mxu0 %v738_v4  ;;  %720 = vmatprep.subr.bf16.mxu1 %v738_v4  ;;  %v750_v18 = vld [vmem:[%s1061_s0] ss:$12 sps:$4 sm:$0xff]   ;;  %v757_v21 = vld [vmem:[%s1061_s0 + $0x1c] ss:$12 sps:$4 sm:$0xff]   ;;  %v761_v24 = vld [vmem:[%s1061_s0 + $0x18] ss:$12 sps:$4 sm:$0xff]  }
   0x9   :  { %v759_v22 = vld [vmem:[%s1061_s0 + $0xac] ss:$12 sps:$4 sm:$0xff]   ;;  %v763_v23 = vld [vmem:[%s1060_s1 + $0x80] sm:$0xff]   ;;  %v762_v25 = vld [vmem:[%s1061_s0 + $0xa8] ss:$12 sps:$4 sm:$0xff]  }
   0xa   :  { %v764_v26 = vld [vmem:[%s1061_s0 + $0x34] ss:$12 sps:$4 sm:$0xff]   ;;  %v769_v30 = vld [vmem:[%s1061_s0 + $0x4c] ss:$12 sps:$4 sm:$0xff]   ;;  %v773_v33 = vld [vmem:[%s1061_s0 + $0x50] ss:$12 sps:$4 sm:$0xff]  }
   0xb   :  { %629 = vmatpush3.bf16.msra.mxu0 %v739_v5  ;;  %728 = vmatpush3.bf16.msra.mxu1 %v739_v5  ;;  %v766_v27 = vld [vmem:[%s1061_s0 + $0x8] ss:$12 sps:$4 sm:$0xff]   ;;  %v768_v29 = vld [vmem:[%s1061_s0 + $0x20] ss:$12 sps:$4 sm:$0xff]   ;;  %v771_v31 = vld [vmem:[%s1061_s0 + $0x38] ss:$12 sps:$4 sm:$0xff]  }
   0xc   :  { %630 = vmatprep.subr.bf16.mxu0 %v740_v6  ;;  %721 = vmatprep.subr.bf16.mxu1 %v740_v6  ;;  %v772_v32 = vld [vmem:[%s1061_s0 + $0x48] ss:$12 sps:$4 sm:$0xff]   ;;  %v774_v34 = vld [vmem:[%s1061_s0 + $0x64] ss:$12 sps:$4 sm:$0xff]   ;;  %v777_v36 = vld [vmem:[%s1061_s0 + $0x60] ss:$12 sps:$4 sm:$0xff]  }
   0xd   :  { %v776_v35 = vld [vmem:[%s1061_s0 + $0x68] ss:$12 sps:$4 sm:$0xff]   ;;  %v778_v37 = vld [vmem:[%s1061_s0 + $0x80] ss:$12 sps:$4 sm:$0xff]   ;;  %v781_v39 = vld [vmem:[%s1061_s0 + $0x98] ss:$12 sps:$4 sm:$0xff]  }
   0xe   :  { %v779_v38 = vld [vmem:[%s1061_s0 + $0x7c] ss:$12 sps:$4 sm:$0xff]   ;;  %v782_v40 = vld [vmem:[%s1061_s0 + $0x78] ss:$12 sps:$4 sm:$0xff]   ;;  %v987_v60 = vld [vmem:[%s1062_s2] ss:$0 sm:$0xff] }
   0xf   :  { %631 = vmatpush3.bf16.msra.mxu0 %v741_v7  ;;  %729 = vmatpush3.bf16.msra.mxu1 %v741_v7  ;;  %v783_v41 = vld [vmem:[%s1061_s0 + $0xb0] ss:$12 sps:$4 sm:$0xff]  }
  0x10   :  { %632 = vmatprep.subr.bf16.mxu0 %v742_v8  ;;  %722 = vmatprep.subr.bf16.mxu1 %v742_v8 }
  0x13   :  { %633 = vmatpush3.bf16.msra.mxu0 %v743_v9  ;;  %730 = vmatpush3.bf16.msra.mxu1 %v743_v9 }
  0x14   :  { %634 = vmatprep.subr.bf16.mxu0 %v744_v10  ;;  %723 = vmatprep.subr.bf16.mxu1 %v744_v10 }
  0x17   :  { %635 = vmatpush3.bf16.msra.mxu0 %v745_v13  ;;  %731 = vmatpush3.bf16.msra.mxu1 %v745_v13 }
  0x18   :  { %636 = vmatprep.subr.bf16.mxu0 %v746_v14  ;;  %724 = vmatprep.subr.bf16.mxu1 %v746_v14 }
  0x1b   :  { %637 = vmatpush3.bf16.msra.mxu0 %v747_v15  ;;  %732 = vmatpush3.bf16.msra.mxu1 %v747_v15 }
  0x1c   :  { %638 = vmatprep.subr.bf16.mxu0 %v748_v16  ;;  %725 = vmatprep.subr.bf16.mxu1 %v748_v16 }
  0x1f   :  { %639 = vmatpush3.bf16.msra.mxu0 %v749_v17  ;;  %733 = vmatpush3.bf16.msra.mxu1 %v749_v17 }
  0x20   :  { %698 = vmatprep.subr.bf16.mxu1 %v756_v19 }
  0x22   :  { %376 = vmatmul.mubr.bf16.vlgmr.msra.gmra.mxu0 %v750_v18  ;;  %424 = vmatmul.mubr.bf16.vlgmr.msra.gmra.mxu1 %v753_v20 }
  0x23   :  { %699 = vmatpush3.bf16.msra.mxu1 %v756_v19  ;;  %383 = vmatprep.mubr.bf16.mxu0 %v757_v21 }
  0x24   :  { %431 = vmatprep.mubr.bf16.mxu1 %v759_v22  ;;  %700 = vmatprep.subr.bf16.mxu1 %v763_v23 }
  0x27   :  { %701 = vmatpush3.bf16.msra.mxu1 %v763_v23 }
  0x2a   :  { %384 = vmatmul.mubr.bf16.gmra.mxu0 %v761_v24  ;;  %432 = vmatmul.mubr.bf16.gmra.mxu1 %v762_v25 }
  0x2b   :  { %391 = vmatprep.mubr.bf16.mxu0 %v764_v26  ;;  %702 = vmatprep.mubr.msk.bf16.mxu1 %vm318_vm0, %v766_v27 }
  0x32   :  { %392 = vmatmul.mubr.bf16.gmra.mxu0 %v767_v28  ;;  %703 = vmatmul.mubr.msk.bf16.vlgmr.msra.gmra.mxu1 %vm318_vm0, %v768_v29 }
  0x33   :  { %399 = vmatprep.mubr.bf16.mxu0 %v769_v30  ;;  %706 = vmatprep.mubr.msk.bf16.mxu1 %vm318_vm0, %v771_v31 }
  0x3a   :  { %400 = vmatmul.mubr.bf16.gmra.mxu0 %v772_v32  ;;  %707 = vmatmul.mubr.msk.bf16.gmra.mxu1 %vm318_vm0, %v773_v33 }
  0x3b   :  { %407 = vmatprep.mubr.bf16.mxu0 %v774_v34  ;;  %710 = vmatprep.mubr.msk.bf16.mxu1 %vm318_vm0, %v776_v35 }
  0x42   :  { %408 = vmatmul.mubr.bf16.gmra.mxu0 %v777_v36  ;;  %711 = vmatmul.mubr.msk.bf16.gmra.mxu1 %vm318_vm0, %v778_v37 }
  0x43   :  { %415 = vmatprep.mubr.bf16.mxu0 %v779_v38  ;;  %714 = vmatprep.mubr.msk.bf16.mxu1 %vm318_vm0, %v781_v39 }
  0x4a   :  { %416 = vmatmul.mubr.bf16.gmra.mxu0 %v782_v40  ;;  %715 = vmatmul.mubr.msk.bf16.gmra.mxu1 %vm318_vm0, %v783_v41 }
  0xe2   :  { %v640_v42 = vpop.f32.mrf.mxu0  ;;  %v970_v43 = vpop.f32.mrf.mxu1 }
  0xe4   :  { %v641_v44 = vpop.f32.mrf.mxu0  ;;  %v972_v45 = vpop.f32.mrf.mxu1 }
  0xe5   :  { %v642_v57 = vadd.f32 %v641_v44, %v640_v42 }
  0xe6   :  { %v643_v46 = vpop.f32.mrf.mxu0  ;;  %v974_v47 = vpop.f32.mrf.mxu1 }
  0xe7   :  { %v378_v3 = vadd.f32 %v642_v57, %v987_v60 }
  0xe8   :  { %v644_v48 = vpop.f32.mrf.mxu0  ;;  %v976_v49 = vpop.f32.mrf.mxu1 }
  0xe9   :  { %v645_v1 = vadd.f32 %v644_v48, %v643_v46  ;;  %v678_v46 = vadd.f32 %v972_v45, %v970_v43 }
  0xea   :  { %v646_v50 = vpop.f32.mrf.mxu0  ;;  %v978_v51 = vpop.f32.mrf.mxu1 }
  0xeb   :  { %v381_v12 = vadd.f32 %v645_v1, %v987_v60 }
  0xec   :  { %v647_v52 = vpop.f32.mrf.mxu0  ;;  %v683_v53 = vpop.f32.mrf.mxu1 }
  0xed   :  { %v648_v54 = vadd.f32 %v647_v52, %v646_v50  ;;  %v684_v40 = vadd.f32 %v683_v53, %v978_v51 }
  0xee   :  { %v649_v55 = vpop.f32.mrf.mxu0  ;;  %v980_v56 = vpop.f32.mrf.mxu1 }
  0xef   :  { %v386_v62 = vadd.f32 %v648_v54, %v987_v60  ;;  %v434_v57 = vadd.f32 %v684_v40, %v987_v60 }
  0xf0   :  { %v650_v58 = vpop.f32.mrf.mxu0  ;;  %v982_v59 = vpop.f32.mrf.mxu1 }
  0xf1   :  { %v651_v61 = vadd.f32 %v650_v58, %v649_v55  ;;  %v687_v53 = vadd.f32 %v982_v59, %v980_v56 }
  0xf2   :  { %v652_v63 = vpop.f32.mrf.mxu0  ;;  %v704_v0 = vpop.f32.mrf.mxu1 }
  0xf3   :  { %v483_v2 = vadd.f32 %v704_v0, %v386_v62  ;;  %v389_v7 = vadd.f32 %v651_v61, %v987_v60  ;;  %v426_v62 = vadd.f32 %v678_v46, %v987_v60 }
  0xf4   :  { %v653_v4 = vpop.f32.mrf.mxu0  ;;  %v474_v5 = vpop.f32.mrf.mxu1 }
  0xf5   :  { %784 = vtanh.f32 %v483_v2  ;;  %v475_v6 = vadd.f32 %v474_v5, %v378_v3  ;;  %v654_v10 = vadd.f32 %v653_v4, %v652_v63  ;;  %v681_v63 = vadd.f32 %v976_v49, %v974_v47 }
  0xf6   :  { %v655_v8 = vpop.f32.mrf.mxu0  ;;  %v705_v9 = vpop.f32.mrf.mxu1  ;;  %v437_v3 = vadd.f32 %v687_v53, %v987_v60 }
  0xf7   :  { %786 = vtanh.f32 %v475_v6  ;;  %v486_v11 = vadd.f32 %v705_v9, %v389_v7  ;;  %v394_v19 = vadd.f32 %v654_v10, %v987_v60  ;;  %v429_v9 = vadd.f32 %v681_v63, %v987_v60 }
  0xf8   :  { %v656_v13 = vpop.f32.mrf.mxu0  ;;  %v477_v14 = vpop.f32.mrf.mxu1 }
  0xf9   :  { %788 = vtanh.f32 %v486_v11  ;;  %v478_v15 = vadd.f32 %v477_v14, %v381_v12  ;;  %v657_v18 = vadd.f32 %v656_v13, %v655_v8 }
  0xfa   :  { %v658_v16 = vpop.f32.mrf.mxu0  ;;  %v708_v17 = vpop.f32.mrf.mxu1 }
  0xfb   :  { %790 = vtanh.f32 %v478_v15  ;;  %v397_v27 = vadd.f32 %v657_v18, %v987_v60 }
  0xfc   :  { %v659_v20 = vpop.f32.mrf.mxu0  ;;  %v490_v21 = vpop.f32.mrf.mxu1 }
  0xfd   :  { %v660_v22 = vadd.f32 %v659_v20, %v658_v16  ;;  %v491_v23 = vadd.f32 %v490_v21, %v394_v19 }
  0xfe   :  { %v661_v24 = vpop.f32.mrf.mxu0  ;;  %v709_v25 = vpop.f32.mrf.mxu1 }
  0xff   :  { %v402_v26 = vadd.f32 %v660_v22, %v987_v60  ;;  %792 = vtanh.f32 %v491_v23 }
 0x100   :  { %v662_v28 = vpop.f32.mrf.mxu0  ;;  %v493_v29 = vpop.f32.mrf.mxu1 }
 0x101   :  { %v499_v30 = vadd.f32 %v708_v17, %v402_v26  ;;  %v663_v31 = vadd.f32 %v662_v28, %v661_v24  ;;  %v494_v32 = vadd.f32 %v493_v29, %v397_v27 }
 0x102   :  { %v785_v33 = vpop.eup %784  ;;  %v664_v34 = vpop.f32.mrf.mxu0 }
 0x103   :  { %v712_v35 = vpop.f32.mrf.mxu1  ;;  %555 = vst [vmem:[%s1063_s3 + $0x10] sm:$0xff] %v785_v33  ;;  %794 = vtanh.f32 %v499_v30  ;;  %v405_v36 = vadd.f32 %v663_v31, %v987_v60 }
 0x104   :  { %v787_v37 = vpop.eup %786  ;;  %796 = vtanh.f32 %v494_v32  ;;  %v665_v38 = vpop.f32.mrf.mxu0 }
 0x105   :  { %v506_v39 = vpop.f32.mrf.mxu1  ;;  %553 = vst [vmem:[%s1063_s3] sm:$0xff] %v787_v37  ;;  %v502_v41 = vadd.f32 %v709_v25, %v405_v36  ;;  %v666_v42 = vadd.f32 %v665_v38, %v664_v34 }
 0x106   :  { %v789_v44 = vpop.eup %788  ;;  %v667_v48 = vpop.f32.mrf.mxu0 }
 0x107   :  { %v713_v50 = vpop.f32.mrf.mxu1  ;;  %556 = vst [vmem:[%s1063_s3 + $0x18] sm:$0xff] %v789_v44  ;;  %798 = vtanh.f32 %v502_v41  ;;  %v410_v52 = vadd.f32 %v666_v42, %v987_v60 }
 0x108   :  { %v791_v51 = vpop.eup %790  ;;  %v668_v54 = vpop.f32.mrf.mxu0 }
 0x109   :  { %v509_v55 = vpop.f32.mrf.mxu1  ;;  %554 = vst [vmem:[%s1063_s3 + $0x8] sm:$0xff] %v791_v51  ;;  %v507_v43 = vadd.f32 %v506_v39, %v410_v52  ;;  %v669_v45 = vadd.f32 %v668_v54, %v667_v48 }
 0x10a   :  { %v670_v58 = vpop.f32.mrf.mxu0 }
 0x10b   :  { %v716_v61 = vpop.f32.mrf.mxu1  ;;  %800 = vtanh.f32 %v507_v43  ;;  %v413_v56 = vadd.f32 %v669_v45, %v987_v60 }
 0x10c   :  { %v531_v59 = vadd.f32 %v716_v61, %v434_v57  ;;  %v793_v0 = vpop.eup %792  ;;  %v671_v1 = vpop.f32.mrf.mxu0 }
 0x10d   :  { %v522_v2 = vpop.f32.mrf.mxu1  ;;  %557 = vst [vmem:[%s1063_s3 + $0x20] sm:$0xff] %v793_v0  ;;  %v510_v4 = vadd.f32 %v509_v55, %v413_v56  ;;  %v672_v5 = vadd.f32 %v671_v1, %v670_v58 }
 0x10e   :  { %802 = vtanh.f32 %v531_v59  ;;  %v523_v6 = vadd.f32 %v522_v2, %v426_v62  ;;  %v673_v7 = vpop.f32.mrf.mxu0 }
 0x10f   :  { %v717_v8 = vpop.f32.mrf.mxu1  ;;  %804 = vtanh.f32 %v510_v4  ;;  %v418_v47 = vadd.f32 %v672_v5, %v987_v60 }
 0x110   :  { %v534_v49 = vadd.f32 %v717_v8, %v437_v3  ;;  %v795_v10 = vpop.eup %794  ;;  %806 = vtanh.f32 %v523_v6  ;;  %v674_v11 = vpop.f32.mrf.mxu0 }
 0x111   :  { %v525_v12 = vpop.f32.mrf.mxu1  ;;  %v797_v13 = vpop.eup %796  ;;  %559 = vst [vmem:[%s1063_s3 + $0x30] sm:$0xff] %v795_v10  ;;  %v515_v14 = vadd.f32 %v712_v35, %v418_v47  ;;  %v675_v15 = vadd.f32 %v674_v11, %v673_v7 }
 0x112   :  { %808 = vtanh.f32 %v534_v49  ;;  %v526_v16 = vadd.f32 %v525_v12, %v429_v9  ;;  %558 = vst [vmem:[%s1063_s3 + $0x28] sm:$0xff] %v797_v13 }
 0x113   :  { %810 = vtanh.f32 %v515_v14  ;;  %v421_v17 = vadd.f32 %v675_v15, %v987_v60 }
 0x114   :  { %v799_v18 = vpop.eup %798  ;;  %812 = vtanh.f32 %v526_v16 }
 0x115   :  { %560 = vst [vmem:[%s1063_s3 + $0x38] sm:$0xff] %v799_v18  ;;  %v518_v19 = vadd.f32 %v713_v50, %v421_v17 }
 0x117   :  { %814 = vtanh.f32 %v518_v19 }
 0x118   :  { %v801_v20 = vpop.eup %800 }
 0x119   :  { %561 = vst [vmem:[%s1063_s3 + $0x40] sm:$0xff] %v801_v20 }
 0x11b   :  { %v803_v21 = vpop.eup %802 }
 0x11c   :  { %567 = vst [vmem:[%s1063_s3 + $0x70] sm:$0xff] %v803_v21  ;;  %v805_v22 = vpop.eup %804 }
 0x11d   :  { %v807_v60 = vpop.eup %806  ;;  %562 = vst [vmem:[%s1063_s3 + $0x48] sm:$0xff] %v805_v22 }
 0x11e   :  { %565 = vst [vmem:[%s1063_s3 + $0x60] sm:$0xff] %v807_v60 }
 0x11f   :  { %v809_v23 = vpop.eup %808 }
 0x120   :  { %568 = vst [vmem:[%s1063_s3 + $0x78] sm:$0xff] %v809_v23  ;;  %v811_v24 = vpop.eup %810 }
 0x121   :  { %v813_v25 = vpop.eup %812  ;;  %563 = vst [vmem:[%s1063_s3 + $0x50] sm:$0xff] %v811_v24 }
 0x122   :  { %566 = vst [vmem:[%s1063_s3 + $0x68] sm:$0xff] %v813_v25 }
 0x124   :  { %v815_v26 = vpop.eup %814 }
 0x125   :  { %564 = vst [vmem:[%s1063_s3 + $0x58] sm:$0xff] %v815_v26 }

// kernel: colorizer_v6_forward.16
= control target key start
LH: loop header
LB: loop body
LE: loop exit
PB: predicated region body
PF: predicated region fallthrough
CT: control target
= control target key end

     0   :  { %8 = vsyncpa [#allocation3], 0  ;;  %s10904_s0 = inlined_call_operand.vmem [shape: bf16[8,8192], index: 0, kind: input, shape index: {}]   ;;  %s10905_s1 = inlined_call_operand.hbm [shape: bf16[8192,256], index: 1, kind: input, shape index: {}]   ;;  %s10906_s2 = inlined_call_operand.hbm [shape: f32[1,256], index: 2, kind: input, shape index: {}]   ;;  %s10907_s3 = inlined_call_operand.vmem [shape: bf16[8,256], index: 3, kind: output, shape index: {}]  }
   0x1   :  { %9 = vsyncpa [#allocation5], 0  ;;  %s10523_s12 = smov [#allocation2]  }
   0x2   :  { %s17_s13 = sshll.u32 %s10523_s12, 4  ;;  %s18_s13 = int_to_ptr.vmem [resolvable:$true] %s17_s13 }
   0x3   :  { %s10487_s14 = scalar_lea.vmem %s18_s13, 131072  ;;  %p10492_p1 = scmp.lt.s32.totalorder %s18_s13, %s18_s13 }
   0x4   :  { %p10488_p0 = scmp.ne.s32.totalorder %s18_s13, %s10487_s14  ;;  %p10493_p2 = scmp.lt.s32.totalorder %s10487_s14, %s10487_s14 }
   0x6   :  { %p10494_p3 = por %p10493_p2, %p10492_p1 }
   0x8   :  { %p10495_p4 = pnand %p10494_p3, %p10488_p0 }
   0xa   :  { %10498 = shalt.err (!%p10495_p4)
}
   0xb   :  { %s10524_s15 = smov 128   ;;  %s10525_s16 = smov 8  }
   0xc   :  { %23 = dma.hbm_to_vmem [thread:$0]  %s10905_s1, 131072, %s18_s13, [#allocation3], %s10524_s15, %s10524_s15, %s10525_s16  }
   0xd   :  { %s10526_s19 = smov [#allocation4]  }
   0xe   :  { %s30_s20 = sshll.u32 %s10526_s19, 4  ;;  %s31_s20 = int_to_ptr.vmem [resolvable:$true] %s30_s20 }
   0xf   :  { %s10507_s21 = scalar_lea.vmem %s31_s20, 32  ;;  %p10512_p6 = scmp.lt.s32.totalorder %s31_s20, %s31_s20 }
  0x10   :  { %p10508_p5 = scmp.ne.s32.totalorder %s31_s20, %s10507_s21  ;;  %p10513_p7 = scmp.lt.s32.totalorder %s10507_s21, %s10507_s21 }
  0x12   :  { %p10514_p8 = por %p10513_p7, %p10512_p6 }
  0x14   :  { %p10515_p9 = pnand %p10514_p8, %p10508_p5 }
  0x16   :  { %10518 = shalt.err (!%p10515_p9)
}
  0x17   :  { %33 = dma.hbm_to_vmem [thread:$0]  %s10906_s2, 32, %s31_s20, [#allocation5]  }
  0x18   :  { %10519 = dma.done.wait [#allocation3], 131072  }
  0x19   :  { %10520 = vsyncadd [#allocation3], 4294836224 }
  0x1a   :  { %10521 = dma.done.wait [#allocation5], 32  }
  0x1b   :  { %10522 = vsyncadd [#allocation5], 4294967264  ;;  %v8879_v0 = vld [vmem:[#allocation2 + $0x74] ss:$8 sps:$4 sm:$0xff]   ;;  %v8883_v2 = vld [vmem:[#allocation2 + $0x70] ss:$8 sps:$4 sm:$0xff]  }
  0x1c   :  { %v8881_v1 = vld [vmem:[#allocation2 + $0x174] ss:$8 sps:$4 sm:$0xff]   ;;  %6452 = vmatprep.subr.bf16.mxu0 %v8879_v0  ;;  %v8884_v3 = vld [vmem:[#allocation2 + $0x170] ss:$8 sps:$4 sm:$0xff]   ;;  %v8885_v4 = vld [vmem:[#allocation2 + $0x64] ss:$8 sps:$4 sm:$0xff]  }
  0x1d   :  { %6493 = vmatprep.subr.bf16.mxu1 %v8881_v1  ;;  %6453 = vmatpush1.bf16.msra.mxu0 %v8883_v2  ;;  %v8887_v5 = vld [vmem:[#allocation2 + $0x164] ss:$8 sps:$4 sm:$0xff]   ;;  %v8889_v6 = vld [vmem:[#allocation2 + $0x60] ss:$8 sps:$4 sm:$0xff]   ;;  %v8891_v8 = vld [vmem:[#allocation2 + $0x54] ss:$8 sps:$4 sm:$0xff]  }
  0x1e   :  { %6494 = vmatpush1.bf16.msra.mxu1 %v8884_v3  ;;  %6454 = vmatprep.subr.bf16.mxu0 %v8885_v4  ;;  %v8890_v7 = vld [vmem:[#allocation2 + $0x160] ss:$8 sps:$4 sm:$0xff]   ;;  %v8893_v9 = vld [vmem:[#allocation2 + $0x154] ss:$8 sps:$4 sm:$0xff]   ;;  %v8895_v10 = vld [vmem:[#allocation2 + $0x50] ss:$8 sps:$4 sm:$0xff]  }
  0x1f   :  { %6495 = vmatprep.subr.bf16.mxu1 %v8887_v5  ;;  %v8896_v11 = vld [vmem:[#allocation2 + $0x150] ss:$8 sps:$4 sm:$0xff]   ;;  %v8897_v12 = vld [vmem:[#allocation2 + $0x44] ss:$8 sps:$4 sm:$0xff]   ;;  %v8901_v14 = vld [vmem:[#allocation2 + $0x40] ss:$8 sps:$4 sm:$0xff]  }
  0x20   :  { %v8899_v13 = vld [vmem:[#allocation2 + $0x144] ss:$8 sps:$4 sm:$0xff]   ;;  %v8902_v15 = vld [vmem:[#allocation2 + $0x140] ss:$8 sps:$4 sm:$0xff]   ;;  %v8903_v16 = vld [vmem:[#allocation2 + $0x34] ss:$8 sps:$4 sm:$0xff]  }
  0x21   :  { %6455 = vmatpush1.bf16.msra.mxu0 %v8889_v6  ;;  %v8905_v17 = vld [vmem:[#allocation2 + $0x134] ss:$8 sps:$4 sm:$0xff]   ;;  %v8907_v18 = vld [vmem:[#allocation2 + $0x30] ss:$8 sps:$4 sm:$0xff]   ;;  %v8909_v20 = vld [vmem:[#allocation2 + $0x24] ss:$8 sps:$4 sm:$0xff]  }
  0x22   :  { %6496 = vmatpush1.bf16.msra.mxu1 %v8890_v7  ;;  %6456 = vmatprep.subr.bf16.mxu0 %v8891_v8  ;;  %v8908_v19 = vld [vmem:[#allocation2 + $0x130] ss:$8 sps:$4 sm:$0xff]   ;;  %v8911_v21 = vld [vmem:[#allocation2 + $0x124] ss:$8 sps:$4 sm:$0xff]   ;;  %v8913_v22 = vld [vmem:[#allocation2 + $0x20] ss:$8 sps:$4 sm:$0xff]  }
  0x23   :  { %6497 = vmatprep.subr.bf16.mxu1 %v8893_v9  ;;  %v8914_v23 = vld [vmem:[#allocation2 + $0x120] ss:$8 sps:$4 sm:$0xff]   ;;  %v8915_v24 = vld [vmem:[#allocation2 + $0x14] ss:$8 sps:$4 sm:$0xff]   ;;  %v8919_v26 = vld [vmem:[#allocation2 + $0x10] ss:$8 sps:$4 sm:$0xff]  }
  0x24   :  { %v8917_v25 = vld [vmem:[#allocation2 + $0x114] ss:$8 sps:$4 sm:$0xff]   ;;  %v8920_v27 = vld [vmem:[#allocation2 + $0x110] ss:$8 sps:$4 sm:$0xff]   ;;  %v8921_v28 = vld [vmem:[#allocation2 + $0x4] ss:$8 sps:$4 sm:$0xff]  }
  0x25   :  { %6457 = vmatpush1.bf16.msra.mxu0 %v8895_v10  ;;  %v8923_v29 = vld [vmem:[#allocation2 + $0x104] ss:$8 sps:$4 sm:$0xff]   ;;  %v8925_v30 = vld [vmem:[#allocation2] ss:$8 sps:$4 sm:$0xff]   ;;  %v8927_v32 = vld [vmem:[#allocation2 + $0xf4] ss:$8 sps:$4 sm:$0xff]  }
  0x26   :  { %6498 = vmatpush1.bf16.msra.mxu1 %v8896_v11  ;;  %6458 = vmatprep.subr.bf16.mxu0 %v8897_v12  ;;  %v8926_v31 = vld [vmem:[#allocation2 + $0x100] ss:$8 sps:$4 sm:$0xff]   ;;  %v8929_v33 = vld [vmem:[#allocation2 + $0x1f4] ss:$8 sps:$4 sm:$0xff]   ;;  %v8931_v34 = vld [vmem:[#allocation2 + $0xf0] ss:$8 sps:$4 sm:$0xff]  }
  0x27   :  { %6499 = vmatprep.subr.bf16.mxu1 %v8899_v13  ;;  %v8932_v35 = vld [vmem:[#allocation2 + $0x1f0] ss:$8 sps:$4 sm:$0xff]   ;;  %v8933_v36 = vld [vmem:[#allocation2 + $0xe4] ss:$8 sps:$4 sm:$0xff]   ;;  %v8937_v38 = vld [vmem:[#allocation2 + $0xe0] ss:$8 sps:$4 sm:$0xff]  }
  0x28   :  { %v8935_v37 = vld [vmem:[#allocation2 + $0x1e4] ss:$8 sps:$4 sm:$0xff]   ;;  %v8938_v39 = vld [vmem:[#allocation2 + $0x1e0] ss:$8 sps:$4 sm:$0xff]   ;;  %v8939_v40 = vld [vmem:[#allocation2 + $0xd4] ss:$8 sps:$4 sm:$0xff]  }
  0x29   :  { %6459 = vmatpush1.bf16.msra.mxu0 %v8901_v14  ;;  %v8941_v41 = vld [vmem:[#allocation2 + $0x1d4] ss:$8 sps:$4 sm:$0xff]   ;;  %v8943_v42 = vld [vmem:[#allocation2 + $0xd0] ss:$8 sps:$4 sm:$0xff]   ;;  %v8945_v44 = vld [vmem:[#allocation2 + $0xc4] ss:$8 sps:$4 sm:$0xff]  }
  0x2a   :  { %6500 = vmatpush1.bf16.msra.mxu1 %v8902_v15  ;;  %6460 = vmatprep.subr.bf16.mxu0 %v8903_v16  ;;  %v8944_v43 = vld [vmem:[#allocation2 + $0x1d0] ss:$8 sps:$4 sm:$0xff]   ;;  %v8947_v45 = vld [vmem:[#allocation2 + $0x1c4] ss:$8 sps:$4 sm:$0xff]   ;;  %v8949_v49 = vld [vmem:[#allocation2 + $0xc0] ss:$8 sps:$4 sm:$0xff]  }
  0x2b   :  { %6501 = vmatprep.subr.bf16.mxu1 %v8905_v17  ;;  %v40_v46 = vld [vmem:[%s10904_s0] sm:$0xff]  ;;  %v41_v48 = vld [vmem:[%s10904_s0 + $0x8] sm:$0xff]  ;;  %v8951_v52 = vld [vmem:[#allocation2 + $0xb4] ss:$8 sps:$4 sm:$0xff]  }
  0x2c   :  { %v7786_v47 = vcombine.high %v40_v46, %v40_v46  ;;  %v8950_v50 = vld [vmem:[#allocation2 + $0x1c0] ss:$8 sps:$4 sm:$0xff]   ;;  %v7788_v51 = vcombine.high %v41_v48, %v41_v48  ;;  %v8953_v53 = vld [vmem:[#allocation2 + $0x1b4] ss:$8 sps:$4 sm:$0xff]   ;;  %v8955_v54 = vld [vmem:[#allocation2 + $0xb0] ss:$8 sps:$4 sm:$0xff]   ;;  %v7785_v6 = vcombine.low %v40_v46, %v40_v46  ;;  %v7787_v7 = vcombine.low %v41_v48, %v41_v48 }
  0x2d   :  { %6461 = vmatpush1.bf16.msra.mxu0 %v8907_v18  ;;  %v8956_v55 = vld [vmem:[#allocation2 + $0x1b0] ss:$8 sps:$4 sm:$0xff]   ;;  %v8957_v56 = vld [vmem:[#allocation2 + $0xa4] ss:$8 sps:$4 sm:$0xff]   ;;  %v8961_v58 = vld [vmem:[#allocation2 + $0xa0] ss:$8 sps:$4 sm:$0xff]  }
  0x2e   :  { %6502 = vmatpush1.bf16.msra.mxu1 %v8908_v19  ;;  %6462 = vmatprep.subr.bf16.mxu0 %v8909_v20  ;;  %v8959_v57 = vld [vmem:[#allocation2 + $0x1a4] ss:$8 sps:$4 sm:$0xff]   ;;  %v8962_v59 = vld [vmem:[#allocation2 + $0x1a0] ss:$8 sps:$4 sm:$0xff]   ;;  %v8963_v60 = vld [vmem:[#allocation2 + $0x94] ss:$8 sps:$4 sm:$0xff]  }
  0x2f   :  { %6503 = vmatprep.subr.bf16.mxu1 %v8911_v21  ;;  %6484 = vmatprep.mubr.bf16.mxu0 %v7786_v47  ;;  %v8965_v61 = vld [vmem:[#allocation2 + $0x194] ss:$8 sps:$4 sm:$0xff]   ;;  %v8967_v62 = vld [vmem:[#allocation2 + $0x90] ss:$8 sps:$4 sm:$0xff]   ;;  %v8969_v0 = vld [vmem:[#allocation2 + $0x84] ss:$8 sps:$4 sm:$0xff]  }
  0x30   :  { %6525 = vmatprep.mubr.bf16.mxu1 %v7788_v51  ;;  %v8968_v63 = vld [vmem:[#allocation2 + $0x190] ss:$8 sps:$4 sm:$0xff]   ;;  %v8971_v1 = vld [vmem:[#allocation2 + $0x184] ss:$8 sps:$4 sm:$0xff]   ;;  %v8973_v2 = vld [vmem:[#allocation2 + $0x80] ss:$8 sps:$4 sm:$0xff]  }
  0x31   :  { %6463 = vmatpush1.bf16.msra.mxu0 %v8913_v22  ;;  %v8974_v3 = vld [vmem:[#allocation2 + $0x180] ss:$8 sps:$4 sm:$0xff]   ;;  %v8981_v4 = vld [vmem:[#allocation2 + $0x274] ss:$8 sps:$4 sm:$0xff]   ;;  %v8979_v8 = vld [vmem:[#allocation2 + $0x270] ss:$8 sps:$4 sm:$0xff]  }
  0x32   :  { %6504 = vmatpush1.bf16.msra.mxu1 %v8914_v23  ;;  %6464 = vmatprep.subr.bf16.mxu0 %v8915_v24  ;;  %v8984_v5 = vld [vmem:[#allocation2 + $0x374] ss:$8 sps:$4 sm:$0xff]   ;;  %v8982_v9 = vld [vmem:[#allocation2 + $0x370] ss:$8 sps:$4 sm:$0xff]   ;;  %v8987_v10 = vld [vmem:[#allocation2 + $0x264] ss:$8 sps:$4 sm:$0xff]  }
  0x33   :  { %6505 = vmatprep.subr.bf16.mxu1 %v8917_v25  ;;  %v8990_v11 = vld [vmem:[#allocation2 + $0x364] ss:$8 sps:$4 sm:$0xff]   ;;  %v8985_v12 = vld [vmem:[#allocation2 + $0x260] ss:$8 sps:$4 sm:$0xff]   ;;  %v8993_v14 = vld [vmem:[#allocation2 + $0x254] ss:$8 sps:$4 sm:$0xff]  }
  0x34   :  { %v8988_v13 = vld [vmem:[#allocation2 + $0x360] ss:$8 sps:$4 sm:$0xff]   ;;  %v8996_v15 = vld [vmem:[#allocation2 + $0x354] ss:$8 sps:$4 sm:$0xff]   ;;  %v8991_v16 = vld [vmem:[#allocation2 + $0x250] ss:$8 sps:$4 sm:$0xff]  }
  0x35   :  { %6465 = vmatpush1.bf16.msra.mxu0 %v8919_v26  ;;  %v8994_v17 = vld [vmem:[#allocation2 + $0x350] ss:$8 sps:$4 sm:$0xff]   ;;  %v8999_v18 = vld [vmem:[#allocation2 + $0x244] ss:$8 sps:$4 sm:$0xff]   ;;  %v8997_v20 = vld [vmem:[#allocation2 + $0x240] ss:$8 sps:$4 sm:$0xff]  }
  0x36   :  { %6506 = vmatpush1.bf16.msra.mxu1 %v8920_v27  ;;  %6466 = vmatprep.subr.bf16.mxu0 %v8921_v28  ;;  %v9002_v19 = vld [vmem:[#allocation2 + $0x344] ss:$8 sps:$4 sm:$0xff]   ;;  %v9000_v21 = vld [vmem:[#allocation2 + $0x340] ss:$8 sps:$4 sm:$0xff]   ;;  %v9005_v22 = vld [vmem:[#allocation2 + $0x234] ss:$8 sps:$4 sm:$0xff]  }
  0x37   :  { %6507 = vmatprep.subr.bf16.mxu1 %v8923_v29  ;;  %v9008_v23 = vld [vmem:[#allocation2 + $0x334] ss:$8 sps:$4 sm:$0xff]   ;;  %v9003_v24 = vld [vmem:[#allocation2 + $0x230] ss:$8 sps:$4 sm:$0xff]   ;;  %v9011_v26 = vld [vmem:[#allocation2 + $0x224] ss:$8 sps:$4 sm:$0xff]  }
  0x38   :  { %v9006_v25 = vld [vmem:[#allocation2 + $0x330] ss:$8 sps:$4 sm:$0xff]   ;;  %v9014_v27 = vld [vmem:[#allocation2 + $0x324] ss:$8 sps:$4 sm:$0xff]   ;;  %v9009_v28 = vld [vmem:[#allocation2 + $0x220] ss:$8 sps:$4 sm:$0xff]  }
  0x39   :  { %6467 = vmatpush1.bf16.msra.mxu0 %v8925_v30  ;;  %v9012_v29 = vld [vmem:[#allocation2 + $0x320] ss:$8 sps:$4 sm:$0xff]   ;;  %v9017_v30 = vld [vmem:[#allocation2 + $0x214] ss:$8 sps:$4 sm:$0xff]   ;;  %v9035_v46 = vld [vmem:[#allocation2 + $0x2e4] ss:$8 sps:$4 sm:$0xff]  }
  0x3a   :  { %6508 = vmatpush1.bf16.msra.mxu1 %v8926_v31  ;;  %6468 = vmatprep.subr.bf16.mxu0 %v8927_v32  ;;  %v9020_v31 = vld [vmem:[#allocation2 + $0x314] ss:$8 sps:$4 sm:$0xff]   ;;  %v9038_v47 = vld [vmem:[#allocation2 + $0x3e4] ss:$8 sps:$4 sm:$0xff]   ;;  %v9033_v48 = vld [vmem:[#allocation2 + $0x2e0] ss:$8 sps:$4 sm:$0xff]  }
  0x3b   :  { %6509 = vmatprep.subr.bf16.mxu1 %v8929_v33  ;;  %v10562_v32 = vld [vmem:[%s10904_s0 + $0x10] sm:$0xff]  ;;  %v10567_v33 = vld [vmem:[%s10904_s0 + $0x18] sm:$0xff] }
  0x3c   :  { %v9044_v51 = vld [vmem:[#allocation2 + $0x3d4] ss:$8 sps:$4 sm:$0xff]  }
  0x3d   :  { %6469 = vmatpush2.bf16.msra.mxu0 %v8931_v34  ;;  %v9015_v34 = vld [vmem:[#allocation2 + $0x210] ss:$8 sps:$4 sm:$0xff]  }
  0x3e   :  { %6510 = vmatpush2.bf16.msra.mxu1 %v8932_v35  ;;  %6470 = vmatprep.subr.bf16.mxu0 %v8933_v36  ;;  %v9018_v35 = vld [vmem:[#allocation2 + $0x310] ss:$8 sps:$4 sm:$0xff]   ;;  %v7790_v36 = vcombine.high %v10562_v32, %v10562_v32 }
  0x3f   :  { %6511 = vmatprep.subr.bf16.mxu1 %v8935_v37  ;;  %v7792_v37 = vcombine.high %v10567_v33, %v10567_v33 }
  0x41   :  { %6471 = vmatpush2.bf16.msra.mxu0 %v8937_v38  ;;  %v9023_v38 = vld [vmem:[#allocation2 + $0x204] ss:$8 sps:$4 sm:$0xff]  }
  0x42   :  { %6512 = vmatpush2.bf16.msra.mxu1 %v8938_v39  ;;  %6472 = vmatprep.subr.bf16.mxu0 %v8939_v40  ;;  %v9026_v39 = vld [vmem:[#allocation2 + $0x304] ss:$8 sps:$4 sm:$0xff]   ;;  %v9021_v40 = vld [vmem:[#allocation2 + $0x200] ss:$8 sps:$4 sm:$0xff]  }
  0x43   :  { %6513 = vmatprep.subr.bf16.mxu1 %v8941_v41  ;;  %v9024_v41 = vld [vmem:[#allocation2 + $0x300] ss:$8 sps:$4 sm:$0xff]  }
  0x45   :  { %6473 = vmatpush2.bf16.msra.mxu0 %v8943_v42  ;;  %v9029_v42 = vld [vmem:[#allocation2 + $0x2f4] ss:$8 sps:$4 sm:$0xff]  }
  0x46   :  { %6514 = vmatpush2.bf16.msra.mxu1 %v8944_v43  ;;  %6474 = vmatprep.subr.bf16.mxu0 %v8945_v44  ;;  %v9032_v43 = vld [vmem:[#allocation2 + $0x3f4] ss:$8 sps:$4 sm:$0xff]   ;;  %v9027_v44 = vld [vmem:[#allocation2 + $0x2f0] ss:$8 sps:$4 sm:$0xff]  }
  0x47   :  { %6515 = vmatprep.subr.bf16.mxu1 %v8947_v45  ;;  %v9030_v45 = vld [vmem:[#allocation2 + $0x3f0] ss:$8 sps:$4 sm:$0xff]  }
  0x49   :  { %6475 = vmatpush2.bf16.msra.mxu0 %v8949_v49  ;;  %v9036_v49 = vld [vmem:[#allocation2 + $0x3e0] ss:$8 sps:$4 sm:$0xff]  }
  0x4a   :  { %6516 = vmatpush2.bf16.msra.mxu1 %v8950_v50  ;;  %6476 = vmatprep.subr.bf16.mxu0 %v8951_v52  ;;  %v9041_v50 = vld [vmem:[#allocation2 + $0x2d4] ss:$8 sps:$4 sm:$0xff]   ;;  %v9039_v52 = vld [vmem:[#allocation2 + $0x2d0] ss:$8 sps:$4 sm:$0xff]  }
  0x4b   :  { %6517 = vmatprep.subr.bf16.mxu1 %v8953_v53  ;;  %v9042_v53 = vld [vmem:[#allocation2 + $0x3d0] ss:$8 sps:$4 sm:$0xff]  }
  0x4d   :  { %6477 = vmatpush2.bf16.msra.mxu0 %v8955_v54  ;;  %v9047_v54 = vld [vmem:[#allocation2 + $0x2c4] ss:$8 sps:$4 sm:$0xff]  }
  0x4e   :  { %6518 = vmatpush2.bf16.msra.mxu1 %v8956_v55  ;;  %6478 = vmatprep.subr.bf16.mxu0 %v8957_v56  ;;  %v9050_v55 = vld [vmem:[#allocation2 + $0x3c4] ss:$8 sps:$4 sm:$0xff]   ;;  %v9045_v56 = vld [vmem:[#allocation2 + $0x2c0] ss:$8 sps:$4 sm:$0xff]  }
  0x4f   :  { %6519 = vmatprep.subr.bf16.mxu1 %v8959_v57  ;;  %v9048_v57 = vld [vmem:[#allocation2 + $0x3c0] ss:$8 sps:$4 sm:$0xff]  }
  0x51   :  { %6479 = vmatpush2.bf16.msra.mxu0 %v8961_v58  ;;  %v9053_v58 = vld [vmem:[#allocation2 + $0x2b4] ss:$8 sps:$4 sm:$0xff]  }
  0x52   :  { %6520 = vmatpush2.bf16.msra.mxu1 %v8962_v59  ;;  %6480 = vmatprep.subr.bf16.mxu0 %v8963_v60  ;;  %v9056_v59 = vld [vmem:[#allocation2 + $0x3b4] ss:$8 sps:$4 sm:$0xff]   ;;  %v9051_v60 = vld [vmem:[#allocation2 + $0x2b0] ss:$8 sps:$4 sm:$0xff]  }
  0x53   :  { %6521 = vmatprep.subr.bf16.mxu1 %v8965_v61  ;;  %v9054_v61 = vld [vmem:[#allocation2 + $0x3b0] ss:$8 sps:$4 sm:$0xff]  }
  0x55   :  { %6481 = vmatpush2.bf16.msra.mxu0 %v8967_v62  ;;  %v9059_v62 = vld [vmem:[#allocation2 + $0x2a4] ss:$8 sps:$4 sm:$0xff]  }
  0x56   :  { %6522 = vmatpush2.bf16.msra.mxu1 %v8968_v63  ;;  %6482 = vmatprep.subr.bf16.mxu0 %v8969_v0  ;;  %v9062_v63 = vld [vmem:[#allocation2 + $0x3a4] ss:$8 sps:$4 sm:$0xff]   ;;  %v9057_v0 = vld [vmem:[#allocation2 + $0x2a0] ss:$8 sps:$4 sm:$0xff]  }
  0x57   :  { %6523 = vmatprep.subr.bf16.mxu1 %v8971_v1  ;;  %v9060_v1 = vld [vmem:[#allocation2 + $0x3a0] ss:$8 sps:$4 sm:$0xff]  }
  0x59   :  { %6483 = vmatpush2.bf16.msra.mxu0 %v8973_v2  ;;  %v9065_v2 = vld [vmem:[#allocation2 + $0x294] ss:$8 sps:$4 sm:$0xff]  }
  0x5a   :  { %6524 = vmatpush2.bf16.msra.mxu1 %v8974_v3  ;;  %6534 = vmatprep.subr.bf16.mxu0 %v8981_v4  ;;  %v9068_v3 = vld [vmem:[#allocation2 + $0x394] ss:$8 sps:$4 sm:$0xff]   ;;  %v9063_v4 = vld [vmem:[#allocation2 + $0x290] ss:$8 sps:$4 sm:$0xff]  }
  0x5b   :  { %6575 = vmatprep.subr.bf16.mxu1 %v8984_v5  ;;  %v9066_v5 = vld [vmem:[#allocation2 + $0x390] ss:$8 sps:$4 sm:$0xff]  }
  0x5c   :  { %6485 = vmatmul.mubr.bf16.vlgmr.msra.gmra.mxu0 %v7785_v6  ;;  %v9071_v6 = vld [vmem:[#allocation2 + $0x284] ss:$8 sps:$4 sm:$0xff]  }
  0x5d   :  { %6526 = vmatmul.mubr.bf16.vlgmr.msra.gmra.mxu1 %v7787_v7  ;;  %6535 = vmatpush1.bf16.msra.mxu0 %v8979_v8  ;;  %v9074_v7 = vld [vmem:[#allocation2 + $0x384] ss:$8 sps:$4 sm:$0xff]   ;;  %v9069_v8 = vld [vmem:[#allocation2 + $0x280] ss:$8 sps:$4 sm:$0xff]  }
  0x5e   :  { %6576 = vmatpush1.bf16.msra.mxu1 %v8982_v9  ;;  %6536 = vmatprep.subr.bf16.mxu0 %v8987_v10  ;;  %v9072_v9 = vld [vmem:[#allocation2 + $0x380] ss:$8 sps:$4 sm:$0xff]   ;;  %v9081_v10 = vld [vmem:[#allocation2 + $0x474] ss:$8 sps:$4 sm:$0xff]  }
  0x5f   :  { %6577 = vmatprep.subr.bf16.mxu1 %v8990_v11  ;;  %6566 = vmatprep.mubr.bf16.mxu0 %v7790_v36  ;;  %v9084_v11 = vld [vmem:[#allocation2 + $0x574] ss:$8 sps:$4 sm:$0xff]   ;;  %v9111_v36 = vld [vmem:[#allocation2 + $0x424] ss:$8 sps:$4 sm:$0xff]  }
  0x60   :  { %6607 = vmatprep.mubr.bf16.mxu1 %v7792_v37  ;;  %v9114_v37 = vld [vmem:[#allocation2 + $0x524] ss:$8 sps:$4 sm:$0xff]  }
  0x61   :  { %6537 = vmatpush1.bf16.msra.mxu0 %v8985_v12  ;;  %v7789_v12 = vcombine.low %v10562_v32, %v10562_v32  ;;  %v9105_v32 = vld [vmem:[#allocation2 + $0x434] ss:$8 sps:$4 sm:$0xff]  }
  0x62   :  { %6578 = vmatpush1.bf16.msra.mxu1 %v8988_v13  ;;  %6538 = vmatprep.subr.bf16.mxu0 %v8993_v14  ;;  %v7791_v13 = vcombine.low %v10567_v33, %v10567_v33  ;;  %v9079_v14 = vld [vmem:[#allocation2 + $0x470] ss:$8 sps:$4 sm:$0xff]   ;;  %v9108_v33 = vld [vmem:[#allocation2 + $0x534] ss:$8 sps:$4 sm:$0xff]  }
  0x63   :  { %6579 = vmatprep.subr.bf16.mxu1 %v8996_v15  ;;  %v9082_v15 = vld [vmem:[#allocation2 + $0x570] ss:$8 sps:$4 sm:$0xff]  }
  0x65   :  { %6539 = vmatpush1.bf16.msra.mxu0 %v8991_v16  ;;  %v9087_v16 = vld [vmem:[#allocation2 + $0x464] ss:$8 sps:$4 sm:$0xff]  }
  0x66   :  { %6580 = vmatpush1.bf16.msra.mxu1 %v8994_v17  ;;  %6540 = vmatprep.subr.bf16.mxu0 %v8999_v18  ;;  %v9090_v17 = vld [vmem:[#allocation2 + $0x564] ss:$8 sps:$4 sm:$0xff]  }
  0x67   :  { %6581 = vmatprep.subr.bf16.mxu1 %v9002_v19  ;;  %v10580_v18 = vld [vmem:[%s10904_s0 + $0x20] sm:$0xff]  ;;  %v10585_v19 = vld [vmem:[%s10904_s0 + $0x28] sm:$0xff] }
  0x69   :  { %6541 = vmatpush1.bf16.msra.mxu0 %v8997_v20  ;;  %v7794_v20 = vcombine.high %v10580_v18, %v10580_v18 }
  0x6a   :  { %6582 = vmatpush1.bf16.msra.mxu1 %v9000_v21  ;;  %6542 = vmatprep.subr.bf16.mxu0 %v9005_v22  ;;  %v7796_v21 = vcombine.high %v10585_v19, %v10585_v19  ;;  %v9085_v22 = vld [vmem:[#allocation2 + $0x460] ss:$8 sps:$4 sm:$0xff]  }
  0x6b   :  { %6583 = vmatprep.subr.bf16.mxu1 %v9008_v23  ;;  %v9088_v23 = vld [vmem:[#allocation2 + $0x560] ss:$8 sps:$4 sm:$0xff]  }
  0x6d   :  { %6543 = vmatpush1.bf16.msra.mxu0 %v9003_v24  ;;  %v9093_v24 = vld [vmem:[#allocation2 + $0x454] ss:$8 sps:$4 sm:$0xff]  }
  0x6e   :  { %6584 = vmatpush1.bf16.msra.mxu1 %v9006_v25  ;;  %6544 = vmatprep.subr.bf16.mxu0 %v9011_v26  ;;  %v9096_v25 = vld [vmem:[#allocation2 + $0x554] ss:$8 sps:$4 sm:$0xff]   ;;  %v9091_v26 = vld [vmem:[#allocation2 + $0x450] ss:$8 sps:$4 sm:$0xff]  }
  0x6f   :  { %6585 = vmatprep.subr.bf16.mxu1 %v9014_v27  ;;  %v9094_v27 = vld [vmem:[#allocation2 + $0x550] ss:$8 sps:$4 sm:$0xff]  }
  0x71   :  { %6545 = vmatpush1.bf16.msra.mxu0 %v9009_v28  ;;  %v9099_v28 = vld [vmem:[#allocation2 + $0x444] ss:$8 sps:$4 sm:$0xff]  }
  0x72   :  { %6586 = vmatpush1.bf16.msra.mxu1 %v9012_v29  ;;  %6546 = vmatprep.subr.bf16.mxu0 %v9017_v30  ;;  %v9102_v29 = vld [vmem:[#allocation2 + $0x544] ss:$8 sps:$4 sm:$0xff]   ;;  %v9097_v30 = vld [vmem:[#allocation2 + $0x440] ss:$8 sps:$4 sm:$0xff]  }
  0x73   :  { %6587 = vmatprep.subr.bf16.mxu1 %v9020_v31  ;;  %v9100_v31 = vld [vmem:[#allocation2 + $0x540] ss:$8 sps:$4 sm:$0xff]  }
  0x75   :  { %6547 = vmatpush1.bf16.msra.mxu0 %v9015_v34  ;;  %v9103_v34 = vld [vmem:[#allocation2 + $0x430] ss:$8 sps:$4 sm:$0xff]  }
  0x76   :  { %6588 = vmatpush1.bf16.msra.mxu1 %v9018_v35  ;;  %6548 = vmatprep.subr.bf16.mxu0 %v9023_v38  ;;  %v9106_v35 = vld [vmem:[#allocation2 + $0x530] ss:$8 sps:$4 sm:$0xff]   ;;  %v9109_v38 = vld [vmem:[#allocation2 + $0x420] ss:$8 sps:$4 sm:$0xff]  }
  0x77   :  { %6589 = vmatprep.subr.bf16.mxu1 %v9026_v39  ;;  %v9112_v39 = vld [vmem:[#allocation2 + $0x520] ss:$8 sps:$4 sm:$0xff]  }
  0x79   :  { %6549 = vmatpush1.bf16.msra.mxu0 %v9021_v40  ;;  %v9117_v40 = vld [vmem:[#allocation2 + $0x414] ss:$8 sps:$4 sm:$0xff]  }
  0x7a   :  { %6590 = vmatpush1.bf16.msra.mxu1 %v9024_v41  ;;  %6550 = vmatprep.subr.bf16.mxu0 %v9029_v42  ;;  %v9120_v41 = vld [vmem:[#allocation2 + $0x514] ss:$8 sps:$4 sm:$0xff]   ;;  %v9115_v42 = vld [vmem:[#allocation2 + $0x410] ss:$8 sps:$4 sm:$0xff]  }
  0x7b   :  { %6591 = vmatprep.subr.bf16.mxu1 %v9032_v43  ;;  %v9118_v43 = vld [vmem:[#allocation2 + $0x510] ss:$8 sps:$4 sm:$0xff]  }
  0x7d   :  { %6551 = vmatpush2.bf16.msra.mxu0 %v9027_v44  ;;  %v9123_v44 = vld [vmem:[#allocation2 + $0x404] ss:$8 sps:$4 sm:$0xff]  }
  0x7e   :  { %6592 = vmatpush2.bf16.msra.mxu1 %v9030_v45  ;;  %6552 = vmatprep.subr.bf16.mxu0 %v9035_v46  ;;  %v9126_v45 = vld [vmem:[#allocation2 + $0x504] ss:$8 sps:$4 sm:$0xff]   ;;  %v9121_v46 = vld [vmem:[#allocation2 + $0x400] ss:$8 sps:$4 sm:$0xff]  }
  0x7f   :  { %6593 = vmatprep.subr.bf16.mxu1 %v9038_v47  ;;  %v9124_v47 = vld [vmem:[#allocation2 + $0x500] ss:$8 sps:$4 sm:$0xff]  }
  0x81   :  { %6553 = vmatpush2.bf16.msra.mxu0 %v9033_v48  ;;  %v9129_v48 = vld [vmem:[#allocation2 + $0x4f4] ss:$8 sps:$4 sm:$0xff]  }
  0x82   :  { %6594 = vmatpush2.bf16.msra.mxu1 %v9036_v49  ;;  %6554 = vmatprep.subr.bf16.mxu0 %v9041_v50  ;;  %v9132_v49 = vld [vmem:[#allocation2 + $0x5f4] ss:$8 sps:$4 sm:$0xff]   ;;  %v9127_v50 = vld [vmem:[#allocation2 + $0x4f0] ss:$8 sps:$4 sm:$0xff]  }
  0x83   :  { %6595 = vmatprep.subr.bf16.mxu1 %v9044_v51  ;;  %v9130_v51 = vld [vmem:[#allocation2 + $0x5f0] ss:$8 sps:$4 sm:$0xff]  }
  0x85   :  { %6555 = vmatpush2.bf16.msra.mxu0 %v9039_v52  ;;  %v9135_v52 = vld [vmem:[#allocation2 + $0x4e4] ss:$8 sps:$4 sm:$0xff]  }
  0x86   :  { %6596 = vmatpush2.bf16.msra.mxu1 %v9042_v53  ;;  %6556 = vmatprep.subr.bf16.mxu0 %v9047_v54  ;;  %v9138_v53 = vld [vmem:[#allocation2 + $0x5e4] ss:$8 sps:$4 sm:$0xff]   ;;  %v9133_v54 = vld [vmem:[#allocation2 + $0x4e0] ss:$8 sps:$4 sm:$0xff]  }
  0x87   :  { %6597 = vmatprep.subr.bf16.mxu1 %v9050_v55  ;;  %v9136_v55 = vld [vmem:[#allocation2 + $0x5e0] ss:$8 sps:$4 sm:$0xff]  }
  0x89   :  { %6557 = vmatpush2.bf16.msra.mxu0 %v9045_v56  ;;  %v9141_v56 = vld [vmem:[#allocation2 + $0x4d4] ss:$8 sps:$4 sm:$0xff]  }
  0x8a   :  { %6598 = vmatpush2.bf16.msra.mxu1 %v9048_v57  ;;  %6558 = vmatprep.subr.bf16.mxu0 %v9053_v58  ;;  %v9144_v57 = vld [vmem:[#allocation2 + $0x5d4] ss:$8 sps:$4 sm:$0xff]   ;;  %v9139_v58 = vld [vmem:[#allocation2 + $0x4d0] ss:$8 sps:$4 sm:$0xff]  }
  0x8b   :  { %6599 = vmatprep.subr.bf16.mxu1 %v9056_v59  ;;  %v9142_v59 = vld [vmem:[#allocation2 + $0x5d0] ss:$8 sps:$4 sm:$0xff]  }
  0x8d   :  { %6559 = vmatpush2.bf16.msra.mxu0 %v9051_v60  ;;  %v9147_v60 = vld [vmem:[#allocation2 + $0x4c4] ss:$8 sps:$4 sm:$0xff]  }
  0x8e   :  { %6600 = vmatpush2.bf16.msra.mxu1 %v9054_v61  ;;  %6560 = vmatprep.subr.bf16.mxu0 %v9059_v62  ;;  %v9150_v61 = vld [vmem:[#allocation2 + $0x5c4] ss:$8 sps:$4 sm:$0xff]   ;;  %v9145_v62 = vld [vmem:[#allocation2 + $0x4c0] ss:$8 sps:$4 sm:$0xff]  }
  0x8f   :  { %6601 = vmatprep.subr.bf16.mxu1 %v9062_v63  ;;  %v9148_v63 = vld [vmem:[#allocation2 + $0x5c0] ss:$8 sps:$4 sm:$0xff]  }
  0x91   :  { %6561 = vmatpush2.bf16.msra.mxu0 %v9057_v0  ;;  %v9153_v0 = vld [vmem:[#allocation2 + $0x4b4] ss:$8 sps:$4 sm:$0xff]  }
  0x92   :  { %6602 = vmatpush2.bf16.msra.mxu1 %v9060_v1  ;;  %6562 = vmatprep.subr.bf16.mxu0 %v9065_v2  ;;  %v9156_v1 = vld [vmem:[#allocation2 + $0x5b4] ss:$8 sps:$4 sm:$0xff]   ;;  %v9151_v2 = vld [vmem:[#allocation2 + $0x4b0] ss:$8 sps:$4 sm:$0xff]  }
  0x93   :  { %6603 = vmatprep.subr.bf16.mxu1 %v9068_v3  ;;  %v9154_v3 = vld [vmem:[#allocation2 + $0x5b0] ss:$8 sps:$4 sm:$0xff]  }
  0x95   :  { %6563 = vmatpush2.bf16.msra.mxu0 %v9063_v4  ;;  %v9159_v4 = vld [vmem:[#allocation2 + $0x4a4] ss:$8 sps:$4 sm:$0xff]  }
  0x96   :  { %6604 = vmatpush2.bf16.msra.mxu1 %v9066_v5  ;;  %6564 = vmatprep.subr.bf16.mxu0 %v9071_v6  ;;  %v9162_v5 = vld [vmem:[#allocation2 + $0x5a4] ss:$8 sps:$4 sm:$0xff]   ;;  %v9157_v6 = vld [vmem:[#allocation2 + $0x4a0] ss:$8 sps:$4 sm:$0xff]  }
  0x97   :  { %6605 = vmatprep.subr.bf16.mxu1 %v9074_v7  ;;  %v9160_v7 = vld [vmem:[#allocation2 + $0x5a0] ss:$8 sps:$4 sm:$0xff]  }
  0x99   :  { %6565 = vmatpush2.bf16.msra.mxu0 %v9069_v8  ;;  %v9165_v8 = vld [vmem:[#allocation2 + $0x494] ss:$8 sps:$4 sm:$0xff]  }
  0x9a   :  { %6606 = vmatpush2.bf16.msra.mxu1 %v9072_v9  ;;  %6616 = vmatprep.subr.bf16.mxu0 %v9081_v10  ;;  %v9168_v9 = vld [vmem:[#allocation2 + $0x594] ss:$8 sps:$4 sm:$0xff]   ;;  %v9163_v10 = vld [vmem:[#allocation2 + $0x490] ss:$8 sps:$4 sm:$0xff]  }
  0x9b   :  { %6657 = vmatprep.subr.bf16.mxu1 %v9084_v11  ;;  %v9166_v11 = vld [vmem:[#allocation2 + $0x590] ss:$8 sps:$4 sm:$0xff]  }
  0x9c   :  { %6567 = vmatmul.mubr.bf16.vlgmr.msra.gmra.mxu0 %v7789_v12  ;;  %v9171_v12 = vld [vmem:[#allocation2 + $0x484] ss:$8 sps:$4 sm:$0xff]  }
  0x9d   :  { %6608 = vmatmul.mubr.bf16.vlgmr.msra.gmra.mxu1 %v7791_v13  ;;  %6617 = vmatpush1.bf16.msra.mxu0 %v9079_v14  ;;  %v9174_v13 = vld [vmem:[#allocation2 + $0x584] ss:$8 sps:$4 sm:$0xff]   ;;  %v9169_v14 = vld [vmem:[#allocation2 + $0x480] ss:$8 sps:$4 sm:$0xff]  }
  0x9e   :  { %6658 = vmatpush1.bf16.msra.mxu1 %v9082_v15  ;;  %6618 = vmatprep.subr.bf16.mxu0 %v9087_v16  ;;  %v9172_v15 = vld [vmem:[#allocation2 + $0x580] ss:$8 sps:$4 sm:$0xff]   ;;  %v9181_v16 = vld [vmem:[#allocation2 + $0x674] ss:$8 sps:$4 sm:$0xff]  }
  0x9f   :  { %6659 = vmatprep.subr.bf16.mxu1 %v9090_v17  ;;  %6648 = vmatprep.mubr.bf16.mxu0 %v7794_v20  ;;  %v9184_v17 = vld [vmem:[#allocation2 + $0x774] ss:$8 sps:$4 sm:$0xff]   ;;  %v9179_v20 = vld [vmem:[#allocation2 + $0x670] ss:$8 sps:$4 sm:$0xff]  }
  0xa0   :  { %6689 = vmatprep.mubr.bf16.mxu1 %v7796_v21  ;;  %v10594_v21 = vld [vmem:[%s10904_s0 + $0x30] sm:$0xff] }
  0xa1   :  { %6619 = vmatpush1.bf16.msra.mxu0 %v9085_v22  ;;  %v7793_v22 = vcombine.low %v10580_v18, %v10580_v18 }
  0xa2   :  { %6660 = vmatpush1.bf16.msra.mxu1 %v9088_v23  ;;  %6620 = vmatprep.subr.bf16.mxu0 %v9093_v24  ;;  %v7795_v23 = vcombine.low %v10585_v19, %v10585_v19  ;;  %v10603_v24 = vld [vmem:[%s10904_s0 + $0x38] sm:$0xff]  ;;  %v9185_v19 = vld [vmem:[#allocation2 + $0x660] ss:$8 sps:$4 sm:$0xff]  }
  0xa3   :  { %6661 = vmatprep.subr.bf16.mxu1 %v9096_v25  ;;  %v9182_v25 = vld [vmem:[#allocation2 + $0x770] ss:$8 sps:$4 sm:$0xff]   ;;  %v7800_v18 = vcombine.high %v10603_v24, %v10603_v24 }
  0xa5   :  { %6621 = vmatpush1.bf16.msra.mxu0 %v9091_v26  ;;  %v9187_v26 = vld [vmem:[#allocation2 + $0x664] ss:$8 sps:$4 sm:$0xff]  }
  0xa6   :  { %6662 = vmatpush1.bf16.msra.mxu1 %v9094_v27  ;;  %6622 = vmatprep.subr.bf16.mxu0 %v9099_v28  ;;  %v9190_v27 = vld [vmem:[#allocation2 + $0x764] ss:$8 sps:$4 sm:$0xff]   ;;  %v7798_v28 = vcombine.high %v10594_v21, %v10594_v21 }
  0xa7   :  { %6663 = vmatprep.subr.bf16.mxu1 %v9102_v29  ;;  %v9188_v29 = vld [vmem:[#allocation2 + $0x760] ss:$8 sps:$4 sm:$0xff]  }
  0xa9   :  { %6623 = vmatpush1.bf16.msra.mxu0 %v9097_v30  ;;  %v9193_v30 = vld [vmem:[#allocation2 + $0x654] ss:$8 sps:$4 sm:$0xff]  }
  0xaa   :  { %6664 = vmatpush1.bf16.msra.mxu1 %v9100_v31  ;;  %6624 = vmatprep.subr.bf16.mxu0 %v9105_v32  ;;  %v9196_v31 = vld [vmem:[#allocation2 + $0x754] ss:$8 sps:$4 sm:$0xff]   ;;  %v9191_v32 = vld [vmem:[#allocation2 + $0x650] ss:$8 sps:$4 sm:$0xff]  }
  0xab   :  { %6665 = vmatprep.subr.bf16.mxu1 %v9108_v33  ;;  %v9194_v33 = vld [vmem:[#allocation2 + $0x750] ss:$8 sps:$4 sm:$0xff]  }
  0xad   :  { %6625 = vmatpush1.bf16.msra.mxu0 %v9103_v34  ;;  %v9199_v34 = vld [vmem:[#allocation2 + $0x644] ss:$8 sps:$4 sm:$0xff]  }
  0xae   :  { %6666 = vmatpush1.bf16.msra.mxu1 %v9106_v35  ;;  %6626 = vmatprep.subr.bf16.mxu0 %v9111_v36  ;;  %v9202_v35 = vld [vmem:[#allocation2 + $0x744] ss:$8 sps:$4 sm:$0xff]   ;;  %v9197_v36 = vld [vmem:[#allocation2 + $0x640] ss:$8 sps:$4 sm:$0xff]  }
  0xaf   :  { %6667 = vmatprep.subr.bf16.mxu1 %v9114_v37  ;;  %v9200_v37 = vld [vmem:[#allocation2 + $0x740] ss:$8 sps:$4 sm:$0xff]  }
  0xb1   :  { %6627 = vmatpush1.bf16.msra.mxu0 %v9109_v38  ;;  %v9205_v38 = vld [vmem:[#allocation2 + $0x634] ss:$8 sps:$4 sm:$0xff]  }
  0xb2   :  { %6668 = vmatpush1.bf16.msra.mxu1 %v9112_v39  ;;  %6628 = vmatprep.subr.bf16.mxu0 %v9117_v40  ;;  %v9208_v39 = vld [vmem:[#allocation2 + $0x734] ss:$8 sps:$4 sm:$0xff]   ;;  %v9203_v40 = vld [vmem:[#allocation2 + $0x630] ss:$8 sps:$4 sm:$0xff]  }
  0xb3   :  { %6669 = vmatprep.subr.bf16.mxu1 %v9120_v41  ;;  %v9206_v41 = vld [vmem:[#allocation2 + $0x730] ss:$8 sps:$4 sm:$0xff]  }
  0xb5   :  { %6629 = vmatpush1.bf16.msra.mxu0 %v9115_v42  ;;  %v9211_v42 = vld [vmem:[#allocation2 + $0x624] ss:$8 sps:$4 sm:$0xff]  }
  0xb6   :  { %6670 = vmatpush1.bf16.msra.mxu1 %v9118_v43  ;;  %6630 = vmatprep.subr.bf16.mxu0 %v9123_v44  ;;  %v9214_v43 = vld [vmem:[#allocation2 + $0x724] ss:$8 sps:$4 sm:$0xff]   ;;  %v9209_v44 = vld [vmem:[#allocation2 + $0x620] ss:$8 sps:$4 sm:$0xff]  }
  0xb7   :  { %6671 = vmatprep.subr.bf16.mxu1 %v9126_v45  ;;  %v9212_v45 = vld [vmem:[#allocation2 + $0x720] ss:$8 sps:$4 sm:$0xff]  }
  0xb9   :  { %6631 = vmatpush1.bf16.msra.mxu0 %v9121_v46  ;;  %v9217_v46 = vld [vmem:[#allocation2 + $0x614] ss:$8 sps:$4 sm:$0xff]  }
  0xba   :  { %6672 = vmatpush1.bf16.msra.mxu1 %v9124_v47  ;;  %6632 = vmatprep.subr.bf16.mxu0 %v9129_v48  ;;  %v9220_v47 = vld [vmem:[#allocation2 + $0x714] ss:$8 sps:$4 sm:$0xff]   ;;  %v9215_v48 = vld [vmem:[#allocation2 + $0x610] ss:$8 sps:$4 sm:$0xff]  }
  0xbb   :  { %6673 = vmatprep.subr.bf16.mxu1 %v9132_v49  ;;  %v9218_v49 = vld [vmem:[#allocation2 + $0x710] ss:$8 sps:$4 sm:$0xff]  }
  0xbd   :  { %6633 = vmatpush2.bf16.msra.mxu0 %v9127_v50  ;;  %v9223_v50 = vld [vmem:[#allocation2 + $0x604] ss:$8 sps:$4 sm:$0xff]  }
  0xbe   :  { %6674 = vmatpush2.bf16.msra.mxu1 %v9130_v51  ;;  %6634 = vmatprep.subr.bf16.mxu0 %v9135_v52  ;;  %v9226_v51 = vld [vmem:[#allocation2 + $0x704] ss:$8 sps:$4 sm:$0xff]   ;;  %v9221_v52 = vld [vmem:[#allocation2 + $0x600] ss:$8 sps:$4 sm:$0xff]  }
  0xbf   :  { %6675 = vmatprep.subr.bf16.mxu1 %v9138_v53  ;;  %v9224_v53 = vld [vmem:[#allocation2 + $0x700] ss:$8 sps:$4 sm:$0xff]  }
  0xc1   :  { %6635 = vmatpush2.bf16.msra.mxu0 %v9133_v54  ;;  %v9229_v54 = vld [vmem:[#allocation2 + $0x6f4] ss:$8 sps:$4 sm:$0xff]  }
  0xc2   :  { %6676 = vmatpush2.bf16.msra.mxu1 %v9136_v55  ;;  %6636 = vmatprep.subr.bf16.mxu0 %v9141_v56  ;;  %v9232_v55 = vld [vmem:[#allocation2 + $0x7f4] ss:$8 sps:$4 sm:$0xff]   ;;  %v9227_v56 = vld [vmem:[#allocation2 + $0x6f0] ss:$8 sps:$4 sm:$0xff]  }
  0xc3   :  { %6677 = vmatprep.subr.bf16.mxu1 %v9144_v57  ;;  %v9230_v57 = vld [vmem:[#allocation2 + $0x7f0] ss:$8 sps:$4 sm:$0xff]  }
  0xc5   :  { %6637 = vmatpush2.bf16.msra.mxu0 %v9139_v58  ;;  %v9235_v58 = vld [vmem:[#allocation2 + $0x6e4] ss:$8 sps:$4 sm:$0xff]  }
  0xc6   :  { %6678 = vmatpush2.bf16.msra.mxu1 %v9142_v59  ;;  %6638 = vmatprep.subr.bf16.mxu0 %v9147_v60  ;;  %v9238_v59 = vld [vmem:[#allocation2 + $0x7e4] ss:$8 sps:$4 sm:$0xff]   ;;  %v9233_v60 = vld [vmem:[#allocation2 + $0x6e0] ss:$8 sps:$4 sm:$0xff]  }
  0xc7   :  { %6679 = vmatprep.subr.bf16.mxu1 %v9150_v61  ;;  %v9236_v61 = vld [vmem:[#allocation2 + $0x7e0] ss:$8 sps:$4 sm:$0xff]  }
  0xc9   :  { %6639 = vmatpush2.bf16.msra.mxu0 %v9145_v62  ;;  %v9241_v62 = vld [vmem:[#allocation2 + $0x6d4] ss:$8 sps:$4 sm:$0xff]  }
  0xca   :  { %6680 = vmatpush2.bf16.msra.mxu1 %v9148_v63  ;;  %6640 = vmatprep.subr.bf16.mxu0 %v9153_v0  ;;  %v9244_v63 = vld [vmem:[#allocation2 + $0x7d4] ss:$8 sps:$4 sm:$0xff]   ;;  %v9239_v0 = vld [vmem:[#allocation2 + $0x6d0] ss:$8 sps:$4 sm:$0xff]  }
  0xcb   :  { %6681 = vmatprep.subr.bf16.mxu1 %v9156_v1  ;;  %v9242_v1 = vld [vmem:[#allocation2 + $0x7d0] ss:$8 sps:$4 sm:$0xff]  }
  0xcd   :  { %6641 = vmatpush2.bf16.msra.mxu0 %v9151_v2  ;;  %v9247_v2 = vld [vmem:[#allocation2 + $0x6c4] ss:$8 sps:$4 sm:$0xff]  }
  0xce   :  { %6682 = vmatpush2.bf16.msra.mxu1 %v9154_v3  ;;  %6642 = vmatprep.subr.bf16.mxu0 %v9159_v4  ;;  %v9250_v3 = vld [vmem:[#allocation2 + $0x7c4] ss:$8 sps:$4 sm:$0xff]   ;;  %v9245_v4 = vld [vmem:[#allocation2 + $0x6c0] ss:$8 sps:$4 sm:$0xff]  }
  0xcf   :  { %6683 = vmatprep.subr.bf16.mxu1 %v9162_v5  ;;  %v9248_v5 = vld [vmem:[#allocation2 + $0x7c0] ss:$8 sps:$4 sm:$0xff]  }
  0xd1   :  { %6643 = vmatpush2.bf16.msra.mxu0 %v9157_v6  ;;  %v9253_v6 = vld [vmem:[#allocation2 + $0x6b4] ss:$8 sps:$4 sm:$0xff]  }
  0xd2   :  { %6684 = vmatpush2.bf16.msra.mxu1 %v9160_v7  ;;  %6644 = vmatprep.subr.bf16.mxu0 %v9165_v8  ;;  %v9256_v7 = vld [vmem:[#allocation2 + $0x7b4] ss:$8 sps:$4 sm:$0xff]   ;;  %v9251_v8 = vld [vmem:[#allocation2 + $0x6b0] ss:$8 sps:$4 sm:$0xff]  }
  0xd3   :  { %6685 = vmatprep.subr.bf16.mxu1 %v9168_v9  ;;  %v9254_v9 = vld [vmem:[#allocation2 + $0x7b0] ss:$8 sps:$4 sm:$0xff]  }
  0xd5   :  { %6645 = vmatpush2.bf16.msra.mxu0 %v9163_v10  ;;  %v9259_v10 = vld [vmem:[#allocation2 + $0x6a4] ss:$8 sps:$4 sm:$0xff]  }
  0xd6   :  { %6686 = vmatpush2.bf16.msra.mxu1 %v9166_v11  ;;  %6646 = vmatprep.subr.bf16.mxu0 %v9171_v12  ;;  %v9262_v11 = vld [vmem:[#allocation2 + $0x7a4] ss:$8 sps:$4 sm:$0xff]   ;;  %v9257_v12 = vld [vmem:[#allocation2 + $0x6a0] ss:$8 sps:$4 sm:$0xff]  }
  0xd7   :  { %6687 = vmatprep.subr.bf16.mxu1 %v9174_v13  ;;  %v9260_v13 = vld [vmem:[#allocation2 + $0x7a0] ss:$8 sps:$4 sm:$0xff]  }
  0xd9   :  { %6647 = vmatpush2.bf16.msra.mxu0 %v9169_v14  ;;  %v9265_v14 = vld [vmem:[#allocation2 + $0x694] ss:$8 sps:$4 sm:$0xff]  }
  0xda   :  { %6688 = vmatpush2.bf16.msra.mxu1 %v9172_v15  ;;  %6698 = vmatprep.subr.bf16.mxu0 %v9181_v16  ;;  %v1098_v15 = vlaneseq  ;;  %v9268_v16 = vld [vmem:[#allocation2 + $0x794] ss:$8 sps:$4 sm:$0xff]  }
  0xdb   :  { %6739 = vmatprep.subr.bf16.mxu1 %v9184_v17  ;;  %v9263_v17 = vld [vmem:[#allocation2 + $0x690] ss:$8 sps:$4 sm:$0xff]  }
  0xdc   :  { %6649 = vmatmul.mubr.bf16.vlgmr.msra.gmra.mxu0 %v7793_v22  ;;  %v9271_v22 = vld [vmem:[#allocation2 + $0x684] ss:$8 sps:$4 sm:$0xff]  }
  0xdd   :  { %6690 = vmatmul.mubr.bf16.vlgmr.msra.gmra.mxu1 %v7795_v23  ;;  %6699 = vmatpush1.bf16.msra.mxu0 %v9179_v20  ;;  %v9266_v20 = vld [vmem:[#allocation2 + $0x790] ss:$8 sps:$4 sm:$0xff]   ;;  %v1099_v23 = vshrl.u32 %v1098_v15, 7  ;;  %v9329_v15 = vld [vmem:[#allocation2 + $0x8f4] ss:$8 sps:$4 sm:$0xff]  }
  0xde   :  { %6740 = vmatpush1.bf16.msra.mxu1 %v9182_v25  ;;  %6700 = vmatprep.subr.bf16.mxu0 %v9187_v26  ;;  %v9274_v25 = vld [vmem:[#allocation2 + $0x784] ss:$8 sps:$4 sm:$0xff]   ;;  %v9269_v26 = vld [vmem:[#allocation2 + $0x680] ss:$8 sps:$4 sm:$0xff]  }
  0xdf   :  { %6741 = vmatprep.subr.bf16.mxu1 %v9190_v27  ;;  %6730 = vmatprep.mubr.bf16.mxu0 %v7798_v28  ;;  %v9272_v27 = vld [vmem:[#allocation2 + $0x780] ss:$8 sps:$4 sm:$0xff]  }
  0xe0   :  { %6771 = vmatprep.mubr.bf16.mxu1 %v7800_v18  ;;  %v1096_v28 = vld [vmem:[#allocation4] sm:$0x3]  ;;  %v1100_v18 = vsub.s32 0, %v1099_v23 }
  0xe1   :  { %6701 = vmatpush1.bf16.msra.mxu0 %v9185_v19  ;;  %v9281_v19 = vld [vmem:[#allocation2 + $0x874] ss:$8 sps:$4 sm:$0xff]  }
  0xe2   :  { %6742 = vmatpush1.bf16.msra.mxu1 %v9188_v29  ;;  %6702 = vmatprep.subr.bf16.mxu0 %v9193_v30  ;;  %v9284_v29 = vld [vmem:[#allocation2 + $0x974] ss:$8 sps:$4 sm:$0xff]   ;;  %v9279_v30 = vld [vmem:[#allocation2 + $0x870] ss:$8 sps:$4 sm:$0xff]  }
  0xe3   :  { %6743 = vmatprep.subr.bf16.mxu1 %v9196_v31  ;;  %v1104_v31 = vsub.s32 1, %v1099_v23  ;;  %v9338_v23 = vld [vmem:[#allocation2 + $0x9e4] ss:$8 sps:$4 sm:$0xff]  }
  0xe5   :  { %6703 = vmatpush1.bf16.msra.mxu0 %v9191_v32  ;;  %v7797_v32 = vcombine.low %v10594_v21, %v10594_v21  ;;  %v9290_v21 = vld [vmem:[#allocation2 + $0x964] ss:$8 sps:$4 sm:$0xff]  }
  0xe6   :  { %6744 = vmatpush1.bf16.msra.mxu1 %v9194_v33  ;;  %6704 = vmatprep.subr.bf16.mxu0 %v9199_v34  ;;  %v7799_v33 = vcombine.low %v10603_v24, %v10603_v24  ;;  %v10616_v34 = vld [vmem:[%s10904_s0 + $0x40] sm:$0xff] }
  0xe7   :  { %6745 = vmatprep.subr.bf16.mxu1 %v9202_v35  ;;  %v10621_v35 = vld [vmem:[%s10904_s0 + $0x48] sm:$0xff]  ;;  %v7802_v24 = vcombine.high %v10616_v34, %v10616_v34 }
  0xe9   :  { %6705 = vmatpush1.bf16.msra.mxu0 %v9197_v36  ;;  %v1101_v36 = vrot.slane %v1096_v28, %v1100_v18  ;;  %v9339_v18 = vld [vmem:[#allocation2 + $0x8d0] ss:$8 sps:$4 sm:$0xff]  }
  0xea   :  { %6746 = vmatpush1.bf16.msra.mxu1 %v9200_v37  ;;  %6706 = vmatprep.subr.bf16.mxu0 %v9205_v38  ;;  %v9282_v37 = vld [vmem:[#allocation2 + $0x970] ss:$8 sps:$4 sm:$0xff]   ;;  %v9287_v38 = vld [vmem:[#allocation2 + $0x864] ss:$8 sps:$4 sm:$0xff]  }
  0xeb   :  { %6747 = vmatprep.subr.bf16.mxu1 %v9208_v39  ;;  %v1105_v39 = vrot.slane %v1096_v28, %v1104_v31  ;;  %v9344_v28 = vld [vmem:[#allocation2 + $0x9d4] ss:$8 sps:$4 sm:$0xff]   ;;  %v9345_v31 = vld [vmem:[#allocation2 + $0x8c0] ss:$8 sps:$4 sm:$0xff]  }
  0xed   :  { %6707 = vmatpush1.bf16.msra.mxu0 %v9203_v40  ;;  %v7804_v40 = vcombine.high %v10621_v35, %v10621_v35 }
  0xee   :  { %6748 = vmatpush1.bf16.msra.mxu1 %v9206_v41  ;;  %6708 = vmatprep.subr.bf16.mxu0 %v9211_v42 }
  0xef   :  { %6749 = vmatprep.subr.bf16.mxu1 %v9214_v43  ;;  %v9285_v43 = vld [vmem:[#allocation2 + $0x860] ss:$8 sps:$4 sm:$0xff]  }
  0xf1   :  { %6709 = vmatpush1.bf16.msra.mxu0 %v9209_v44 }
  0xf2   :  { %6750 = vmatpush1.bf16.msra.mxu1 %v9212_v45  ;;  %6710 = vmatprep.subr.bf16.mxu0 %v9217_v46  ;;  %v9288_v45 = vld [vmem:[#allocation2 + $0x960] ss:$8 sps:$4 sm:$0xff]  }
  0xf3   :  { %6751 = vmatprep.subr.bf16.mxu1 %v9220_v47 }
  0xf5   :  { %6711 = vmatpush1.bf16.msra.mxu0 %v9215_v48  ;;  %v9293_v48 = vld [vmem:[#allocation2 + $0x854] ss:$8 sps:$4 sm:$0xff]  }
  0xf6   :  { %6752 = vmatpush1.bf16.msra.mxu1 %v9218_v49  ;;  %6712 = vmatprep.subr.bf16.mxu0 %v9223_v50  ;;  %v9296_v49 = vld [vmem:[#allocation2 + $0x954] ss:$8 sps:$4 sm:$0xff]  }
  0xf7   :  { %6753 = vmatprep.subr.bf16.mxu1 %v9226_v51 }
  0xf9   :  { %6713 = vmatpush1.bf16.msra.mxu0 %v9221_v52 }
  0xfa   :  { %6754 = vmatpush1.bf16.msra.mxu1 %v9224_v53  ;;  %6714 = vmatprep.subr.bf16.mxu0 %v9229_v54  ;;  %v9291_v54 = vld [vmem:[#allocation2 + $0x850] ss:$8 sps:$4 sm:$0xff]  }
  0xfb   :  { %6755 = vmatprep.subr.bf16.mxu1 %v9232_v55 }
  0xfd   :  { %6715 = vmatpush2.bf16.msra.mxu0 %v9227_v56  ;;  %v9294_v56 = vld [vmem:[#allocation2 + $0x950] ss:$8 sps:$4 sm:$0xff]  }
  0xfe   :  { %6756 = vmatpush2.bf16.msra.mxu1 %v9230_v57  ;;  %6716 = vmatprep.subr.bf16.mxu0 %v9235_v58 }
  0xff   :  { %6757 = vmatprep.subr.bf16.mxu1 %v9238_v59  ;;  %v9299_v59 = vld [vmem:[#allocation2 + $0x844] ss:$8 sps:$4 sm:$0xff]  }
 0x101   :  { %6717 = vmatpush2.bf16.msra.mxu0 %v9233_v60  ;;  %v9302_v60 = vld [vmem:[#allocation2 + $0x944] ss:$8 sps:$4 sm:$0xff]  }
 0x102   :  { %6758 = vmatpush2.bf16.msra.mxu1 %v9236_v61  ;;  %6718 = vmatprep.subr.bf16.mxu0 %v9241_v62  ;;  %v9297_v61 = vld [vmem:[#allocation2 + $0x840] ss:$8 sps:$4 sm:$0xff]  }
 0x103   :  { %6759 = vmatprep.subr.bf16.mxu1 %v9244_v63  ;;  %v9300_v62 = vld [vmem:[#allocation2 + $0x940] ss:$8 sps:$4 sm:$0xff]   ;;  %v9305_v63 = vld [vmem:[#allocation2 + $0x834] ss:$8 sps:$4 sm:$0xff]  }
 0x105   :  { %6719 = vmatpush2.bf16.msra.mxu0 %v9239_v0  ;;  %v9308_v0 = vld [vmem:[#allocation2 + $0x934] ss:$8 sps:$4 sm:$0xff]  }
 0x106   :  { %6760 = vmatpush2.bf16.msra.mxu1 %v9242_v1  ;;  %6720 = vmatprep.subr.bf16.mxu0 %v9247_v2  ;;  %v9303_v1 = vld [vmem:[#allocation2 + $0x830] ss:$8 sps:$4 sm:$0xff]  }
 0x107   :  { %6761 = vmatprep.subr.bf16.mxu1 %v9250_v3  ;;  %v9306_v2 = vld [vmem:[#allocation2 + $0x930] ss:$8 sps:$4 sm:$0xff]   ;;  %v9311_v3 = vld [vmem:[#allocation2 + $0x824] ss:$8 sps:$4 sm:$0xff]  }
 0x109   :  { %6721 = vmatpush2.bf16.msra.mxu0 %v9245_v4  ;;  %v9314_v4 = vld [vmem:[#allocation2 + $0x924] ss:$8 sps:$4 sm:$0xff]  }
 0x10a   :  { %6762 = vmatpush2.bf16.msra.mxu1 %v9248_v5  ;;  %6722 = vmatprep.subr.bf16.mxu0 %v9253_v6  ;;  %v9309_v5 = vld [vmem:[#allocation2 + $0x820] ss:$8 sps:$4 sm:$0xff]  }
 0x10b   :  { %6763 = vmatprep.subr.bf16.mxu1 %v9256_v7  ;;  %v9312_v6 = vld [vmem:[#allocation2 + $0x920] ss:$8 sps:$4 sm:$0xff]   ;;  %v9317_v7 = vld [vmem:[#allocation2 + $0x814] ss:$8 sps:$4 sm:$0xff]  }
 0x10d   :  { %6723 = vmatpush2.bf16.msra.mxu0 %v9251_v8  ;;  %v9320_v8 = vld [vmem:[#allocation2 + $0x914] ss:$8 sps:$4 sm:$0xff]  }
 0x10e   :  { %6764 = vmatpush2.bf16.msra.mxu1 %v9254_v9  ;;  %6724 = vmatprep.subr.bf16.mxu0 %v9259_v10  ;;  %v9315_v9 = vld [vmem:[#allocation2 + $0x810] ss:$8 sps:$4 sm:$0xff]  }
 0x10f   :  { %6765 = vmatprep.subr.bf16.mxu1 %v9262_v11  ;;  %v9318_v10 = vld [vmem:[#allocation2 + $0x910] ss:$8 sps:$4 sm:$0xff]   ;;  %v9323_v11 = vld [vmem:[#allocation2 + $0x804] ss:$8 sps:$4 sm:$0xff]  }
 0x111   :  { %6725 = vmatpush2.bf16.msra.mxu0 %v9257_v12  ;;  %v9326_v12 = vld [vmem:[#allocation2 + $0x904] ss:$8 sps:$4 sm:$0xff]  }
 0x112   :  { %6766 = vmatpush2.bf16.msra.mxu1 %v9260_v13  ;;  %6726 = vmatprep.subr.bf16.mxu0 %v9265_v14  ;;  %v9321_v13 = vld [vmem:[#allocation2 + $0x800] ss:$8 sps:$4 sm:$0xff]  }
 0x113   :  { %6767 = vmatprep.subr.bf16.mxu1 %v9268_v16  ;;  %v9324_v14 = vld [vmem:[#allocation2 + $0x900] ss:$8 sps:$4 sm:$0xff]   ;;  %v9332_v16 = vld [vmem:[#allocation2 + $0x9f4] ss:$8 sps:$4 sm:$0xff]  }
 0x115   :  { %6727 = vmatpush2.bf16.msra.mxu0 %v9263_v17  ;;  %v9327_v17 = vld [vmem:[#allocation2 + $0x8f0] ss:$8 sps:$4 sm:$0xff]  }
 0x116   :  { %6768 = vmatpush2.bf16.msra.mxu1 %v9266_v20  ;;  %6728 = vmatprep.subr.bf16.mxu0 %v9271_v22  ;;  %v9330_v20 = vld [vmem:[#allocation2 + $0x9f0] ss:$8 sps:$4 sm:$0xff]   ;;  %v9335_v22 = vld [vmem:[#allocation2 + $0x8e4] ss:$8 sps:$4 sm:$0xff]  }
 0x117   :  { %6769 = vmatprep.subr.bf16.mxu1 %v9274_v25  ;;  %v9333_v25 = vld [vmem:[#allocation2 + $0x8e0] ss:$8 sps:$4 sm:$0xff]  }
 0x119   :  { %6729 = vmatpush2.bf16.msra.mxu0 %v9269_v26  ;;  %v9336_v26 = vld [vmem:[#allocation2 + $0x9e0] ss:$8 sps:$4 sm:$0xff]  }
 0x11a   :  { %6770 = vmatpush2.bf16.msra.mxu1 %v9272_v27  ;;  %6780 = vmatprep.subr.bf16.mxu0 %v9281_v19  ;;  %v9341_v27 = vld [vmem:[#allocation2 + $0x8d4] ss:$8 sps:$4 sm:$0xff]   ;;  %v9342_v19 = vld [vmem:[#allocation2 + $0x9d0] ss:$8 sps:$4 sm:$0xff]  }
 0x11b   :  { %6821 = vmatprep.subr.bf16.mxu1 %v9284_v29  ;;  %v9347_v29 = vld [vmem:[#allocation2 + $0x8c4] ss:$8 sps:$4 sm:$0xff]  }
 0x11c   :  { %v6486_v41 = vpop.f32.mrf.mxu0  ;;  %6731 = vmatmul.mubr.bf16.vlgmr.msra.gmra.mxu0 %v7797_v32  ;;  %v9348_v32 = vld [vmem:[#allocation2 + $0x9c0] ss:$8 sps:$4 sm:$0xff]  }
 0x11d   :  { %v6527_v42 = vpop.f32.mrf.mxu1  ;;  %6772 = vmatmul.mubr.bf16.vlgmr.msra.gmra.mxu1 %v7799_v33  ;;  %v6487_v44 = vadd.f32 %v6486_v41, %v1101_v36  ;;  %6781 = vmatpush1.bf16.msra.mxu0 %v9279_v30  ;;  %v9350_v30 = vld [vmem:[#allocation2 + $0x9c4] ss:$8 sps:$4 sm:$0xff]   ;;  %v9353_v33 = vld [vmem:[#allocation2 + $0x8b4] ss:$8 sps:$4 sm:$0xff]  }
 0x11e   :  { %6822 = vmatpush1.bf16.msra.mxu1 %v9282_v37  ;;  %v6488_v46 = vpop.f32.mrf.mxu0  ;;  %6782 = vmatprep.subr.bf16.mxu0 %v9287_v38  ;;  %v9356_v36 = vld [vmem:[#allocation2 + $0x9b4] ss:$8 sps:$4 sm:$0xff]   ;;  %v9351_v37 = vld [vmem:[#allocation2 + $0x8b0] ss:$8 sps:$4 sm:$0xff]  }
 0x11f   :  { %v6529_v47 = vpop.f32.mrf.mxu1  ;;  %6823 = vmatprep.subr.bf16.mxu1 %v9290_v21  ;;  %v10627_v50 = vadd.f32 %v6527_v42, %v6487_v44  ;;  %v6489_v51 = vadd.f32 %v6488_v46, %v1105_v39  ;;  %6812 = vmatprep.mubr.bf16.mxu0 %v7802_v24  ;;  %v9354_v38 = vld [vmem:[#allocation2 + $0x9b0] ss:$8 sps:$4 sm:$0xff]   ;;  %v9359_v21 = vld [vmem:[#allocation2 + $0x8a4] ss:$8 sps:$4 sm:$0xff]   ;;  %v9357_v24 = vld [vmem:[#allocation2 + $0x8a0] ss:$8 sps:$4 sm:$0xff]  }
 0x120   :  { %6853 = vmatprep.mubr.bf16.mxu1 %v7804_v40  ;;  %v6490_v52 = vpop.f32.mrf.mxu0  ;;  %v9362_v39 = vld [vmem:[#allocation2 + $0x9a4] ss:$8 sps:$4 sm:$0xff]   ;;  %v9360_v40 = vld [vmem:[#allocation2 + $0x9a0] ss:$8 sps:$4 sm:$0xff]   ;;  %v9365_v41 = vld [vmem:[#allocation2 + $0x894] ss:$8 sps:$4 sm:$0xff]  }
 0x121   :  { %v6531_v53 = vpop.f32.mrf.mxu1  ;;  %v10629_v55 = vadd.f32 %v6529_v47, %v6489_v51  ;;  %6783 = vmatpush1.bf16.msra.mxu0 %v9285_v43  ;;  %v9368_v42 = vld [vmem:[#allocation2 + $0x994] ss:$8 sps:$4 sm:$0xff]   ;;  %v9363_v43 = vld [vmem:[#allocation2 + $0x890] ss:$8 sps:$4 sm:$0xff]   ;;  %v9374_v46 = vld [vmem:[#allocation2 + $0x984] ss:$8 sps:$4 sm:$0xff]  }
 0x122   :  { %6824 = vmatpush1.bf16.msra.mxu1 %v9288_v45  ;;  %v6491_v57 = vpop.f32.mrf.mxu0  ;;  %6784 = vmatprep.subr.bf16.mxu0 %v9293_v48  ;;  %v9366_v44 = vld [vmem:[#allocation2 + $0x990] ss:$8 sps:$4 sm:$0xff]   ;;  %v9371_v45 = vld [vmem:[#allocation2 + $0x884] ss:$8 sps:$4 sm:$0xff]   ;;  %v9369_v47 = vld [vmem:[#allocation2 + $0x880] ss:$8 sps:$4 sm:$0xff]  }
 0x123   :  { %v6532_v58 = vpop.f32.mrf.mxu1  ;;  %6825 = vmatprep.subr.bf16.mxu1 %v9296_v49  ;;  %v9372_v48 = vld [vmem:[#allocation2 + $0x980] ss:$8 sps:$4 sm:$0xff]   ;;  %v9381_v49 = vld [vmem:[#allocation2 + $0xa74] ss:$8 sps:$4 sm:$0xff]   ;;  %v9379_v52 = vld [vmem:[#allocation2 + $0xa70] ss:$8 sps:$4 sm:$0xff]  }
 0x124   :  { %v9384_v51 = vld [vmem:[#allocation2 + $0xb74] ss:$8 sps:$4 sm:$0xff]   ;;  %v9382_v53 = vld [vmem:[#allocation2 + $0xb70] ss:$8 sps:$4 sm:$0xff]  }
 0x125   :  { %6785 = vmatpush1.bf16.msra.mxu0 %v9291_v54  ;;  %v7801_v54 = vcombine.low %v10616_v34, %v10616_v34  ;;  %v10638_v57 = vld [vmem:[%s10904_s0 + $0x50] sm:$0xff]  ;;  %v10643_v58 = vld [vmem:[%s10904_s0 + $0x58] sm:$0xff]  ;;  %v9385_v34 = vld [vmem:[#allocation2 + $0xa60] ss:$8 sps:$4 sm:$0xff]  }
 0x126   :  { %6826 = vmatpush1.bf16.msra.mxu1 %v9294_v56  ;;  %6786 = vmatprep.subr.bf16.mxu0 %v9299_v59  ;;  %v7803_v56 = vcombine.low %v10621_v35, %v10621_v35  ;;  %v9387_v59 = vld [vmem:[#allocation2 + $0xa64] ss:$8 sps:$4 sm:$0xff]   ;;  %v7806_v35 = vcombine.high %v10638_v57, %v10638_v57 }
 0x127   :  { %6827 = vmatprep.subr.bf16.mxu1 %v9302_v60  ;;  %v9390_v60 = vld [vmem:[#allocation2 + $0xb64] ss:$8 sps:$4 sm:$0xff]  }
 0x129   :  { %6787 = vmatpush1.bf16.msra.mxu0 %v9297_v61  ;;  %v9388_v61 = vld [vmem:[#allocation2 + $0xb60] ss:$8 sps:$4 sm:$0xff]  }
 0x12a   :  { %6828 = vmatpush1.bf16.msra.mxu1 %v9300_v62  ;;  %6788 = vmatprep.subr.bf16.mxu0 %v9305_v63  ;;  %v7808_v62 = vcombine.high %v10643_v58, %v10643_v58 }
 0x12b   :  { %6829 = vmatprep.subr.bf16.mxu1 %v9308_v0 }
 0x12d   :  { %6789 = vmatpush1.bf16.msra.mxu0 %v9303_v1 }
 0x12e   :  { %6830 = vmatpush1.bf16.msra.mxu1 %v9306_v2  ;;  %6790 = vmatprep.subr.bf16.mxu0 %v9311_v3 }
 0x12f   :  { %6831 = vmatprep.subr.bf16.mxu1 %v9314_v4  ;;  %v9393_v4 = vld [vmem:[#allocation2 + $0xa54] ss:$8 sps:$4 sm:$0xff]  }
 0x131   :  { %6791 = vmatpush1.bf16.msra.mxu0 %v9309_v5  ;;  %v9396_v5 = vld [vmem:[#allocation2 + $0xb54] ss:$8 sps:$4 sm:$0xff]  }
 0x132   :  { %6832 = vmatpush1.bf16.msra.mxu1 %v9312_v6  ;;  %6792 = vmatprep.subr.bf16.mxu0 %v9317_v7 }
 0x133   :  { %6833 = vmatprep.subr.bf16.mxu1 %v9320_v8  ;;  %v9391_v8 = vld [vmem:[#allocation2 + $0xa50] ss:$8 sps:$4 sm:$0xff]  }
 0x135   :  { %6793 = vmatpush1.bf16.msra.mxu0 %v9315_v9  ;;  %v9394_v9 = vld [vmem:[#allocation2 + $0xb50] ss:$8 sps:$4 sm:$0xff]  }
 0x136   :  { %6834 = vmatpush1.bf16.msra.mxu1 %v9318_v10  ;;  %6794 = vmatprep.subr.bf16.mxu0 %v9323_v11 }
 0x137   :  { %6835 = vmatprep.subr.bf16.mxu1 %v9326_v12 }
 0x139   :  { %6795 = vmatpush1.bf16.msra.mxu0 %v9321_v13 }
 0x13a   :  { %6836 = vmatpush1.bf16.msra.mxu1 %v9324_v14  ;;  %6796 = vmatprep.subr.bf16.mxu0 %v9329_v15  ;;  %v9399_v14 = vld [vmem:[#allocation2 + $0xa44] ss:$8 sps:$4 sm:$0xff]  }
 0x13b   :  { %6837 = vmatprep.subr.bf16.mxu1 %v9332_v16  ;;  %v9402_v15 = vld [vmem:[#allocation2 + $0xb44] ss:$8 sps:$4 sm:$0xff]   ;;  %v9397_v16 = vld [vmem:[#allocation2 + $0xa40] ss:$8 sps:$4 sm:$0xff]  }
 0x13d   :  { %6797 = vmatpush2.bf16.msra.mxu0 %v9327_v17  ;;  %v9405_v17 = vld [vmem:[#allocation2 + $0xa34] ss:$8 sps:$4 sm:$0xff]  }
 0x13e   :  { %6838 = vmatpush2.bf16.msra.mxu1 %v9330_v20  ;;  %6798 = vmatprep.subr.bf16.mxu0 %v9335_v22  ;;  %v9408_v20 = vld [vmem:[#allocation2 + $0xb34] ss:$8 sps:$4 sm:$0xff]   ;;  %v9403_v22 = vld [vmem:[#allocation2 + $0xa30] ss:$8 sps:$4 sm:$0xff]  }
 0x13f   :  { %6839 = vmatprep.subr.bf16.mxu1 %v9338_v23  ;;  %v9406_v23 = vld [vmem:[#allocation2 + $0xb30] ss:$8 sps:$4 sm:$0xff]  }
 0x141   :  { %6799 = vmatpush2.bf16.msra.mxu0 %v9333_v25  ;;  %v9411_v25 = vld [vmem:[#allocation2 + $0xa24] ss:$8 sps:$4 sm:$0xff]  }
 0x142   :  { %6840 = vmatpush2.bf16.msra.mxu1 %v9336_v26  ;;  %6800 = vmatprep.subr.bf16.mxu0 %v9341_v27  ;;  %v9414_v26 = vld [vmem:[#allocation2 + $0xb24] ss:$8 sps:$4 sm:$0xff]   ;;  %v9409_v27 = vld [vmem:[#allocation2 + $0xa20] ss:$8 sps:$4 sm:$0xff]  }
 0x143   :  { %6841 = vmatprep.subr.bf16.mxu1 %v9344_v28  ;;  %v9412_v28 = vld [vmem:[#allocation2 + $0xb20] ss:$8 sps:$4 sm:$0xff]  }
 0x145   :  { %6801 = vmatpush2.bf16.msra.mxu0 %v9339_v18  ;;  %v9417_v18 = vld [vmem:[#allocation2 + $0xa14] ss:$8 sps:$4 sm:$0xff]  }
 0x146   :  { %6842 = vmatpush2.bf16.msra.mxu1 %v9342_v19  ;;  %6802 = vmatprep.subr.bf16.mxu0 %v9347_v29  ;;  %v9420_v19 = vld [vmem:[#allocation2 + $0xb14] ss:$8 sps:$4 sm:$0xff]   ;;  %v9415_v29 = vld [vmem:[#allocation2 + $0xa10] ss:$8 sps:$4 sm:$0xff]  }
 0x147   :  { %6843 = vmatprep.subr.bf16.mxu1 %v9350_v30  ;;  %v9418_v30 = vld [vmem:[#allocation2 + $0xb10] ss:$8 sps:$4 sm:$0xff]  }
 0x149   :  { %6803 = vmatpush2.bf16.msra.mxu0 %v9345_v31  ;;  %v9423_v31 = vld [vmem:[#allocation2 + $0xa04] ss:$8 sps:$4 sm:$0xff]  }
 0x14a   :  { %6844 = vmatpush2.bf16.msra.mxu1 %v9348_v32  ;;  %6804 = vmatprep.subr.bf16.mxu0 %v9353_v33  ;;  %v9426_v32 = vld [vmem:[#allocation2 + $0xb04] ss:$8 sps:$4 sm:$0xff]   ;;  %v9421_v33 = vld [vmem:[#allocation2 + $0xa00] ss:$8 sps:$4 sm:$0xff]  }
 0x14b   :  { %6845 = vmatprep.subr.bf16.mxu1 %v9356_v36  ;;  %v9424_v36 = vld [vmem:[#allocation2 + $0xb00] ss:$8 sps:$4 sm:$0xff]  }
 0x14d   :  { %6805 = vmatpush2.bf16.msra.mxu0 %v9351_v37  ;;  %v9429_v37 = vld [vmem:[#allocation2 + $0xaf4] ss:$8 sps:$4 sm:$0xff]  }
 0x14e   :  { %6846 = vmatpush2.bf16.msra.mxu1 %v9354_v38  ;;  %6806 = vmatprep.subr.bf16.mxu0 %v9359_v21  ;;  %v9432_v38 = vld [vmem:[#allocation2 + $0xbf4] ss:$8 sps:$4 sm:$0xff]   ;;  %v9427_v21 = vld [vmem:[#allocation2 + $0xaf0] ss:$8 sps:$4 sm:$0xff]  }
 0x14f   :  { %6847 = vmatprep.subr.bf16.mxu1 %v9362_v39  ;;  %v9430_v39 = vld [vmem:[#allocation2 + $0xbf0] ss:$8 sps:$4 sm:$0xff]  }
 0x151   :  { %6807 = vmatpush2.bf16.msra.mxu0 %v9357_v24  ;;  %v9435_v24 = vld [vmem:[#allocation2 + $0xae4] ss:$8 sps:$4 sm:$0xff]  }
 0x152   :  { %6848 = vmatpush2.bf16.msra.mxu1 %v9360_v40  ;;  %6808 = vmatprep.subr.bf16.mxu0 %v9365_v41  ;;  %v9438_v40 = vld [vmem:[#allocation2 + $0xbe4] ss:$8 sps:$4 sm:$0xff]   ;;  %v9433_v41 = vld [vmem:[#allocation2 + $0xae0] ss:$8 sps:$4 sm:$0xff]  }
 0x153   :  { %6849 = vmatprep.subr.bf16.mxu1 %v9368_v42  ;;  %v9436_v42 = vld [vmem:[#allocation2 + $0xbe0] ss:$8 sps:$4 sm:$0xff]  }
 0x155   :  { %6809 = vmatpush2.bf16.msra.mxu0 %v9363_v43  ;;  %v9441_v43 = vld [vmem:[#allocation2 + $0xad4] ss:$8 sps:$4 sm:$0xff]  }
 0x156   :  { %6850 = vmatpush2.bf16.msra.mxu1 %v9366_v44  ;;  %6810 = vmatprep.subr.bf16.mxu0 %v9371_v45  ;;  %v9444_v44 = vld [vmem:[#allocation2 + $0xbd4] ss:$8 sps:$4 sm:$0xff]   ;;  %v9439_v45 = vld [vmem:[#allocation2 + $0xad0] ss:$8 sps:$4 sm:$0xff]  }
 0x157   :  { %6851 = vmatprep.subr.bf16.mxu1 %v9374_v46  ;;  %v9442_v46 = vld [vmem:[#allocation2 + $0xbd0] ss:$8 sps:$4 sm:$0xff]  }
 0x159   :  { %6811 = vmatpush2.bf16.msra.mxu0 %v9369_v47  ;;  %v9447_v47 = vld [vmem:[#allocation2 + $0xac4] ss:$8 sps:$4 sm:$0xff]  }
 0x15a   :  { %6852 = vmatpush2.bf16.msra.mxu1 %v9372_v48  ;;  %6862 = vmatprep.subr.bf16.mxu0 %v9381_v49  ;;  %v9450_v48 = vld [vmem:[#allocation2 + $0xbc4] ss:$8 sps:$4 sm:$0xff]   ;;  %v9445_v49 = vld [vmem:[#allocation2 + $0xac0] ss:$8 sps:$4 sm:$0xff]  }
 0x15b   :  { %6903 = vmatprep.subr.bf16.mxu1 %v9384_v51  ;;  %v9448_v51 = vld [vmem:[#allocation2 + $0xbc0] ss:$8 sps:$4 sm:$0xff]  }
 0x15c   :  { %v6568_v63 = vpop.f32.mrf.mxu0  ;;  %6813 = vmatmul.mubr.bf16.vlgmr.msra.gmra.mxu0 %v7801_v54  ;;  %v9451_v54 = vld [vmem:[#allocation2 + $0xab0] ss:$8 sps:$4 sm:$0xff]  }
 0x15d   :  { %v6609_v0 = vpop.f32.mrf.mxu1  ;;  %6854 = vmatmul.mubr.bf16.vlgmr.msra.gmra.mxu1 %v7803_v56  ;;  %v6569_v1 = vadd.f32 %v6568_v63, %v10627_v50  ;;  %6863 = vmatpush1.bf16.msra.mxu0 %v9379_v52  ;;  %v9453_v52 = vld [vmem:[#allocation2 + $0xab4] ss:$8 sps:$4 sm:$0xff]   ;;  %v9454_v56 = vld [vmem:[#allocation2 + $0xbb0] ss:$8 sps:$4 sm:$0xff]  }
 0x15e   :  { %6904 = vmatpush1.bf16.msra.mxu1 %v9382_v53  ;;  %v6570_v2 = vpop.f32.mrf.mxu0  ;;  %6864 = vmatprep.subr.bf16.mxu0 %v9387_v59  ;;  %v9456_v53 = vld [vmem:[#allocation2 + $0xbb4] ss:$8 sps:$4 sm:$0xff]   ;;  %v9459_v59 = vld [vmem:[#allocation2 + $0xaa4] ss:$8 sps:$4 sm:$0xff]   ;;  %v9463_v63 = vld [vmem:[#allocation2 + $0xa90] ss:$8 sps:$4 sm:$0xff]  }
 0x15f   :  { %v6611_v3 = vpop.f32.mrf.mxu1  ;;  %6905 = vmatprep.subr.bf16.mxu1 %v9390_v60  ;;  %v10650_v6 = vadd.f32 %v6609_v0, %v6569_v1  ;;  %v6571_v7 = vadd.f32 %v6570_v2, %v10629_v55  ;;  %6894 = vmatprep.mubr.bf16.mxu0 %v7806_v35  ;;  %v9400_v55 = vld [vmem:[#allocation2 + $0xb40] ss:$8 sps:$4 sm:$0xff]   ;;  %v9462_v60 = vld [vmem:[#allocation2 + $0xba4] ss:$8 sps:$4 sm:$0xff]   ;;  %v9465_v35 = vld [vmem:[#allocation2 + $0xa94] ss:$8 sps:$4 sm:$0xff]  }
 0x160   :  { %6935 = vmatprep.mubr.bf16.mxu1 %v7808_v62  ;;  %v6572_v10 = vpop.f32.mrf.mxu0  ;;  %v9468_v62 = vld [vmem:[#allocation2 + $0xb94] ss:$8 sps:$4 sm:$0xff]   ;;  %v9466_v0 = vld [vmem:[#allocation2 + $0xb90] ss:$8 sps:$4 sm:$0xff]   ;;  %v9471_v1 = vld [vmem:[#allocation2 + $0xa84] ss:$8 sps:$4 sm:$0xff]  }
 0x161   :  { %v6613_v11 = vpop.f32.mrf.mxu1  ;;  %v10653_v12 = vadd.f32 %v6611_v3, %v6571_v7  ;;  %6865 = vmatpush1.bf16.msra.mxu0 %v9385_v34  ;;  %v9457_v34 = vld [vmem:[#allocation2 + $0xaa0] ss:$8 sps:$4 sm:$0xff]   ;;  %v9474_v2 = vld [vmem:[#allocation2 + $0xb84] ss:$8 sps:$4 sm:$0xff]   ;;  %v9484_v7 = vld [vmem:[#allocation2 + $0xd74] ss:$8 sps:$4 sm:$0xff]   ;;  %v7805_v10 = vcombine.low %v10638_v57, %v10638_v57 }
 0x162   :  { %6906 = vmatpush1.bf16.msra.mxu1 %v9388_v61  ;;  %v6573_v50 = vpop.f32.mrf.mxu0  ;;  %6866 = vmatprep.subr.bf16.mxu0 %v9393_v4  ;;  %v9460_v61 = vld [vmem:[#allocation2 + $0xba0] ss:$8 sps:$4 sm:$0xff]   ;;  %v7807_v11 = vcombine.low %v10643_v58, %v10643_v58 }
 0x163   :  { %v6614_v13 = vpop.f32.mrf.mxu1  ;;  %6907 = vmatprep.subr.bf16.mxu1 %v9396_v5  ;;  %v9469_v3 = vld [vmem:[#allocation2 + $0xa80] ss:$8 sps:$4 sm:$0xff]   ;;  %v9481_v5 = vld [vmem:[#allocation2 + $0xc74] ss:$8 sps:$4 sm:$0xff]  }
 0x164   :  { %v9472_v4 = vld [vmem:[#allocation2 + $0xb80] ss:$8 sps:$4 sm:$0xff]  }
 0x165   :  { %6867 = vmatpush1.bf16.msra.mxu0 %v9391_v8  ;;  %v9479_v8 = vld [vmem:[#allocation2 + $0xc70] ss:$8 sps:$4 sm:$0xff]   ;;  %v10662_v50 = vld [vmem:[%s10904_s0 + $0x60] sm:$0xff]  ;;  %v10667_v13 = vld [vmem:[%s10904_s0 + $0x68] sm:$0xff] }
 0x166   :  { %6908 = vmatpush1.bf16.msra.mxu1 %v9394_v9  ;;  %6868 = vmatprep.subr.bf16.mxu0 %v9399_v14  ;;  %v9482_v9 = vld [vmem:[#allocation2 + $0xd70] ss:$8 sps:$4 sm:$0xff]   ;;  %v9487_v14 = vld [vmem:[#allocation2 + $0xc64] ss:$8 sps:$4 sm:$0xff]   ;;  %v9485_v57 = vld [vmem:[#allocation2 + $0xc60] ss:$8 sps:$4 sm:$0xff]   ;;  %v7810_v58 = vcombine.high %v10662_v50, %v10662_v50 }
 0x167   :  { %6909 = vmatprep.subr.bf16.mxu1 %v9402_v15  ;;  %v9490_v15 = vld [vmem:[#allocation2 + $0xd64] ss:$8 sps:$4 sm:$0xff]  }
 0x169   :  { %6869 = vmatpush1.bf16.msra.mxu0 %v9397_v16  ;;  %v9488_v16 = vld [vmem:[#allocation2 + $0xd60] ss:$8 sps:$4 sm:$0xff]  }
 0x16a   :  { %6910 = vmatpush1.bf16.msra.mxu1 %v9400_v55  ;;  %6870 = vmatprep.subr.bf16.mxu0 %v9405_v17  ;;  %v7812_v55 = vcombine.high %v10667_v13, %v10667_v13 }
 0x16b   :  { %6911 = vmatprep.subr.bf16.mxu1 %v9408_v20 }
 0x16d   :  { %6871 = vmatpush1.bf16.msra.mxu0 %v9403_v22 }
 0x16e   :  { %6912 = vmatpush1.bf16.msra.mxu1 %v9406_v23  ;;  %6872 = vmatprep.subr.bf16.mxu0 %v9411_v25 }
 0x16f   :  { %6913 = vmatprep.subr.bf16.mxu1 %v9414_v26  ;;  %v9493_v26 = vld [vmem:[#allocation2 + $0xc54] ss:$8 sps:$4 sm:$0xff]  }
 0x171   :  { %6873 = vmatpush1.bf16.msra.mxu0 %v9409_v27  ;;  %v9496_v27 = vld [vmem:[#allocation2 + $0xd54] ss:$8 sps:$4 sm:$0xff]  }
 0x172   :  { %6914 = vmatpush1.bf16.msra.mxu1 %v9412_v28  ;;  %6874 = vmatprep.subr.bf16.mxu0 %v9417_v18 }
 0x173   :  { %6915 = vmatprep.subr.bf16.mxu1 %v9420_v19  ;;  %v9491_v19 = vld [vmem:[#allocation2 + $0xc50] ss:$8 sps:$4 sm:$0xff]  }
 0x175   :  { %6875 = vmatpush1.bf16.msra.mxu0 %v9415_v29  ;;  %v9494_v29 = vld [vmem:[#allocation2 + $0xd50] ss:$8 sps:$4 sm:$0xff]  }
 0x176   :  { %6916 = vmatpush1.bf16.msra.mxu1 %v9418_v30  ;;  %6876 = vmatprep.subr.bf16.mxu0 %v9423_v31 }
 0x177   :  { %6917 = vmatprep.subr.bf16.mxu1 %v9426_v32 }
 0x179   :  { %6877 = vmatpush1.bf16.msra.mxu0 %v9421_v33 }
 0x17a   :  { %6918 = vmatpush1.bf16.msra.mxu1 %v9424_v36  ;;  %6878 = vmatprep.subr.bf16.mxu0 %v9429_v37  ;;  %v9499_v36 = vld [vmem:[#allocation2 + $0xc44] ss:$8 sps:$4 sm:$0xff]  }
 0x17b   :  { %6919 = vmatprep.subr.bf16.mxu1 %v9432_v38  ;;  %v9502_v37 = vld [vmem:[#allocation2 + $0xd44] ss:$8 sps:$4 sm:$0xff]   ;;  %v9497_v38 = vld [vmem:[#allocation2 + $0xc40] ss:$8 sps:$4 sm:$0xff]  }
 0x17d   :  { %6879 = vmatpush2.bf16.msra.mxu0 %v9427_v21  ;;  %v9505_v21 = vld [vmem:[#allocation2 + $0xc34] ss:$8 sps:$4 sm:$0xff]  }
 0x17e   :  { %6920 = vmatpush2.bf16.msra.mxu1 %v9430_v39  ;;  %6880 = vmatprep.subr.bf16.mxu0 %v9435_v24  ;;  %v9508_v39 = vld [vmem:[#allocation2 + $0xd34] ss:$8 sps:$4 sm:$0xff]   ;;  %v9503_v24 = vld [vmem:[#allocation2 + $0xc30] ss:$8 sps:$4 sm:$0xff]  }
 0x17f   :  { %6921 = vmatprep.subr.bf16.mxu1 %v9438_v40  ;;  %v9506_v40 = vld [vmem:[#allocation2 + $0xd30] ss:$8 sps:$4 sm:$0xff]  }
 0x181   :  { %6881 = vmatpush2.bf16.msra.mxu0 %v9433_v41  ;;  %v9511_v41 = vld [vmem:[#allocation2 + $0xc24] ss:$8 sps:$4 sm:$0xff]  }
 0x182   :  { %6922 = vmatpush2.bf16.msra.mxu1 %v9436_v42  ;;  %6882 = vmatprep.subr.bf16.mxu0 %v9441_v43  ;;  %v9514_v42 = vld [vmem:[#allocation2 + $0xd24] ss:$8 sps:$4 sm:$0xff]   ;;  %v9509_v43 = vld [vmem:[#allocation2 + $0xc20] ss:$8 sps:$4 sm:$0xff]  }
 0x183   :  { %6923 = vmatprep.subr.bf16.mxu1 %v9444_v44  ;;  %v9512_v44 = vld [vmem:[#allocation2 + $0xd20] ss:$8 sps:$4 sm:$0xff]  }
 0x185   :  { %6883 = vmatpush2.bf16.msra.mxu0 %v9439_v45  ;;  %v9517_v45 = vld [vmem:[#allocation2 + $0xc14] ss:$8 sps:$4 sm:$0xff]  }
 0x186   :  { %6924 = vmatpush2.bf16.msra.mxu1 %v9442_v46  ;;  %6884 = vmatprep.subr.bf16.mxu0 %v9447_v47  ;;  %v9520_v46 = vld [vmem:[#allocation2 + $0xd14] ss:$8 sps:$4 sm:$0xff]   ;;  %v9515_v47 = vld [vmem:[#allocation2 + $0xc10] ss:$8 sps:$4 sm:$0xff]  }
 0x187   :  { %6925 = vmatprep.subr.bf16.mxu1 %v9450_v48  ;;  %v9518_v48 = vld [vmem:[#allocation2 + $0xd10] ss:$8 sps:$4 sm:$0xff]  }
 0x189   :  { %6885 = vmatpush2.bf16.msra.mxu0 %v9445_v49  ;;  %v9523_v49 = vld [vmem:[#allocation2 + $0xc04] ss:$8 sps:$4 sm:$0xff]  }
 0x18a   :  { %6926 = vmatpush2.bf16.msra.mxu1 %v9448_v51  ;;  %6886 = vmatprep.subr.bf16.mxu0 %v9453_v52  ;;  %v9526_v51 = vld [vmem:[#allocation2 + $0xd04] ss:$8 sps:$4 sm:$0xff]   ;;  %v9521_v52 = vld [vmem:[#allocation2 + $0xc00] ss:$8 sps:$4 sm:$0xff]  }
 0x18b   :  { %6927 = vmatprep.subr.bf16.mxu1 %v9456_v53  ;;  %v9524_v53 = vld [vmem:[#allocation2 + $0xd00] ss:$8 sps:$4 sm:$0xff]  }
 0x18d   :  { %6887 = vmatpush2.bf16.msra.mxu0 %v9451_v54  ;;  %v9529_v54 = vld [vmem:[#allocation2 + $0xcf4] ss:$8 sps:$4 sm:$0xff]  }
 0x18e   :  { %6928 = vmatpush2.bf16.msra.mxu1 %v9454_v56  ;;  %6888 = vmatprep.subr.bf16.mxu0 %v9459_v59  ;;  %v9532_v56 = vld [vmem:[#allocation2 + $0xdf4] ss:$8 sps:$4 sm:$0xff]   ;;  %v9527_v59 = vld [vmem:[#allocation2 + $0xcf0] ss:$8 sps:$4 sm:$0xff]  }
 0x18f   :  { %6929 = vmatprep.subr.bf16.mxu1 %v9462_v60  ;;  %v9530_v60 = vld [vmem:[#allocation2 + $0xdf0] ss:$8 sps:$4 sm:$0xff]  }
 0x191   :  { %6889 = vmatpush2.bf16.msra.mxu0 %v9457_v34  ;;  %v9535_v34 = vld [vmem:[#allocation2 + $0xce4] ss:$8 sps:$4 sm:$0xff]  }
 0x192   :  { %6930 = vmatpush2.bf16.msra.mxu1 %v9460_v61  ;;  %6890 = vmatprep.subr.bf16.mxu0 %v9465_v35  ;;  %v9538_v61 = vld [vmem:[#allocation2 + $0xde4] ss:$8 sps:$4 sm:$0xff]   ;;  %v9533_v35 = vld [vmem:[#allocation2 + $0xce0] ss:$8 sps:$4 sm:$0xff]  }
 0x193   :  { %6931 = vmatprep.subr.bf16.mxu1 %v9468_v62  ;;  %v9536_v62 = vld [vmem:[#allocation2 + $0xde0] ss:$8 sps:$4 sm:$0xff]  }
 0x195   :  { %6891 = vmatpush2.bf16.msra.mxu0 %v9463_v63  ;;  %v9541_v63 = vld [vmem:[#allocation2 + $0xcd4] ss:$8 sps:$4 sm:$0xff]  }
 0x196   :  { %6932 = vmatpush2.bf16.msra.mxu1 %v9466_v0  ;;  %6892 = vmatprep.subr.bf16.mxu0 %v9471_v1  ;;  %v9544_v0 = vld [vmem:[#allocation2 + $0xdd4] ss:$8 sps:$4 sm:$0xff]   ;;  %v9539_v1 = vld [vmem:[#allocation2 + $0xcd0] ss:$8 sps:$4 sm:$0xff]  }
 0x197   :  { %6933 = vmatprep.subr.bf16.mxu1 %v9474_v2  ;;  %v9542_v2 = vld [vmem:[#allocation2 + $0xdd0] ss:$8 sps:$4 sm:$0xff]  }
 0x199   :  { %6893 = vmatpush2.bf16.msra.mxu0 %v9469_v3  ;;  %v9547_v3 = vld [vmem:[#allocation2 + $0xcc4] ss:$8 sps:$4 sm:$0xff]  }
 0x19a   :  { %6934 = vmatpush2.bf16.msra.mxu1 %v9472_v4  ;;  %6944 = vmatprep.subr.bf16.mxu0 %v9481_v5  ;;  %v9550_v4 = vld [vmem:[#allocation2 + $0xdc4] ss:$8 sps:$4 sm:$0xff]   ;;  %v9545_v5 = vld [vmem:[#allocation2 + $0xcc0] ss:$8 sps:$4 sm:$0xff]  }
 0x19b   :  { %6985 = vmatprep.subr.bf16.mxu1 %v9484_v7  ;;  %v9548_v7 = vld [vmem:[#allocation2 + $0xdc0] ss:$8 sps:$4 sm:$0xff]  }
 0x19c   :  { %v6650_v17 = vpop.f32.mrf.mxu0  ;;  %6895 = vmatmul.mubr.bf16.vlgmr.msra.gmra.mxu0 %v7805_v10  ;;  %v9551_v10 = vld [vmem:[#allocation2 + $0xcb0] ss:$8 sps:$4 sm:$0xff]  }
 0x19d   :  { %v6691_v20 = vpop.f32.mrf.mxu1  ;;  %6936 = vmatmul.mubr.bf16.vlgmr.msra.gmra.mxu1 %v7807_v11  ;;  %v6651_v22 = vadd.f32 %v6650_v17, %v10650_v6  ;;  %6945 = vmatpush1.bf16.msra.mxu0 %v9479_v8  ;;  %v9553_v8 = vld [vmem:[#allocation2 + $0xcb4] ss:$8 sps:$4 sm:$0xff]   ;;  %v9554_v11 = vld [vmem:[#allocation2 + $0xdb0] ss:$8 sps:$4 sm:$0xff]  }
 0x19e   :  { %6986 = vmatpush1.bf16.msra.mxu1 %v9482_v9  ;;  %v6652_v23 = vpop.f32.mrf.mxu0  ;;  %6946 = vmatprep.subr.bf16.mxu0 %v9487_v14  ;;  %v9556_v9 = vld [vmem:[#allocation2 + $0xdb4] ss:$8 sps:$4 sm:$0xff]   ;;  %v9559_v14 = vld [vmem:[#allocation2 + $0xca4] ss:$8 sps:$4 sm:$0xff]   ;;  %v9563_v17 = vld [vmem:[#allocation2 + $0xc90] ss:$8 sps:$4 sm:$0xff]  }
 0x19f   :  { %v6693_v25 = vpop.f32.mrf.mxu1  ;;  %6987 = vmatprep.subr.bf16.mxu1 %v9490_v15  ;;  %v10674_v28 = vadd.f32 %v6691_v20, %v6651_v22  ;;  %v6653_v18 = vadd.f32 %v6652_v23, %v10653_v12  ;;  %6976 = vmatprep.mubr.bf16.mxu0 %v7810_v58  ;;  %v9500_v12 = vld [vmem:[#allocation2 + $0xd40] ss:$8 sps:$4 sm:$0xff]   ;;  %v9562_v15 = vld [vmem:[#allocation2 + $0xda4] ss:$8 sps:$4 sm:$0xff]   ;;  %v9565_v58 = vld [vmem:[#allocation2 + $0xc94] ss:$8 sps:$4 sm:$0xff]  }
 0x1a0   :  { %7017 = vmatprep.mubr.bf16.mxu1 %v7812_v55  ;;  %v6654_v30 = vpop.f32.mrf.mxu0  ;;  %v9568_v55 = vld [vmem:[#allocation2 + $0xd94] ss:$8 sps:$4 sm:$0xff]   ;;  %v9566_v20 = vld [vmem:[#allocation2 + $0xd90] ss:$8 sps:$4 sm:$0xff]   ;;  %v9571_v22 = vld [vmem:[#allocation2 + $0xc84] ss:$8 sps:$4 sm:$0xff]  }
 0x1a1   :  { %v6695_v31 = vpop.f32.mrf.mxu1  ;;  %v10677_v32 = vadd.f32 %v6693_v25, %v6653_v18  ;;  %6947 = vmatpush1.bf16.msra.mxu0 %v9485_v57  ;;  %v9557_v57 = vld [vmem:[#allocation2 + $0xca0] ss:$8 sps:$4 sm:$0xff]   ;;  %v9574_v23 = vld [vmem:[#allocation2 + $0xd84] ss:$8 sps:$4 sm:$0xff]   ;;  %v9584_v18 = vld [vmem:[#allocation2 + $0xf74] ss:$8 sps:$4 sm:$0xff]   ;;  %v7809_v30 = vcombine.low %v10662_v50, %v10662_v50 }
 0x1a2   :  { %6988 = vmatpush1.bf16.msra.mxu1 %v9488_v16  ;;  %v6655_v6 = vpop.f32.mrf.mxu0  ;;  %6948 = vmatprep.subr.bf16.mxu0 %v9493_v26  ;;  %v9560_v16 = vld [vmem:[#allocation2 + $0xda0] ss:$8 sps:$4 sm:$0xff]   ;;  %v7811_v31 = vcombine.low %v10667_v13, %v10667_v13 }
 0x1a3   :  { %v6696_v33 = vpop.f32.mrf.mxu1  ;;  %6989 = vmatprep.subr.bf16.mxu1 %v9496_v27  ;;  %v9569_v25 = vld [vmem:[#allocation2 + $0xc80] ss:$8 sps:$4 sm:$0xff]   ;;  %v9581_v27 = vld [vmem:[#allocation2 + $0xe74] ss:$8 sps:$4 sm:$0xff]  }
 0x1a4   :  { %v9572_v26 = vld [vmem:[#allocation2 + $0xd80] ss:$8 sps:$4 sm:$0xff]   ;;  %v10686_v6 = vld [vmem:[%s10904_s0 + $0x70] sm:$0xff]  ;;  %v10691_v33 = vld [vmem:[%s10904_s0 + $0x78] sm:$0xff] }
 0x1a5   :  { %6949 = vmatpush1.bf16.msra.mxu0 %v9491_v19  ;;  %v9579_v19 = vld [vmem:[#allocation2 + $0xe70] ss:$8 sps:$4 sm:$0xff]   ;;  %v9585_v50 = vld [vmem:[#allocation2 + $0xe60] ss:$8 sps:$4 sm:$0xff]   ;;  %v7814_v13 = vcombine.high %v10686_v6, %v10686_v6 }
 0x1a6   :  { %6990 = vmatpush1.bf16.msra.mxu1 %v9494_v29  ;;  %6950 = vmatprep.subr.bf16.mxu0 %v9499_v36  ;;  %v9582_v29 = vld [vmem:[#allocation2 + $0xf70] ss:$8 sps:$4 sm:$0xff]   ;;  %v9587_v36 = vld [vmem:[#allocation2 + $0xe64] ss:$8 sps:$4 sm:$0xff]  }
 0x1a7   :  { %6991 = vmatprep.subr.bf16.mxu1 %v9502_v37  ;;  %v9590_v37 = vld [vmem:[#allocation2 + $0xf64] ss:$8 sps:$4 sm:$0xff]  }
 0x1a9   :  { %6951 = vmatpush1.bf16.msra.mxu0 %v9497_v38  ;;  %v9588_v38 = vld [vmem:[#allocation2 + $0xf60] ss:$8 sps:$4 sm:$0xff]  }
 0x1aa   :  { %6992 = vmatpush1.bf16.msra.mxu1 %v9500_v12  ;;  %6952 = vmatprep.subr.bf16.mxu0 %v9505_v21  ;;  %v7816_v12 = vcombine.high %v10691_v33, %v10691_v33 }
 0x1ab   :  { %6993 = vmatprep.subr.bf16.mxu1 %v9508_v39 }
 0x1ad   :  { %6953 = vmatpush1.bf16.msra.mxu0 %v9503_v24 }
 0x1ae   :  { %6994 = vmatpush1.bf16.msra.mxu1 %v9506_v40  ;;  %6954 = vmatprep.subr.bf16.mxu0 %v9511_v41 }
 0x1af   :  { %6995 = vmatprep.subr.bf16.mxu1 %v9514_v42  ;;  %v9593_v42 = vld [vmem:[#allocation2 + $0xe54] ss:$8 sps:$4 sm:$0xff]  }
 0x1b1   :  { %6955 = vmatpush1.bf16.msra.mxu0 %v9509_v43  ;;  %v9596_v43 = vld [vmem:[#allocation2 + $0xf54] ss:$8 sps:$4 sm:$0xff]  }
 0x1b2   :  { %6996 = vmatpush1.bf16.msra.mxu1 %v9512_v44  ;;  %6956 = vmatprep.subr.bf16.mxu0 %v9517_v45 }
 0x1b3   :  { %6997 = vmatprep.subr.bf16.mxu1 %v9520_v46  ;;  %v9591_v46 = vld [vmem:[#allocation2 + $0xe50] ss:$8 sps:$4 sm:$0xff]  }
 0x1b5   :  { %6957 = vmatpush1.bf16.msra.mxu0 %v9515_v47  ;;  %v9594_v47 = vld [vmem:[#allocation2 + $0xf50] ss:$8 sps:$4 sm:$0xff]  }
 0x1b6   :  { %6998 = vmatpush1.bf16.msra.mxu1 %v9518_v48  ;;  %6958 = vmatprep.subr.bf16.mxu0 %v9523_v49 }
 0x1b7   :  { %6999 = vmatprep.subr.bf16.mxu1 %v9526_v51 }
 0x1b9   :  { %6959 = vmatpush1.bf16.msra.mxu0 %v9521_v52 }
 0x1ba   :  { %7000 = vmatpush1.bf16.msra.mxu1 %v9524_v53  ;;  %6960 = vmatprep.subr.bf16.mxu0 %v9529_v54  ;;  %v9599_v53 = vld [vmem:[#allocation2 + $0xe44] ss:$8 sps:$4 sm:$0xff]  }
 0x1bb   :  { %7001 = vmatprep.subr.bf16.mxu1 %v9532_v56  ;;  %v9602_v54 = vld [vmem:[#allocation2 + $0xf44] ss:$8 sps:$4 sm:$0xff]   ;;  %v9597_v56 = vld [vmem:[#allocation2 + $0xe40] ss:$8 sps:$4 sm:$0xff]  }
 0x1bd   :  { %6961 = vmatpush2.bf16.msra.mxu0 %v9527_v59  ;;  %v9605_v59 = vld [vmem:[#allocation2 + $0xe34] ss:$8 sps:$4 sm:$0xff]  }
 0x1be   :  { %7002 = vmatpush2.bf16.msra.mxu1 %v9530_v60  ;;  %6962 = vmatprep.subr.bf16.mxu0 %v9535_v34  ;;  %v9608_v60 = vld [vmem:[#allocation2 + $0xf34] ss:$8 sps:$4 sm:$0xff]   ;;  %v9603_v34 = vld [vmem:[#allocation2 + $0xe30] ss:$8 sps:$4 sm:$0xff]  }
 0x1bf   :  { %7003 = vmatprep.subr.bf16.mxu1 %v9538_v61  ;;  %v9606_v61 = vld [vmem:[#allocation2 + $0xf30] ss:$8 sps:$4 sm:$0xff]  }
 0x1c1   :  { %6963 = vmatpush2.bf16.msra.mxu0 %v9533_v35  ;;  %v9611_v35 = vld [vmem:[#allocation2 + $0xe24] ss:$8 sps:$4 sm:$0xff]  }
 0x1c2   :  { %7004 = vmatpush2.bf16.msra.mxu1 %v9536_v62  ;;  %6964 = vmatprep.subr.bf16.mxu0 %v9541_v63  ;;  %v9614_v62 = vld [vmem:[#allocation2 + $0xf24] ss:$8 sps:$4 sm:$0xff]   ;;  %v9609_v63 = vld [vmem:[#allocation2 + $0xe20] ss:$8 sps:$4 sm:$0xff]  }
 0x1c3   :  { %7005 = vmatprep.subr.bf16.mxu1 %v9544_v0  ;;  %v9612_v0 = vld [vmem:[#allocation2 + $0xf20] ss:$8 sps:$4 sm:$0xff]  }
 0x1c5   :  { %6965 = vmatpush2.bf16.msra.mxu0 %v9539_v1  ;;  %v9617_v1 = vld [vmem:[#allocation2 + $0xe14] ss:$8 sps:$4 sm:$0xff]  }
 0x1c6   :  { %7006 = vmatpush2.bf16.msra.mxu1 %v9542_v2  ;;  %6966 = vmatprep.subr.bf16.mxu0 %v9547_v3  ;;  %v9620_v2 = vld [vmem:[#allocation2 + $0xf14] ss:$8 sps:$4 sm:$0xff]   ;;  %v9615_v3 = vld [vmem:[#allocation2 + $0xe10] ss:$8 sps:$4 sm:$0xff]  }
 0x1c7   :  { %7007 = vmatprep.subr.bf16.mxu1 %v9550_v4  ;;  %v9618_v4 = vld [vmem:[#allocation2 + $0xf10] ss:$8 sps:$4 sm:$0xff]  }
 0x1c9   :  { %6967 = vmatpush2.bf16.msra.mxu0 %v9545_v5  ;;  %v9623_v5 = vld [vmem:[#allocation2 + $0xe04] ss:$8 sps:$4 sm:$0xff]  }
 0x1ca   :  { %7008 = vmatpush2.bf16.msra.mxu1 %v9548_v7  ;;  %6968 = vmatprep.subr.bf16.mxu0 %v9553_v8  ;;  %v9626_v7 = vld [vmem:[#allocation2 + $0xf04] ss:$8 sps:$4 sm:$0xff]   ;;  %v9621_v8 = vld [vmem:[#allocation2 + $0xe00] ss:$8 sps:$4 sm:$0xff]  }
 0x1cb   :  { %7009 = vmatprep.subr.bf16.mxu1 %v9556_v9  ;;  %v9624_v9 = vld [vmem:[#allocation2 + $0xf00] ss:$8 sps:$4 sm:$0xff]  }
 0x1cd   :  { %6969 = vmatpush2.bf16.msra.mxu0 %v9551_v10  ;;  %v9629_v10 = vld [vmem:[#allocation2 + $0xef4] ss:$8 sps:$4 sm:$0xff]  }
 0x1ce   :  { %7010 = vmatpush2.bf16.msra.mxu1 %v9554_v11  ;;  %6970 = vmatprep.subr.bf16.mxu0 %v9559_v14  ;;  %v9632_v11 = vld [vmem:[#allocation2 + $0xff4] ss:$8 sps:$4 sm:$0xff]   ;;  %v9627_v14 = vld [vmem:[#allocation2 + $0xef0] ss:$8 sps:$4 sm:$0xff]  }
 0x1cf   :  { %7011 = vmatprep.subr.bf16.mxu1 %v9562_v15  ;;  %v9630_v15 = vld [vmem:[#allocation2 + $0xff0] ss:$8 sps:$4 sm:$0xff]  }
 0x1d1   :  { %6971 = vmatpush2.bf16.msra.mxu0 %v9557_v57  ;;  %v9635_v57 = vld [vmem:[#allocation2 + $0xee4] ss:$8 sps:$4 sm:$0xff]  }
 0x1d2   :  { %7012 = vmatpush2.bf16.msra.mxu1 %v9560_v16  ;;  %6972 = vmatprep.subr.bf16.mxu0 %v9565_v58  ;;  %v9638_v16 = vld [vmem:[#allocation2 + $0xfe4] ss:$8 sps:$4 sm:$0xff]   ;;  %v9633_v58 = vld [vmem:[#allocation2 + $0xee0] ss:$8 sps:$4 sm:$0xff]  }
 0x1d3   :  { %7013 = vmatprep.subr.bf16.mxu1 %v9568_v55  ;;  %v9636_v55 = vld [vmem:[#allocation2 + $0xfe0] ss:$8 sps:$4 sm:$0xff]  }
 0x1d5   :  { %6973 = vmatpush2.bf16.msra.mxu0 %v9563_v17  ;;  %v9641_v17 = vld [vmem:[#allocation2 + $0xed4] ss:$8 sps:$4 sm:$0xff]  }
 0x1d6   :  { %7014 = vmatpush2.bf16.msra.mxu1 %v9566_v20  ;;  %6974 = vmatprep.subr.bf16.mxu0 %v9571_v22  ;;  %v9644_v20 = vld [vmem:[#allocation2 + $0xfd4] ss:$8 sps:$4 sm:$0xff]   ;;  %v9639_v22 = vld [vmem:[#allocation2 + $0xed0] ss:$8 sps:$4 sm:$0xff]  }
 0x1d7   :  { %7015 = vmatprep.subr.bf16.mxu1 %v9574_v23  ;;  %v9642_v23 = vld [vmem:[#allocation2 + $0xfd0] ss:$8 sps:$4 sm:$0xff]  }
 0x1d9   :  { %6975 = vmatpush2.bf16.msra.mxu0 %v9569_v25  ;;  %v9647_v25 = vld [vmem:[#allocation2 + $0xec4] ss:$8 sps:$4 sm:$0xff]  }
 0x1da   :  { %7016 = vmatpush2.bf16.msra.mxu1 %v9572_v26  ;;  %7026 = vmatprep.subr.bf16.mxu0 %v9581_v27  ;;  %v9650_v26 = vld [vmem:[#allocation2 + $0xfc4] ss:$8 sps:$4 sm:$0xff]   ;;  %v9645_v27 = vld [vmem:[#allocation2 + $0xec0] ss:$8 sps:$4 sm:$0xff]  }
 0x1db   :  { %7067 = vmatprep.subr.bf16.mxu1 %v9584_v18  ;;  %v9648_v18 = vld [vmem:[#allocation2 + $0xfc0] ss:$8 sps:$4 sm:$0xff]  }
 0x1dc   :  { %v6732_v21 = vpop.f32.mrf.mxu0  ;;  %6977 = vmatmul.mubr.bf16.vlgmr.msra.gmra.mxu0 %v7809_v30  ;;  %v9651_v30 = vld [vmem:[#allocation2 + $0xeb0] ss:$8 sps:$4 sm:$0xff]  }
 0x1dd   :  { %v6773_v39 = vpop.f32.mrf.mxu1  ;;  %7018 = vmatmul.mubr.bf16.vlgmr.msra.gmra.mxu1 %v7811_v31  ;;  %v6733_v24 = vadd.f32 %v6732_v21, %v10674_v28  ;;  %7027 = vmatpush1.bf16.msra.mxu0 %v9579_v19  ;;  %v9653_v19 = vld [vmem:[#allocation2 + $0xeb4] ss:$8 sps:$4 sm:$0xff]   ;;  %v9654_v31 = vld [vmem:[#allocation2 + $0xfb0] ss:$8 sps:$4 sm:$0xff]  }
 0x1de   :  { %7068 = vmatpush1.bf16.msra.mxu1 %v9582_v29  ;;  %v6734_v40 = vpop.f32.mrf.mxu0  ;;  %7028 = vmatprep.subr.bf16.mxu0 %v9587_v36  ;;  %v9656_v29 = vld [vmem:[#allocation2 + $0xfb4] ss:$8 sps:$4 sm:$0xff]   ;;  %v9659_v36 = vld [vmem:[#allocation2 + $0xea4] ss:$8 sps:$4 sm:$0xff]   ;;  %v9663_v21 = vld [vmem:[#allocation2 + $0xe90] ss:$8 sps:$4 sm:$0xff]  }
 0x1df   :  { %v6775_v41 = vpop.f32.mrf.mxu1  ;;  %7069 = vmatprep.subr.bf16.mxu1 %v9590_v37  ;;  %v10698_v44 = vadd.f32 %v6773_v39, %v6733_v24  ;;  %v6735_v45 = vadd.f32 %v6734_v40, %v10677_v32  ;;  %7058 = vmatprep.mubr.bf16.mxu0 %v7814_v13  ;;  %v9600_v32 = vld [vmem:[#allocation2 + $0xf40] ss:$8 sps:$4 sm:$0xff]   ;;  %v9662_v37 = vld [vmem:[#allocation2 + $0xfa4] ss:$8 sps:$4 sm:$0xff]   ;;  %v9665_v13 = vld [vmem:[#allocation2 + $0xe94] ss:$8 sps:$4 sm:$0xff]  }
 0x1e0   :  { %7099 = vmatprep.mubr.bf16.mxu1 %v7816_v12  ;;  %v6736_v48 = vpop.f32.mrf.mxu0  ;;  %v9668_v12 = vld [vmem:[#allocation2 + $0xf94] ss:$8 sps:$4 sm:$0xff]   ;;  %v9666_v39 = vld [vmem:[#allocation2 + $0xf90] ss:$8 sps:$4 sm:$0xff]   ;;  %v9671_v24 = vld [vmem:[#allocation2 + $0xe84] ss:$8 sps:$4 sm:$0xff]  }
 0x1e1   :  { %v6777_v49 = vpop.f32.mrf.mxu1  ;;  %v10701_v51 = vadd.f32 %v6775_v41, %v6735_v45  ;;  %7029 = vmatpush1.bf16.msra.mxu0 %v9585_v50  ;;  %v9657_v50 = vld [vmem:[#allocation2 + $0xea0] ss:$8 sps:$4 sm:$0xff]   ;;  %v9674_v40 = vld [vmem:[#allocation2 + $0xf84] ss:$8 sps:$4 sm:$0xff]   ;;  %v9684_v45 = vld [vmem:[#allocation2 + $0x1174] ss:$8 sps:$4 sm:$0xff]   ;;  %v7813_v48 = vcombine.low %v10686_v6, %v10686_v6 }
 0x1e2   :  { %7070 = vmatpush1.bf16.msra.mxu1 %v9588_v38  ;;  %v6737_v28 = vpop.f32.mrf.mxu0  ;;  %7030 = vmatprep.subr.bf16.mxu0 %v9593_v42  ;;  %v9660_v38 = vld [vmem:[#allocation2 + $0xfa0] ss:$8 sps:$4 sm:$0xff]   ;;  %v7815_v49 = vcombine.low %v10691_v33, %v10691_v33 }
 0x1e3   :  { %v6778_v52 = vpop.f32.mrf.mxu1  ;;  %7071 = vmatprep.subr.bf16.mxu1 %v9596_v43  ;;  %v9669_v41 = vld [vmem:[#allocation2 + $0xe80] ss:$8 sps:$4 sm:$0xff]   ;;  %v9681_v43 = vld [vmem:[#allocation2 + $0x1074] ss:$8 sps:$4 sm:$0xff]  }
 0x1e4   :  { %v9672_v42 = vld [vmem:[#allocation2 + $0xf80] ss:$8 sps:$4 sm:$0xff]  }
 0x1e5   :  { %7031 = vmatpush1.bf16.msra.mxu0 %v9591_v46  ;;  %v9679_v46 = vld [vmem:[#allocation2 + $0x1070] ss:$8 sps:$4 sm:$0xff]   ;;  %v10710_v28 = vld [vmem:[%s10904_s0 + $0x80] sm:$0xff]  ;;  %v10715_v52 = vld [vmem:[%s10904_s0 + $0x88] sm:$0xff] }
 0x1e6   :  { %7072 = vmatpush1.bf16.msra.mxu1 %v9594_v47  ;;  %7032 = vmatprep.subr.bf16.mxu0 %v9599_v53  ;;  %v9682_v47 = vld [vmem:[#allocation2 + $0x1170] ss:$8 sps:$4 sm:$0xff]   ;;  %v9687_v53 = vld [vmem:[#allocation2 + $0x1064] ss:$8 sps:$4 sm:$0xff]   ;;  %v9685_v6 = vld [vmem:[#allocation2 + $0x1060] ss:$8 sps:$4 sm:$0xff]   ;;  %v7818_v33 = vcombine.high %v10710_v28, %v10710_v28 }
 0x1e7   :  { %7073 = vmatprep.subr.bf16.mxu1 %v9602_v54  ;;  %v9690_v54 = vld [vmem:[#allocation2 + $0x1164] ss:$8 sps:$4 sm:$0xff]  }
 0x1e9   :  { %7033 = vmatpush1.bf16.msra.mxu0 %v9597_v56  ;;  %v9688_v56 = vld [vmem:[#allocation2 + $0x1160] ss:$8 sps:$4 sm:$0xff]  }
 0x1ea   :  { %7074 = vmatpush1.bf16.msra.mxu1 %v9600_v32  ;;  %7034 = vmatprep.subr.bf16.mxu0 %v9605_v59  ;;  %v7820_v32 = vcombine.high %v10715_v52, %v10715_v52 }
 0x1eb   :  { %7075 = vmatprep.subr.bf16.mxu1 %v9608_v60 }
 0x1ed   :  { %7035 = vmatpush1.bf16.msra.mxu0 %v9603_v34 }
 0x1ee   :  { %7076 = vmatpush1.bf16.msra.mxu1 %v9606_v61  ;;  %7036 = vmatprep.subr.bf16.mxu0 %v9611_v35 }
 0x1ef   :  { %7077 = vmatprep.subr.bf16.mxu1 %v9614_v62  ;;  %v9693_v62 = vld [vmem:[#allocation2 + $0x1054] ss:$8 sps:$4 sm:$0xff]  }
 0x1f1   :  { %7037 = vmatpush1.bf16.msra.mxu0 %v9609_v63  ;;  %v9696_v63 = vld [vmem:[#allocation2 + $0x1154] ss:$8 sps:$4 sm:$0xff]  }
 0x1f2   :  { %7078 = vmatpush1.bf16.msra.mxu1 %v9612_v0  ;;  %7038 = vmatprep.subr.bf16.mxu0 %v9617_v1 }
 0x1f3   :  { %7079 = vmatprep.subr.bf16.mxu1 %v9620_v2  ;;  %v9691_v2 = vld [vmem:[#allocation2 + $0x1050] ss:$8 sps:$4 sm:$0xff]  }
 0x1f5   :  { %7039 = vmatpush1.bf16.msra.mxu0 %v9615_v3  ;;  %v9694_v3 = vld [vmem:[#allocation2 + $0x1150] ss:$8 sps:$4 sm:$0xff]  }
 0x1f6   :  { %7080 = vmatpush1.bf16.msra.mxu1 %v9618_v4  ;;  %7040 = vmatprep.subr.bf16.mxu0 %v9623_v5 }
 0x1f7   :  { %7081 = vmatprep.subr.bf16.mxu1 %v9626_v7 }
 0x1f9   :  { %7041 = vmatpush1.bf16.msra.mxu0 %v9621_v8 }
 0x1fa   :  { %7082 = vmatpush1.bf16.msra.mxu1 %v9624_v9  ;;  %7042 = vmatprep.subr.bf16.mxu0 %v9629_v10  ;;  %v9699_v9 = vld [vmem:[#allocation2 + $0x1044] ss:$8 sps:$4 sm:$0xff]  }
 0x1fb   :  { %7083 = vmatprep.subr.bf16.mxu1 %v9632_v11  ;;  %v9702_v10 = vld [vmem:[#allocation2 + $0x1144] ss:$8 sps:$4 sm:$0xff]   ;;  %v9697_v11 = vld [vmem:[#allocation2 + $0x1040] ss:$8 sps:$4 sm:$0xff]  }
 0x1fd   :  { %7043 = vmatpush2.bf16.msra.mxu0 %v9627_v14  ;;  %v9705_v14 = vld [vmem:[#allocation2 + $0x1034] ss:$8 sps:$4 sm:$0xff]  }
 0x1fe   :  { %7084 = vmatpush2.bf16.msra.mxu1 %v9630_v15  ;;  %7044 = vmatprep.subr.bf16.mxu0 %v9635_v57  ;;  %v9708_v15 = vld [vmem:[#allocation2 + $0x1134] ss:$8 sps:$4 sm:$0xff]   ;;  %v9703_v57 = vld [vmem:[#allocation2 + $0x1030] ss:$8 sps:$4 sm:$0xff]  }
 0x1ff   :  { %7085 = vmatprep.subr.bf16.mxu1 %v9638_v16  ;;  %v9706_v16 = vld [vmem:[#allocation2 + $0x1130] ss:$8 sps:$4 sm:$0xff]  }
 0x201   :  { %7045 = vmatpush2.bf16.msra.mxu0 %v9633_v58  ;;  %v9711_v58 = vld [vmem:[#allocation2 + $0x1024] ss:$8 sps:$4 sm:$0xff]  }
 0x202   :  { %7086 = vmatpush2.bf16.msra.mxu1 %v9636_v55  ;;  %7046 = vmatprep.subr.bf16.mxu0 %v9641_v17  ;;  %v9714_v55 = vld [vmem:[#allocation2 + $0x1124] ss:$8 sps:$4 sm:$0xff]   ;;  %v9709_v17 = vld [vmem:[#allocation2 + $0x1020] ss:$8 sps:$4 sm:$0xff]  }
 0x203   :  { %7087 = vmatprep.subr.bf16.mxu1 %v9644_v20  ;;  %v9712_v20 = vld [vmem:[#allocation2 + $0x1120] ss:$8 sps:$4 sm:$0xff]  }
 0x205   :  { %7047 = vmatpush2.bf16.msra.mxu0 %v9639_v22  ;;  %v9717_v22 = vld [vmem:[#allocation2 + $0x1014] ss:$8 sps:$4 sm:$0xff]  }
 0x206   :  { %7088 = vmatpush2.bf16.msra.mxu1 %v9642_v23  ;;  %7048 = vmatprep.subr.bf16.mxu0 %v9647_v25  ;;  %v9720_v23 = vld [vmem:[#allocation2 + $0x1114] ss:$8 sps:$4 sm:$0xff]   ;;  %v9715_v25 = vld [vmem:[#allocation2 + $0x1010] ss:$8 sps:$4 sm:$0xff]  }
 0x207   :  { %7089 = vmatprep.subr.bf16.mxu1 %v9650_v26  ;;  %v9718_v26 = vld [vmem:[#allocation2 + $0x1110] ss:$8 sps:$4 sm:$0xff]  }
 0x209   :  { %7049 = vmatpush2.bf16.msra.mxu0 %v9645_v27  ;;  %v9723_v27 = vld [vmem:[#allocation2 + $0x1004] ss:$8 sps:$4 sm:$0xff]  }
 0x20a   :  { %7090 = vmatpush2.bf16.msra.mxu1 %v9648_v18  ;;  %7050 = vmatprep.subr.bf16.mxu0 %v9653_v19  ;;  %v9726_v18 = vld [vmem:[#allocation2 + $0x1104] ss:$8 sps:$4 sm:$0xff]   ;;  %v9721_v19 = vld [vmem:[#allocation2 + $0x1000] ss:$8 sps:$4 sm:$0xff]  }
 0x20b   :  { %7091 = vmatprep.subr.bf16.mxu1 %v9656_v29  ;;  %v9724_v29 = vld [vmem:[#allocation2 + $0x1100] ss:$8 sps:$4 sm:$0xff]  }
 0x20d   :  { %7051 = vmatpush2.bf16.msra.mxu0 %v9651_v30  ;;  %v9729_v30 = vld [vmem:[#allocation2 + $0x10f4] ss:$8 sps:$4 sm:$0xff]  }
 0x20e   :  { %7092 = vmatpush2.bf16.msra.mxu1 %v9654_v31  ;;  %7052 = vmatprep.subr.bf16.mxu0 %v9659_v36  ;;  %v9732_v31 = vld [vmem:[#allocation2 + $0x11f4] ss:$8 sps:$4 sm:$0xff]   ;;  %v9727_v36 = vld [vmem:[#allocation2 + $0x10f0] ss:$8 sps:$4 sm:$0xff]  }
 0x20f   :  { %7093 = vmatprep.subr.bf16.mxu1 %v9662_v37  ;;  %v9730_v37 = vld [vmem:[#allocation2 + $0x11f0] ss:$8 sps:$4 sm:$0xff]  }
 0x211   :  { %7053 = vmatpush2.bf16.msra.mxu0 %v9657_v50  ;;  %v9735_v50 = vld [vmem:[#allocation2 + $0x10e4] ss:$8 sps:$4 sm:$0xff]  }
 0x212   :  { %7094 = vmatpush2.bf16.msra.mxu1 %v9660_v38  ;;  %7054 = vmatprep.subr.bf16.mxu0 %v9665_v13  ;;  %v9738_v38 = vld [vmem:[#allocation2 + $0x11e4] ss:$8 sps:$4 sm:$0xff]   ;;  %v9733_v13 = vld [vmem:[#allocation2 + $0x10e0] ss:$8 sps:$4 sm:$0xff]  }
 0x213   :  { %7095 = vmatprep.subr.bf16.mxu1 %v9668_v12  ;;  %v9736_v12 = vld [vmem:[#allocation2 + $0x11e0] ss:$8 sps:$4 sm:$0xff]  }
 0x215   :  { %7055 = vmatpush2.bf16.msra.mxu0 %v9663_v21  ;;  %v9741_v21 = vld [vmem:[#allocation2 + $0x10d4] ss:$8 sps:$4 sm:$0xff]  }
 0x216   :  { %7096 = vmatpush2.bf16.msra.mxu1 %v9666_v39  ;;  %7056 = vmatprep.subr.bf16.mxu0 %v9671_v24  ;;  %v9744_v39 = vld [vmem:[#allocation2 + $0x11d4] ss:$8 sps:$4 sm:$0xff]   ;;  %v9739_v24 = vld [vmem:[#allocation2 + $0x10d0] ss:$8 sps:$4 sm:$0xff]  }
 0x217   :  { %7097 = vmatprep.subr.bf16.mxu1 %v9674_v40  ;;  %v9742_v40 = vld [vmem:[#allocation2 + $0x11d0] ss:$8 sps:$4 sm:$0xff]  }
 0x219   :  { %7057 = vmatpush2.bf16.msra.mxu0 %v9669_v41  ;;  %v9747_v41 = vld [vmem:[#allocation2 + $0x10c4] ss:$8 sps:$4 sm:$0xff]  }
 0x21a   :  { %7098 = vmatpush2.bf16.msra.mxu1 %v9672_v42  ;;  %7108 = vmatprep.subr.bf16.mxu0 %v9681_v43  ;;  %v9750_v42 = vld [vmem:[#allocation2 + $0x11c4] ss:$8 sps:$4 sm:$0xff]   ;;  %v9745_v43 = vld [vmem:[#allocation2 + $0x10c0] ss:$8 sps:$4 sm:$0xff]  }
 0x21b   :  { %7149 = vmatprep.subr.bf16.mxu1 %v9684_v45  ;;  %v9748_v45 = vld [vmem:[#allocation2 + $0x11c0] ss:$8 sps:$4 sm:$0xff]  }
 0x21c   :  { %v6814_v59 = vpop.f32.mrf.mxu0  ;;  %7059 = vmatmul.mubr.bf16.vlgmr.msra.gmra.mxu0 %v7813_v48  ;;  %v9751_v48 = vld [vmem:[#allocation2 + $0x10b0] ss:$8 sps:$4 sm:$0xff]  }
 0x21d   :  { %v6855_v60 = vpop.f32.mrf.mxu1  ;;  %7100 = vmatmul.mubr.bf16.vlgmr.msra.gmra.mxu1 %v7815_v49  ;;  %v6815_v34 = vadd.f32 %v6814_v59, %v10698_v44  ;;  %7109 = vmatpush1.bf16.msra.mxu0 %v9679_v46  ;;  %v9753_v46 = vld [vmem:[#allocation2 + $0x10b4] ss:$8 sps:$4 sm:$0xff]   ;;  %v9754_v49 = vld [vmem:[#allocation2 + $0x11b0] ss:$8 sps:$4 sm:$0xff]  }
 0x21e   :  { %7150 = vmatpush1.bf16.msra.mxu1 %v9682_v47  ;;  %v6816_v61 = vpop.f32.mrf.mxu0  ;;  %7110 = vmatprep.subr.bf16.mxu0 %v9687_v53  ;;  %v9756_v47 = vld [vmem:[#allocation2 + $0x11b4] ss:$8 sps:$4 sm:$0xff]   ;;  %v9759_v53 = vld [vmem:[#allocation2 + $0x10a4] ss:$8 sps:$4 sm:$0xff]   ;;  %v9763_v59 = vld [vmem:[#allocation2 + $0x1090] ss:$8 sps:$4 sm:$0xff]  }
 0x21f   :  { %v6857_v35 = vpop.f32.mrf.mxu1  ;;  %7151 = vmatprep.subr.bf16.mxu1 %v9690_v54  ;;  %v10722_v0 = vadd.f32 %v6855_v60, %v6815_v34  ;;  %v6817_v1 = vadd.f32 %v6816_v61, %v10701_v51  ;;  %7140 = vmatprep.mubr.bf16.mxu0 %v7818_v33  ;;  %v9700_v51 = vld [vmem:[#allocation2 + $0x1140] ss:$8 sps:$4 sm:$0xff]   ;;  %v9762_v54 = vld [vmem:[#allocation2 + $0x11a4] ss:$8 sps:$4 sm:$0xff]   ;;  %v9765_v33 = vld [vmem:[#allocation2 + $0x1094] ss:$8 sps:$4 sm:$0xff]  }
 0x220   :  { %7181 = vmatprep.mubr.bf16.mxu1 %v7820_v32  ;;  %v6818_v4 = vpop.f32.mrf.mxu0  ;;  %v9768_v32 = vld [vmem:[#allocation2 + $0x1194] ss:$8 sps:$4 sm:$0xff]   ;;  %v9766_v60 = vld [vmem:[#allocation2 + $0x1190] ss:$8 sps:$4 sm:$0xff]   ;;  %v9771_v34 = vld [vmem:[#allocation2 + $0x1084] ss:$8 sps:$4 sm:$0xff]  }
 0x221   :  { %v6859_v5 = vpop.f32.mrf.mxu1  ;;  %v10725_v7 = vadd.f32 %v6857_v35, %v6817_v1  ;;  %7111 = vmatpush1.bf16.msra.mxu0 %v9685_v6  ;;  %v9757_v6 = vld [vmem:[#allocation2 + $0x10a0] ss:$8 sps:$4 sm:$0xff]   ;;  %v9774_v61 = vld [vmem:[#allocation2 + $0x1184] ss:$8 sps:$4 sm:$0xff]   ;;  %v9784_v1 = vld [vmem:[#allocation2 + $0x1374] ss:$8 sps:$4 sm:$0xff]   ;;  %v7817_v4 = vcombine.low %v10710_v28, %v10710_v28 }
 0x222   :  { %7152 = vmatpush1.bf16.msra.mxu1 %v9688_v56  ;;  %v6819_v44 = vpop.f32.mrf.mxu0  ;;  %7112 = vmatprep.subr.bf16.mxu0 %v9693_v62  ;;  %v9760_v56 = vld [vmem:[#allocation2 + $0x11a0] ss:$8 sps:$4 sm:$0xff]   ;;  %v7819_v5 = vcombine.low %v10715_v52, %v10715_v52 }
 0x223   :  { %v6860_v8 = vpop.f32.mrf.mxu1  ;;  %7153 = vmatprep.subr.bf16.mxu1 %v9696_v63  ;;  %v9769_v35 = vld [vmem:[#allocation2 + $0x1080] ss:$8 sps:$4 sm:$0xff]   ;;  %v9781_v63 = vld [vmem:[#allocation2 + $0x1274] ss:$8 sps:$4 sm:$0xff]  }
 0x224   :  { %v9772_v62 = vld [vmem:[#allocation2 + $0x1180] ss:$8 sps:$4 sm:$0xff]   ;;  %v10734_v44 = vld [vmem:[%s10904_s0 + $0x90] sm:$0xff]  ;;  %v10739_v8 = vld [vmem:[%s10904_s0 + $0x98] sm:$0xff] }
 0x225   :  { %7113 = vmatpush1.bf16.msra.mxu0 %v9691_v2  ;;  %v9779_v2 = vld [vmem:[#allocation2 + $0x1270] ss:$8 sps:$4 sm:$0xff]   ;;  %v9785_v28 = vld [vmem:[#allocation2 + $0x1260] ss:$8 sps:$4 sm:$0xff]   ;;  %v7822_v52 = vcombine.high %v10734_v44, %v10734_v44 }
 0x226   :  { %7154 = vmatpush1.bf16.msra.mxu1 %v9694_v3  ;;  %7114 = vmatprep.subr.bf16.mxu0 %v9699_v9  ;;  %v9782_v3 = vld [vmem:[#allocation2 + $0x1370] ss:$8 sps:$4 sm:$0xff]   ;;  %v9787_v9 = vld [vmem:[#allocation2 + $0x1264] ss:$8 sps:$4 sm:$0xff]  }
 0x227   :  { %7155 = vmatprep.subr.bf16.mxu1 %v9702_v10  ;;  %v9790_v10 = vld [vmem:[#allocation2 + $0x1364] ss:$8 sps:$4 sm:$0xff]  }
 0x229   :  { %7115 = vmatpush1.bf16.msra.mxu0 %v9697_v11  ;;  %v9788_v11 = vld [vmem:[#allocation2 + $0x1360] ss:$8 sps:$4 sm:$0xff]  }
 0x22a   :  { %7156 = vmatpush1.bf16.msra.mxu1 %v9700_v51  ;;  %7116 = vmatprep.subr.bf16.mxu0 %v9705_v14  ;;  %v7824_v51 = vcombine.high %v10739_v8, %v10739_v8 }
 0x22b   :  { %7157 = vmatprep.subr.bf16.mxu1 %v9708_v15 }
 0x22d   :  { %7117 = vmatpush1.bf16.msra.mxu0 %v9703_v57 }
 0x22e   :  { %7158 = vmatpush1.bf16.msra.mxu1 %v9706_v16  ;;  %7118 = vmatprep.subr.bf16.mxu0 %v9711_v58 }
 0x22f   :  { %7159 = vmatprep.subr.bf16.mxu1 %v9714_v55  ;;  %v9793_v55 = vld [vmem:[#allocation2 + $0x1254] ss:$8 sps:$4 sm:$0xff]  }
 0x231   :  { %7119 = vmatpush1.bf16.msra.mxu0 %v9709_v17  ;;  %v9796_v17 = vld [vmem:[#allocation2 + $0x1354] ss:$8 sps:$4 sm:$0xff]  }
 0x232   :  { %7160 = vmatpush1.bf16.msra.mxu1 %v9712_v20  ;;  %7120 = vmatprep.subr.bf16.mxu0 %v9717_v22 }
 0x233   :  { %7161 = vmatprep.subr.bf16.mxu1 %v9720_v23  ;;  %v9791_v23 = vld [vmem:[#allocation2 + $0x1250] ss:$8 sps:$4 sm:$0xff]  }
 0x235   :  { %7121 = vmatpush1.bf16.msra.mxu0 %v9715_v25  ;;  %v9794_v25 = vld [vmem:[#allocation2 + $0x1350] ss:$8 sps:$4 sm:$0xff]  }
 0x236   :  { %7162 = vmatpush1.bf16.msra.mxu1 %v9718_v26  ;;  %7122 = vmatprep.subr.bf16.mxu0 %v9723_v27 }
 0x237   :  { %7163 = vmatprep.subr.bf16.mxu1 %v9726_v18 }
 0x239   :  { %7123 = vmatpush1.bf16.msra.mxu0 %v9721_v19 }
 0x23a   :  { %7164 = vmatpush1.bf16.msra.mxu1 %v9724_v29  ;;  %7124 = vmatprep.subr.bf16.mxu0 %v9729_v30  ;;  %v9799_v29 = vld [vmem:[#allocation2 + $0x1244] ss:$8 sps:$4 sm:$0xff]  }
 0x23b   :  { %7165 = vmatprep.subr.bf16.mxu1 %v9732_v31  ;;  %v9802_v30 = vld [vmem:[#allocation2 + $0x1344] ss:$8 sps:$4 sm:$0xff]   ;;  %v9797_v31 = vld [vmem:[#allocation2 + $0x1240] ss:$8 sps:$4 sm:$0xff]  }
 0x23d   :  { %7125 = vmatpush2.bf16.msra.mxu0 %v9727_v36  ;;  %v9805_v36 = vld [vmem:[#allocation2 + $0x1234] ss:$8 sps:$4 sm:$0xff]  }
 0x23e   :  { %7166 = vmatpush2.bf16.msra.mxu1 %v9730_v37  ;;  %7126 = vmatprep.subr.bf16.mxu0 %v9735_v50  ;;  %v9808_v37 = vld [vmem:[#allocation2 + $0x1334] ss:$8 sps:$4 sm:$0xff]   ;;  %v9803_v50 = vld [vmem:[#allocation2 + $0x1230] ss:$8 sps:$4 sm:$0xff]  }
 0x23f   :  { %7167 = vmatprep.subr.bf16.mxu1 %v9738_v38  ;;  %v9806_v38 = vld [vmem:[#allocation2 + $0x1330] ss:$8 sps:$4 sm:$0xff]  }
 0x241   :  { %7127 = vmatpush2.bf16.msra.mxu0 %v9733_v13  ;;  %v9811_v13 = vld [vmem:[#allocation2 + $0x1224] ss:$8 sps:$4 sm:$0xff]  }
 0x242   :  { %7168 = vmatpush2.bf16.msra.mxu1 %v9736_v12  ;;  %7128 = vmatprep.subr.bf16.mxu0 %v9741_v21  ;;  %v9814_v12 = vld [vmem:[#allocation2 + $0x1324] ss:$8 sps:$4 sm:$0xff]   ;;  %v9809_v21 = vld [vmem:[#allocation2 + $0x1220] ss:$8 sps:$4 sm:$0xff]  }
 0x243   :  { %7169 = vmatprep.subr.bf16.mxu1 %v9744_v39  ;;  %v9812_v39 = vld [vmem:[#allocation2 + $0x1320] ss:$8 sps:$4 sm:$0xff]  }
 0x245   :  { %7129 = vmatpush2.bf16.msra.mxu0 %v9739_v24  ;;  %v9817_v24 = vld [vmem:[#allocation2 + $0x1214] ss:$8 sps:$4 sm:$0xff]  }
 0x246   :  { %7170 = vmatpush2.bf16.msra.mxu1 %v9742_v40  ;;  %7130 = vmatprep.subr.bf16.mxu0 %v9747_v41  ;;  %v9820_v40 = vld [vmem:[#allocation2 + $0x1314] ss:$8 sps:$4 sm:$0xff]   ;;  %v9815_v41 = vld [vmem:[#allocation2 + $0x1210] ss:$8 sps:$4 sm:$0xff]  }
 0x247   :  { %7171 = vmatprep.subr.bf16.mxu1 %v9750_v42  ;;  %v9818_v42 = vld [vmem:[#allocation2 + $0x1310] ss:$8 sps:$4 sm:$0xff]  }
 0x249   :  { %7131 = vmatpush2.bf16.msra.mxu0 %v9745_v43  ;;  %v9823_v43 = vld [vmem:[#allocation2 + $0x1204] ss:$8 sps:$4 sm:$0xff]  }
 0x24a   :  { %7172 = vmatpush2.bf16.msra.mxu1 %v9748_v45  ;;  %7132 = vmatprep.subr.bf16.mxu0 %v9753_v46  ;;  %v9826_v45 = vld [vmem:[#allocation2 + $0x1304] ss:$8 sps:$4 sm:$0xff]   ;;  %v9821_v46 = vld [vmem:[#allocation2 + $0x1200] ss:$8 sps:$4 sm:$0xff]  }
 0x24b   :  { %7173 = vmatprep.subr.bf16.mxu1 %v9756_v47  ;;  %v9824_v47 = vld [vmem:[#allocation2 + $0x1300] ss:$8 sps:$4 sm:$0xff]  }
 0x24d   :  { %7133 = vmatpush2.bf16.msra.mxu0 %v9751_v48  ;;  %v9829_v48 = vld [vmem:[#allocation2 + $0x12f4] ss:$8 sps:$4 sm:$0xff]  }
 0x24e   :  { %7174 = vmatpush2.bf16.msra.mxu1 %v9754_v49  ;;  %7134 = vmatprep.subr.bf16.mxu0 %v9759_v53  ;;  %v9832_v49 = vld [vmem:[#allocation2 + $0x13f4] ss:$8 sps:$4 sm:$0xff]   ;;  %v9827_v53 = vld [vmem:[#allocation2 + $0x12f0] ss:$8 sps:$4 sm:$0xff]  }
 0x24f   :  { %7175 = vmatprep.subr.bf16.mxu1 %v9762_v54  ;;  %v9830_v54 = vld [vmem:[#allocation2 + $0x13f0] ss:$8 sps:$4 sm:$0xff]  }
 0x251   :  { %7135 = vmatpush2.bf16.msra.mxu0 %v9757_v6  ;;  %v9835_v6 = vld [vmem:[#allocation2 + $0x12e4] ss:$8 sps:$4 sm:$0xff]  }
 0x252   :  { %7176 = vmatpush2.bf16.msra.mxu1 %v9760_v56  ;;  %7136 = vmatprep.subr.bf16.mxu0 %v9765_v33  ;;  %v9838_v56 = vld [vmem:[#allocation2 + $0x13e4] ss:$8 sps:$4 sm:$0xff]   ;;  %v9833_v33 = vld [vmem:[#allocation2 + $0x12e0] ss:$8 sps:$4 sm:$0xff]  }
 0x253   :  { %7177 = vmatprep.subr.bf16.mxu1 %v9768_v32  ;;  %v9836_v32 = vld [vmem:[#allocation2 + $0x13e0] ss:$8 sps:$4 sm:$0xff]  }
 0x255   :  { %7137 = vmatpush2.bf16.msra.mxu0 %v9763_v59  ;;  %v9841_v59 = vld [vmem:[#allocation2 + $0x12d4] ss:$8 sps:$4 sm:$0xff]  }
 0x256   :  { %7178 = vmatpush2.bf16.msra.mxu1 %v9766_v60  ;;  %7138 = vmatprep.subr.bf16.mxu0 %v9771_v34  ;;  %v9844_v60 = vld [vmem:[#allocation2 + $0x13d4] ss:$8 sps:$4 sm:$0xff]   ;;  %v9839_v34 = vld [vmem:[#allocation2 + $0x12d0] ss:$8 sps:$4 sm:$0xff]  }
 0x257   :  { %7179 = vmatprep.subr.bf16.mxu1 %v9774_v61  ;;  %v9842_v61 = vld [vmem:[#allocation2 + $0x13d0] ss:$8 sps:$4 sm:$0xff]  }
 0x259   :  { %7139 = vmatpush2.bf16.msra.mxu0 %v9769_v35  ;;  %v9847_v35 = vld [vmem:[#allocation2 + $0x12c4] ss:$8 sps:$4 sm:$0xff]  }
 0x25a   :  { %7180 = vmatpush2.bf16.msra.mxu1 %v9772_v62  ;;  %7190 = vmatprep.subr.bf16.mxu0 %v9781_v63  ;;  %v9850_v62 = vld [vmem:[#allocation2 + $0x13c4] ss:$8 sps:$4 sm:$0xff]   ;;  %v9845_v63 = vld [vmem:[#allocation2 + $0x12c0] ss:$8 sps:$4 sm:$0xff]  }
 0x25b   :  { %7231 = vmatprep.subr.bf16.mxu1 %v9784_v1  ;;  %v9848_v1 = vld [vmem:[#allocation2 + $0x13c0] ss:$8 sps:$4 sm:$0xff]  }
 0x25c   :  { %v6896_v14 = vpop.f32.mrf.mxu0  ;;  %7141 = vmatmul.mubr.bf16.vlgmr.msra.gmra.mxu0 %v7817_v4  ;;  %v9851_v4 = vld [vmem:[#allocation2 + $0x12b0] ss:$8 sps:$4 sm:$0xff]  }
 0x25d   :  { %v6937_v15 = vpop.f32.mrf.mxu1  ;;  %7182 = vmatmul.mubr.bf16.vlgmr.msra.gmra.mxu1 %v7819_v5  ;;  %v6897_v57 = vadd.f32 %v6896_v14, %v10722_v0  ;;  %7191 = vmatpush1.bf16.msra.mxu0 %v9779_v2  ;;  %v9853_v2 = vld [vmem:[#allocation2 + $0x12b4] ss:$8 sps:$4 sm:$0xff]   ;;  %v9854_v5 = vld [vmem:[#allocation2 + $0x13b0] ss:$8 sps:$4 sm:$0xff]  }
 0x25e   :  { %7232 = vmatpush1.bf16.msra.mxu1 %v9782_v3  ;;  %v6898_v16 = vpop.f32.mrf.mxu0  ;;  %7192 = vmatprep.subr.bf16.mxu0 %v9787_v9  ;;  %v9856_v3 = vld [vmem:[#allocation2 + $0x13b4] ss:$8 sps:$4 sm:$0xff]   ;;  %v9859_v9 = vld [vmem:[#allocation2 + $0x12a4] ss:$8 sps:$4 sm:$0xff]   ;;  %v9863_v14 = vld [vmem:[#allocation2 + $0x1290] ss:$8 sps:$4 sm:$0xff]  }
 0x25f   :  { %v6939_v58 = vpop.f32.mrf.mxu1  ;;  %7233 = vmatprep.subr.bf16.mxu1 %v9790_v10  ;;  %v10746_v20 = vadd.f32 %v6937_v15, %v6897_v57  ;;  %v6899_v22 = vadd.f32 %v6898_v16, %v10725_v7  ;;  %7222 = vmatprep.mubr.bf16.mxu0 %v7822_v52  ;;  %v9800_v7 = vld [vmem:[#allocation2 + $0x1340] ss:$8 sps:$4 sm:$0xff]   ;;  %v9862_v10 = vld [vmem:[#allocation2 + $0x13a4] ss:$8 sps:$4 sm:$0xff]   ;;  %v9865_v52 = vld [vmem:[#allocation2 + $0x1294] ss:$8 sps:$4 sm:$0xff]  }
 0x260   :  { %7263 = vmatprep.mubr.bf16.mxu1 %v7824_v51  ;;  %v6900_v26 = vpop.f32.mrf.mxu0  ;;  %v9868_v51 = vld [vmem:[#allocation2 + $0x1394] ss:$8 sps:$4 sm:$0xff]   ;;  %v9866_v15 = vld [vmem:[#allocation2 + $0x1390] ss:$8 sps:$4 sm:$0xff]   ;;  %v9871_v57 = vld [vmem:[#allocation2 + $0x1284] ss:$8 sps:$4 sm:$0xff]  }
 0x261   :  { %v6941_v27 = vpop.f32.mrf.mxu1  ;;  %v10749_v18 = vadd.f32 %v6939_v58, %v6899_v22  ;;  %7193 = vmatpush1.bf16.msra.mxu0 %v9785_v28  ;;  %v9857_v28 = vld [vmem:[#allocation2 + $0x12a0] ss:$8 sps:$4 sm:$0xff]   ;;  %v9874_v16 = vld [vmem:[#allocation2 + $0x1384] ss:$8 sps:$4 sm:$0xff]   ;;  %v9884_v22 = vld [vmem:[#allocation2 + $0x1574] ss:$8 sps:$4 sm:$0xff]  }
 0x262   :  { %7234 = vmatpush1.bf16.msra.mxu1 %v9788_v11  ;;  %v6901_v0 = vpop.f32.mrf.mxu0  ;;  %7194 = vmatprep.subr.bf16.mxu0 %v9793_v55  ;;  %v9860_v11 = vld [vmem:[#allocation2 + $0x13a0] ss:$8 sps:$4 sm:$0xff]  }
 0x263   :  { %v6942_v19 = vpop.f32.mrf.mxu1  ;;  %7235 = vmatprep.subr.bf16.mxu1 %v9796_v17  ;;  %v9869_v58 = vld [vmem:[#allocation2 + $0x1280] ss:$8 sps:$4 sm:$0xff]   ;;  %v9881_v17 = vld [vmem:[#allocation2 + $0x1474] ss:$8 sps:$4 sm:$0xff]   ;;  %v9879_v0 = vld [vmem:[#allocation2 + $0x1470] ss:$8 sps:$4 sm:$0xff]  }
 0x264   :  { %v9872_v55 = vld [vmem:[#allocation2 + $0x1380] ss:$8 sps:$4 sm:$0xff]   ;;  %v9882_v19 = vld [vmem:[#allocation2 + $0x1570] ss:$8 sps:$4 sm:$0xff]  }
 0x265   :  { %7195 = vmatpush1.bf16.msra.mxu0 %v9791_v23  ;;  %v7821_v23 = vcombine.low %v10734_v44, %v10734_v44  ;;  %v10758_v26 = vld [vmem:[%s10904_s0 + $0xa0] sm:$0xff]  ;;  %v10763_v27 = vld [vmem:[%s10904_s0 + $0xa8] sm:$0xff] }
 0x266   :  { %7236 = vmatpush1.bf16.msra.mxu1 %v9794_v25  ;;  %7196 = vmatprep.subr.bf16.mxu0 %v9799_v29  ;;  %v7823_v25 = vcombine.low %v10739_v8, %v10739_v8  ;;  %v9887_v44 = vld [vmem:[#allocation2 + $0x1464] ss:$8 sps:$4 sm:$0xff]   ;;  %v7826_v8 = vcombine.high %v10758_v26, %v10758_v26 }
 0x267   :  { %7237 = vmatprep.subr.bf16.mxu1 %v9802_v30  ;;  %v9890_v29 = vld [vmem:[#allocation2 + $0x1564] ss:$8 sps:$4 sm:$0xff]   ;;  %v7828_v30 = vcombine.high %v10763_v27, %v10763_v27 }
 0x269   :  { %7197 = vmatpush1.bf16.msra.mxu0 %v9797_v31 }
 0x26a   :  { %7238 = vmatpush1.bf16.msra.mxu1 %v9800_v7  ;;  %7198 = vmatprep.subr.bf16.mxu0 %v9805_v36 }
 0x26b   :  { %7239 = vmatprep.subr.bf16.mxu1 %v9808_v37  ;;  %v9885_v37 = vld [vmem:[#allocation2 + $0x1460] ss:$8 sps:$4 sm:$0xff]  }
 0x26d   :  { %7199 = vmatpush1.bf16.msra.mxu0 %v9803_v50  ;;  %v9888_v50 = vld [vmem:[#allocation2 + $0x1560] ss:$8 sps:$4 sm:$0xff]  }
 0x26e   :  { %7240 = vmatpush1.bf16.msra.mxu1 %v9806_v38  ;;  %7200 = vmatprep.subr.bf16.mxu0 %v9811_v13 }
 0x26f   :  { %7241 = vmatprep.subr.bf16.mxu1 %v9814_v12  ;;  %v9893_v12 = vld [vmem:[#allocation2 + $0x1454] ss:$8 sps:$4 sm:$0xff]  }
 0x271   :  { %7201 = vmatpush1.bf16.msra.mxu0 %v9809_v21  ;;  %v9896_v21 = vld [vmem:[#allocation2 + $0x1554] ss:$8 sps:$4 sm:$0xff]  }
 0x272   :  { %7242 = vmatpush1.bf16.msra.mxu1 %v9812_v39  ;;  %7202 = vmatprep.subr.bf16.mxu0 %v9817_v24 }
 0x273   :  { %7243 = vmatprep.subr.bf16.mxu1 %v9820_v40 }
 0x275   :  { %7203 = vmatpush1.bf16.msra.mxu0 %v9815_v41 }
 0x276   :  { %7244 = vmatpush1.bf16.msra.mxu1 %v9818_v42  ;;  %7204 = vmatprep.subr.bf16.mxu0 %v9823_v43  ;;  %v9894_v43 = vld [vmem:[#allocation2 + $0x1550] ss:$8 sps:$4 sm:$0xff]  }
 0x277   :  { %7245 = vmatprep.subr.bf16.mxu1 %v9826_v45 }
 0x279   :  { %7205 = vmatpush1.bf16.msra.mxu0 %v9821_v46 }
 0x27a   :  { %7246 = vmatpush1.bf16.msra.mxu1 %v9824_v47  ;;  %7206 = vmatprep.subr.bf16.mxu0 %v9829_v48  ;;  %v9899_v47 = vld [vmem:[#allocation2 + $0x1444] ss:$8 sps:$4 sm:$0xff]  }
 0x27b   :  { %7247 = vmatprep.subr.bf16.mxu1 %v9832_v49  ;;  %v9902_v48 = vld [vmem:[#allocation2 + $0x1544] ss:$8 sps:$4 sm:$0xff]   ;;  %v9897_v49 = vld [vmem:[#allocation2 + $0x1440] ss:$8 sps:$4 sm:$0xff]  }
 0x27d   :  { %7207 = vmatpush2.bf16.msra.mxu0 %v9827_v53  ;;  %v9905_v53 = vld [vmem:[#allocation2 + $0x1434] ss:$8 sps:$4 sm:$0xff]  }
 0x27e   :  { %7248 = vmatpush2.bf16.msra.mxu1 %v9830_v54  ;;  %7208 = vmatprep.subr.bf16.mxu0 %v9835_v6  ;;  %v9908_v54 = vld [vmem:[#allocation2 + $0x1534] ss:$8 sps:$4 sm:$0xff]   ;;  %v9903_v6 = vld [vmem:[#allocation2 + $0x1430] ss:$8 sps:$4 sm:$0xff]  }
 0x27f   :  { %7249 = vmatprep.subr.bf16.mxu1 %v9838_v56  ;;  %v9906_v56 = vld [vmem:[#allocation2 + $0x1530] ss:$8 sps:$4 sm:$0xff]  }
 0x281   :  { %7209 = vmatpush2.bf16.msra.mxu0 %v9833_v33  ;;  %v9911_v33 = vld [vmem:[#allocation2 + $0x1424] ss:$8 sps:$4 sm:$0xff]  }
 0x282   :  { %7250 = vmatpush2.bf16.msra.mxu1 %v9836_v32  ;;  %7210 = vmatprep.subr.bf16.mxu0 %v9841_v59  ;;  %v9914_v32 = vld [vmem:[#allocation2 + $0x1524] ss:$8 sps:$4 sm:$0xff]   ;;  %v9909_v59 = vld [vmem:[#allocation2 + $0x1420] ss:$8 sps:$4 sm:$0xff]  }
 0x283   :  { %7251 = vmatprep.subr.bf16.mxu1 %v9844_v60  ;;  %v9912_v60 = vld [vmem:[#allocation2 + $0x1520] ss:$8 sps:$4 sm:$0xff]  }
 0x285   :  { %7211 = vmatpush2.bf16.msra.mxu0 %v9839_v34  ;;  %v9917_v34 = vld [vmem:[#allocation2 + $0x1414] ss:$8 sps:$4 sm:$0xff]  }
 0x286   :  { %7252 = vmatpush2.bf16.msra.mxu1 %v9842_v61  ;;  %7212 = vmatprep.subr.bf16.mxu0 %v9847_v35  ;;  %v9920_v61 = vld [vmem:[#allocation2 + $0x1514] ss:$8 sps:$4 sm:$0xff]   ;;  %v9915_v35 = vld [vmem:[#allocation2 + $0x1410] ss:$8 sps:$4 sm:$0xff]  }
 0x287   :  { %7253 = vmatprep.subr.bf16.mxu1 %v9850_v62  ;;  %v9918_v62 = vld [vmem:[#allocation2 + $0x1510] ss:$8 sps:$4 sm:$0xff]  }
 0x289   :  { %7213 = vmatpush2.bf16.msra.mxu0 %v9845_v63  ;;  %v9923_v63 = vld [vmem:[#allocation2 + $0x1404] ss:$8 sps:$4 sm:$0xff]  }
 0x28a   :  { %7254 = vmatpush2.bf16.msra.mxu1 %v9848_v1  ;;  %7214 = vmatprep.subr.bf16.mxu0 %v9853_v2  ;;  %v9926_v1 = vld [vmem:[#allocation2 + $0x1504] ss:$8 sps:$4 sm:$0xff]   ;;  %v9921_v2 = vld [vmem:[#allocation2 + $0x1400] ss:$8 sps:$4 sm:$0xff]  }
 0x28b   :  { %7255 = vmatprep.subr.bf16.mxu1 %v9856_v3  ;;  %v9924_v3 = vld [vmem:[#allocation2 + $0x1500] ss:$8 sps:$4 sm:$0xff]  }
 0x28d   :  { %7215 = vmatpush2.bf16.msra.mxu0 %v9851_v4  ;;  %v9929_v4 = vld [vmem:[#allocation2 + $0x14f4] ss:$8 sps:$4 sm:$0xff]  }
 0x28e   :  { %7256 = vmatpush2.bf16.msra.mxu1 %v9854_v5  ;;  %7216 = vmatprep.subr.bf16.mxu0 %v9859_v9  ;;  %v9932_v5 = vld [vmem:[#allocation2 + $0x15f4] ss:$8 sps:$4 sm:$0xff]   ;;  %v9927_v9 = vld [vmem:[#allocation2 + $0x14f0] ss:$8 sps:$4 sm:$0xff]  }
 0x28f   :  { %7257 = vmatprep.subr.bf16.mxu1 %v9862_v10  ;;  %v9930_v10 = vld [vmem:[#allocation2 + $0x15f0] ss:$8 sps:$4 sm:$0xff]  }
 0x291   :  { %7217 = vmatpush2.bf16.msra.mxu0 %v9857_v28  ;;  %v9935_v28 = vld [vmem:[#allocation2 + $0x14e4] ss:$8 sps:$4 sm:$0xff]  }
 0x292   :  { %7258 = vmatpush2.bf16.msra.mxu1 %v9860_v11  ;;  %7218 = vmatprep.subr.bf16.mxu0 %v9865_v52  ;;  %v9938_v11 = vld [vmem:[#allocation2 + $0x15e4] ss:$8 sps:$4 sm:$0xff]   ;;  %v9933_v52 = vld [vmem:[#allocation2 + $0x14e0] ss:$8 sps:$4 sm:$0xff]  }
 0x293   :  { %7259 = vmatprep.subr.bf16.mxu1 %v9868_v51  ;;  %v9936_v51 = vld [vmem:[#allocation2 + $0x15e0] ss:$8 sps:$4 sm:$0xff]  }
 0x295   :  { %7219 = vmatpush2.bf16.msra.mxu0 %v9863_v14  ;;  %v9941_v14 = vld [vmem:[#allocation2 + $0x14d4] ss:$8 sps:$4 sm:$0xff]  }
 0x296   :  { %7260 = vmatpush2.bf16.msra.mxu1 %v9866_v15  ;;  %7220 = vmatprep.subr.bf16.mxu0 %v9871_v57  ;;  %v9944_v15 = vld [vmem:[#allocation2 + $0x15d4] ss:$8 sps:$4 sm:$0xff]   ;;  %v9939_v57 = vld [vmem:[#allocation2 + $0x14d0] ss:$8 sps:$4 sm:$0xff]  }
 0x297   :  { %7261 = vmatprep.subr.bf16.mxu1 %v9874_v16  ;;  %v9942_v16 = vld [vmem:[#allocation2 + $0x15d0] ss:$8 sps:$4 sm:$0xff]  }
 0x299   :  { %7221 = vmatpush2.bf16.msra.mxu0 %v9869_v58  ;;  %v9947_v58 = vld [vmem:[#allocation2 + $0x14c4] ss:$8 sps:$4 sm:$0xff]  }
 0x29a   :  { %7262 = vmatpush2.bf16.msra.mxu1 %v9872_v55  ;;  %7272 = vmatprep.subr.bf16.mxu0 %v9881_v17  ;;  %v9950_v55 = vld [vmem:[#allocation2 + $0x15c4] ss:$8 sps:$4 sm:$0xff]   ;;  %v9945_v17 = vld [vmem:[#allocation2 + $0x14c0] ss:$8 sps:$4 sm:$0xff]  }
 0x29b   :  { %7313 = vmatprep.subr.bf16.mxu1 %v9884_v22  ;;  %v9948_v22 = vld [vmem:[#allocation2 + $0x15c0] ss:$8 sps:$4 sm:$0xff]  }
 0x29c   :  { %v6978_v31 = vpop.f32.mrf.mxu0  ;;  %7223 = vmatmul.mubr.bf16.vlgmr.msra.gmra.mxu0 %v7821_v23  ;;  %v9953_v23 = vld [vmem:[#allocation2 + $0x14b4] ss:$8 sps:$4 sm:$0xff]  }
 0x29d   :  { %v7019_v7 = vpop.f32.mrf.mxu1  ;;  %7264 = vmatmul.mubr.bf16.vlgmr.msra.gmra.mxu1 %v7823_v25  ;;  %v6979_v36 = vadd.f32 %v6978_v31, %v10746_v20  ;;  %7273 = vmatpush1.bf16.msra.mxu0 %v9879_v0  ;;  %v9891_v20 = vld [vmem:[#allocation2 + $0x1450] ss:$8 sps:$4 sm:$0xff]   ;;  %v9956_v25 = vld [vmem:[#allocation2 + $0x15b4] ss:$8 sps:$4 sm:$0xff]  }
 0x29e   :  { %7314 = vmatpush1.bf16.msra.mxu1 %v9882_v19  ;;  %v6980_v38 = vpop.f32.mrf.mxu0  ;;  %7274 = vmatprep.subr.bf16.mxu0 %v9887_v44  ;;  %v9951_v0 = vld [vmem:[#allocation2 + $0x14b0] ss:$8 sps:$4 sm:$0xff]   ;;  %v9959_v44 = vld [vmem:[#allocation2 + $0x14a4] ss:$8 sps:$4 sm:$0xff]   ;;  %v9965_v31 = vld [vmem:[#allocation2 + $0x1494] ss:$8 sps:$4 sm:$0xff]  }
 0x29f   :  { %v7021_v13 = vpop.f32.mrf.mxu1  ;;  %7315 = vmatprep.subr.bf16.mxu1 %v9890_v29  ;;  %v10770_v39 = vadd.f32 %v7019_v7, %v6979_v36  ;;  %v6981_v24 = vadd.f32 %v6980_v38, %v10749_v18  ;;  %7304 = vmatprep.mubr.bf16.mxu0 %v7826_v8  ;;  %v9900_v18 = vld [vmem:[#allocation2 + $0x1540] ss:$8 sps:$4 sm:$0xff]   ;;  %v9954_v19 = vld [vmem:[#allocation2 + $0x15b0] ss:$8 sps:$4 sm:$0xff]   ;;  %v9962_v29 = vld [vmem:[#allocation2 + $0x15a4] ss:$8 sps:$4 sm:$0xff]  }
 0x2a0   :  { %7345 = vmatprep.mubr.bf16.mxu1 %v7828_v30  ;;  %v6982_v40 = vpop.f32.mrf.mxu0  ;;  %v9957_v8 = vld [vmem:[#allocation2 + $0x14a0] ss:$8 sps:$4 sm:$0xff]   ;;  %v9968_v7 = vld [vmem:[#allocation2 + $0x1594] ss:$8 sps:$4 sm:$0xff]   ;;  %v9963_v36 = vld [vmem:[#allocation2 + $0x1490] ss:$8 sps:$4 sm:$0xff]  }
 0x2a1   :  { %v7023_v41 = vpop.f32.mrf.mxu1  ;;  %v10773_v42 = vadd.f32 %v7021_v13, %v6981_v24  ;;  %7275 = vmatpush1.bf16.msra.mxu0 %v9885_v37  ;;  %v9960_v30 = vld [vmem:[#allocation2 + $0x15a0] ss:$8 sps:$4 sm:$0xff]   ;;  %v9966_v37 = vld [vmem:[#allocation2 + $0x1590] ss:$8 sps:$4 sm:$0xff]   ;;  %v9974_v38 = vld [vmem:[#allocation2 + $0x1584] ss:$8 sps:$4 sm:$0xff]   ;;  %v7825_v40 = vcombine.low %v10758_v26, %v10758_v26 }
 0x2a2   :  { %7316 = vmatpush1.bf16.msra.mxu1 %v9888_v50  ;;  %v6983_v45 = vpop.f32.mrf.mxu0  ;;  %7276 = vmatprep.subr.bf16.mxu0 %v9893_v12  ;;  %v9971_v50 = vld [vmem:[#allocation2 + $0x1484] ss:$8 sps:$4 sm:$0xff]   ;;  %v9969_v13 = vld [vmem:[#allocation2 + $0x1480] ss:$8 sps:$4 sm:$0xff]   ;;  %v9984_v24 = vld [vmem:[#allocation2 + $0x1774] ss:$8 sps:$4 sm:$0xff]   ;;  %v7827_v41 = vcombine.low %v10763_v27, %v10763_v27 }
 0x2a3   :  { %v7024_v46 = vpop.f32.mrf.mxu1  ;;  %7317 = vmatprep.subr.bf16.mxu1 %v9896_v21  ;;  %v9972_v12 = vld [vmem:[#allocation2 + $0x1580] ss:$8 sps:$4 sm:$0xff]   ;;  %v9981_v21 = vld [vmem:[#allocation2 + $0x1674] ss:$8 sps:$4 sm:$0xff]   ;;  %v9979_v45 = vld [vmem:[#allocation2 + $0x1670] ss:$8 sps:$4 sm:$0xff]  }
 0x2a4   :  { %v9982_v46 = vld [vmem:[#allocation2 + $0x1770] ss:$8 sps:$4 sm:$0xff]   ;;  %v9987_v26 = vld [vmem:[#allocation2 + $0x1664] ss:$8 sps:$4 sm:$0xff]  }
 0x2a5   :  { %7277 = vmatpush1.bf16.msra.mxu0 %v9891_v20  ;;  %v10782_v20 = vld [vmem:[%s10904_s0 + $0xb0] sm:$0xff] }
 0x2a6   :  { %7318 = vmatpush1.bf16.msra.mxu1 %v9894_v43  ;;  %7278 = vmatprep.subr.bf16.mxu0 %v9899_v47  ;;  %v10787_v43 = vld [vmem:[%s10904_s0 + $0xb8] sm:$0xff]  ;;  %v9990_v47 = vld [vmem:[#allocation2 + $0x1764] ss:$8 sps:$4 sm:$0xff]   ;;  %v7830_v27 = vcombine.high %v10782_v20, %v10782_v20 }
 0x2a7   :  { %7319 = vmatprep.subr.bf16.mxu1 %v9902_v48  ;;  %v7832_v48 = vcombine.high %v10787_v43, %v10787_v43 }
 0x2a9   :  { %7279 = vmatpush1.bf16.msra.mxu0 %v9897_v49 }
 0x2aa   :  { %7320 = vmatpush1.bf16.msra.mxu1 %v9900_v18  ;;  %7280 = vmatprep.subr.bf16.mxu0 %v9905_v53 }
 0x2ab   :  { %7321 = vmatprep.subr.bf16.mxu1 %v9908_v54  ;;  %v9985_v54 = vld [vmem:[#allocation2 + $0x1660] ss:$8 sps:$4 sm:$0xff]  }
 0x2ad   :  { %7281 = vmatpush1.bf16.msra.mxu0 %v9903_v6  ;;  %v9988_v6 = vld [vmem:[#allocation2 + $0x1760] ss:$8 sps:$4 sm:$0xff]  }
 0x2ae   :  { %7322 = vmatpush1.bf16.msra.mxu1 %v9906_v56  ;;  %7282 = vmatprep.subr.bf16.mxu0 %v9911_v33 }
 0x2af   :  { %7323 = vmatprep.subr.bf16.mxu1 %v9914_v32  ;;  %v9993_v32 = vld [vmem:[#allocation2 + $0x1654] ss:$8 sps:$4 sm:$0xff]  }
 0x2b1   :  { %7283 = vmatpush1.bf16.msra.mxu0 %v9909_v59  ;;  %v9996_v59 = vld [vmem:[#allocation2 + $0x1754] ss:$8 sps:$4 sm:$0xff]  }
 0x2b2   :  { %7324 = vmatpush1.bf16.msra.mxu1 %v9912_v60  ;;  %7284 = vmatprep.subr.bf16.mxu0 %v9917_v34 }
 0x2b3   :  { %7325 = vmatprep.subr.bf16.mxu1 %v9920_v61 }
 0x2b5   :  { %7285 = vmatpush1.bf16.msra.mxu0 %v9915_v35 }
 0x2b6   :  { %7326 = vmatpush1.bf16.msra.mxu1 %v9918_v62  ;;  %7286 = vmatprep.subr.bf16.mxu0 %v9923_v63  ;;  %v9994_v63 = vld [vmem:[#allocation2 + $0x1750] ss:$8 sps:$4 sm:$0xff]  }
 0x2b7   :  { %7327 = vmatprep.subr.bf16.mxu1 %v9926_v1 }
 0x2b9   :  { %7287 = vmatpush1.bf16.msra.mxu0 %v9921_v2 }
 0x2ba   :  { %7328 = vmatpush1.bf16.msra.mxu1 %v9924_v3  ;;  %7288 = vmatprep.subr.bf16.mxu0 %v9929_v4  ;;  %v9999_v3 = vld [vmem:[#allocation2 + $0x1644] ss:$8 sps:$4 sm:$0xff]  }
 0x2bb   :  { %7329 = vmatprep.subr.bf16.mxu1 %v9932_v5  ;;  %v10002_v4 = vld [vmem:[#allocation2 + $0x1744] ss:$8 sps:$4 sm:$0xff]   ;;  %v9997_v5 = vld [vmem:[#allocation2 + $0x1640] ss:$8 sps:$4 sm:$0xff]  }
 0x2bd   :  { %7289 = vmatpush2.bf16.msra.mxu0 %v9927_v9  ;;  %v10005_v9 = vld [vmem:[#allocation2 + $0x1634] ss:$8 sps:$4 sm:$0xff]  }
 0x2be   :  { %7330 = vmatpush2.bf16.msra.mxu1 %v9930_v10  ;;  %7290 = vmatprep.subr.bf16.mxu0 %v9935_v28  ;;  %v10008_v10 = vld [vmem:[#allocation2 + $0x1734] ss:$8 sps:$4 sm:$0xff]   ;;  %v10003_v28 = vld [vmem:[#allocation2 + $0x1630] ss:$8 sps:$4 sm:$0xff]  }
 0x2bf   :  { %7331 = vmatprep.subr.bf16.mxu1 %v9938_v11  ;;  %v10006_v11 = vld [vmem:[#allocation2 + $0x1730] ss:$8 sps:$4 sm:$0xff]  }
 0x2c1   :  { %7291 = vmatpush2.bf16.msra.mxu0 %v9933_v52  ;;  %v10011_v52 = vld [vmem:[#allocation2 + $0x1624] ss:$8 sps:$4 sm:$0xff]  }
 0x2c2   :  { %7332 = vmatpush2.bf16.msra.mxu1 %v9936_v51  ;;  %7292 = vmatprep.subr.bf16.mxu0 %v9941_v14  ;;  %v10014_v51 = vld [vmem:[#allocation2 + $0x1724] ss:$8 sps:$4 sm:$0xff]   ;;  %v10009_v14 = vld [vmem:[#allocation2 + $0x1620] ss:$8 sps:$4 sm:$0xff]  }
 0x2c3   :  { %7333 = vmatprep.subr.bf16.mxu1 %v9944_v15  ;;  %v10012_v15 = vld [vmem:[#allocation2 + $0x1720] ss:$8 sps:$4 sm:$0xff]  }
 0x2c5   :  { %7293 = vmatpush2.bf16.msra.mxu0 %v9939_v57  ;;  %v10017_v57 = vld [vmem:[#allocation2 + $0x1614] ss:$8 sps:$4 sm:$0xff]  }
 0x2c6   :  { %7334 = vmatpush2.bf16.msra.mxu1 %v9942_v16  ;;  %7294 = vmatprep.subr.bf16.mxu0 %v9947_v58  ;;  %v10020_v16 = vld [vmem:[#allocation2 + $0x1714] ss:$8 sps:$4 sm:$0xff]   ;;  %v10015_v58 = vld [vmem:[#allocation2 + $0x1610] ss:$8 sps:$4 sm:$0xff]  }
 0x2c7   :  { %7335 = vmatprep.subr.bf16.mxu1 %v9950_v55  ;;  %v10018_v55 = vld [vmem:[#allocation2 + $0x1710] ss:$8 sps:$4 sm:$0xff]  }
 0x2c9   :  { %7295 = vmatpush2.bf16.msra.mxu0 %v9945_v17  ;;  %v10023_v17 = vld [vmem:[#allocation2 + $0x1604] ss:$8 sps:$4 sm:$0xff]  }
 0x2ca   :  { %7336 = vmatpush2.bf16.msra.mxu1 %v9948_v22  ;;  %7296 = vmatprep.subr.bf16.mxu0 %v9953_v23  ;;  %v10026_v22 = vld [vmem:[#allocation2 + $0x1704] ss:$8 sps:$4 sm:$0xff]   ;;  %v10021_v23 = vld [vmem:[#allocation2 + $0x1600] ss:$8 sps:$4 sm:$0xff]  }
 0x2cb   :  { %7337 = vmatprep.subr.bf16.mxu1 %v9956_v25  ;;  %v10024_v25 = vld [vmem:[#allocation2 + $0x1700] ss:$8 sps:$4 sm:$0xff]  }
 0x2cd   :  { %7297 = vmatpush2.bf16.msra.mxu0 %v9951_v0  ;;  %v10029_v0 = vld [vmem:[#allocation2 + $0x16f4] ss:$8 sps:$4 sm:$0xff]  }
 0x2ce   :  { %7338 = vmatpush2.bf16.msra.mxu1 %v9954_v19  ;;  %7298 = vmatprep.subr.bf16.mxu0 %v9959_v44  ;;  %v10032_v19 = vld [vmem:[#allocation2 + $0x17f4] ss:$8 sps:$4 sm:$0xff]   ;;  %v10027_v44 = vld [vmem:[#allocation2 + $0x16f0] ss:$8 sps:$4 sm:$0xff]  }
 0x2cf   :  { %7339 = vmatprep.subr.bf16.mxu1 %v9962_v29  ;;  %v10030_v29 = vld [vmem:[#allocation2 + $0x17f0] ss:$8 sps:$4 sm:$0xff]  }
 0x2d1   :  { %7299 = vmatpush2.bf16.msra.mxu0 %v9957_v8  ;;  %v10035_v8 = vld [vmem:[#allocation2 + $0x16e4] ss:$8 sps:$4 sm:$0xff]  }
 0x2d2   :  { %7340 = vmatpush2.bf16.msra.mxu1 %v9960_v30  ;;  %7300 = vmatprep.subr.bf16.mxu0 %v9965_v31  ;;  %v10038_v30 = vld [vmem:[#allocation2 + $0x17e4] ss:$8 sps:$4 sm:$0xff]   ;;  %v10033_v31 = vld [vmem:[#allocation2 + $0x16e0] ss:$8 sps:$4 sm:$0xff]  }
 0x2d3   :  { %7341 = vmatprep.subr.bf16.mxu1 %v9968_v7  ;;  %v10036_v7 = vld [vmem:[#allocation2 + $0x17e0] ss:$8 sps:$4 sm:$0xff]  }
 0x2d5   :  { %7301 = vmatpush2.bf16.msra.mxu0 %v9963_v36  ;;  %v10041_v36 = vld [vmem:[#allocation2 + $0x16d4] ss:$8 sps:$4 sm:$0xff]  }
 0x2d6   :  { %7342 = vmatpush2.bf16.msra.mxu1 %v9966_v37  ;;  %7302 = vmatprep.subr.bf16.mxu0 %v9971_v50  ;;  %v10044_v37 = vld [vmem:[#allocation2 + $0x17d4] ss:$8 sps:$4 sm:$0xff]   ;;  %v10039_v50 = vld [vmem:[#allocation2 + $0x16d0] ss:$8 sps:$4 sm:$0xff]  }
 0x2d7   :  { %7343 = vmatprep.subr.bf16.mxu1 %v9974_v38  ;;  %v10042_v38 = vld [vmem:[#allocation2 + $0x17d0] ss:$8 sps:$4 sm:$0xff]  }
 0x2d9   :  { %7303 = vmatpush2.bf16.msra.mxu0 %v9969_v13  ;;  %v10047_v13 = vld [vmem:[#allocation2 + $0x16c4] ss:$8 sps:$4 sm:$0xff]  }
 0x2da   :  { %7344 = vmatpush2.bf16.msra.mxu1 %v9972_v12  ;;  %7354 = vmatprep.subr.bf16.mxu0 %v9981_v21  ;;  %v10050_v12 = vld [vmem:[#allocation2 + $0x17c4] ss:$8 sps:$4 sm:$0xff]   ;;  %v10045_v21 = vld [vmem:[#allocation2 + $0x16c0] ss:$8 sps:$4 sm:$0xff]  }
 0x2db   :  { %7395 = vmatprep.subr.bf16.mxu1 %v9984_v24  ;;  %v10048_v24 = vld [vmem:[#allocation2 + $0x17c0] ss:$8 sps:$4 sm:$0xff]  }
 0x2dc   :  { %v7060_v49 = vpop.f32.mrf.mxu0  ;;  %7305 = vmatmul.mubr.bf16.vlgmr.msra.gmra.mxu0 %v7825_v40  ;;  %v10053_v40 = vld [vmem:[#allocation2 + $0x16b4] ss:$8 sps:$4 sm:$0xff]  }
 0x2dd   :  { %v7101_v18 = vpop.f32.mrf.mxu1  ;;  %7346 = vmatmul.mubr.bf16.vlgmr.msra.gmra.mxu1 %v7827_v41  ;;  %v7061_v53 = vadd.f32 %v7060_v49, %v10770_v39  ;;  %7355 = vmatpush1.bf16.msra.mxu0 %v9979_v45  ;;  %v9991_v39 = vld [vmem:[#allocation2 + $0x1650] ss:$8 sps:$4 sm:$0xff]   ;;  %v10056_v41 = vld [vmem:[#allocation2 + $0x17b4] ss:$8 sps:$4 sm:$0xff]  }
 0x2de   :  { %7396 = vmatpush1.bf16.msra.mxu1 %v9982_v46  ;;  %v7062_v56 = vpop.f32.mrf.mxu0  ;;  %7356 = vmatprep.subr.bf16.mxu0 %v9987_v26  ;;  %v10051_v45 = vld [vmem:[#allocation2 + $0x16b0] ss:$8 sps:$4 sm:$0xff]   ;;  %v10059_v26 = vld [vmem:[#allocation2 + $0x16a4] ss:$8 sps:$4 sm:$0xff]   ;;  %v10065_v49 = vld [vmem:[#allocation2 + $0x1694] ss:$8 sps:$4 sm:$0xff]  }
 0x2df   :  { %v7103_v33 = vpop.f32.mrf.mxu1  ;;  %7397 = vmatprep.subr.bf16.mxu1 %v9990_v47  ;;  %v10794_v60 = vadd.f32 %v7101_v18, %v7061_v53  ;;  %v7063_v34 = vadd.f32 %v7062_v56, %v10773_v42  ;;  %7386 = vmatprep.mubr.bf16.mxu0 %v7830_v27  ;;  %v10000_v42 = vld [vmem:[#allocation2 + $0x1740] ss:$8 sps:$4 sm:$0xff]   ;;  %v10054_v46 = vld [vmem:[#allocation2 + $0x17b0] ss:$8 sps:$4 sm:$0xff]   ;;  %v10062_v47 = vld [vmem:[#allocation2 + $0x17a4] ss:$8 sps:$4 sm:$0xff]  }
 0x2e0   :  { %7427 = vmatprep.mubr.bf16.mxu1 %v7832_v48  ;;  %v7064_v61 = vpop.f32.mrf.mxu0  ;;  %v10057_v27 = vld [vmem:[#allocation2 + $0x16a0] ss:$8 sps:$4 sm:$0xff]   ;;  %v10068_v18 = vld [vmem:[#allocation2 + $0x1794] ss:$8 sps:$4 sm:$0xff]   ;;  %v10063_v53 = vld [vmem:[#allocation2 + $0x1690] ss:$8 sps:$4 sm:$0xff]  }
 0x2e1   :  { %v7105_v35 = vpop.f32.mrf.mxu1  ;;  %v10797_v62 = vadd.f32 %v7103_v33, %v7063_v34  ;;  %7357 = vmatpush1.bf16.msra.mxu0 %v9985_v54  ;;  %v10060_v48 = vld [vmem:[#allocation2 + $0x17a0] ss:$8 sps:$4 sm:$0xff]   ;;  %v10066_v54 = vld [vmem:[#allocation2 + $0x1790] ss:$8 sps:$4 sm:$0xff]   ;;  %v10074_v56 = vld [vmem:[#allocation2 + $0x1784] ss:$8 sps:$4 sm:$0xff]   ;;  %v7829_v61 = vcombine.low %v10782_v20, %v10782_v20 }
 0x2e2   :  { %7398 = vmatpush1.bf16.msra.mxu1 %v9988_v6  ;;  %v7065_v1 = vpop.f32.mrf.mxu0  ;;  %7358 = vmatprep.subr.bf16.mxu0 %v9993_v32  ;;  %v10071_v6 = vld [vmem:[#allocation2 + $0x1684] ss:$8 sps:$4 sm:$0xff]   ;;  %v10069_v33 = vld [vmem:[#allocation2 + $0x1680] ss:$8 sps:$4 sm:$0xff]   ;;  %v10084_v34 = vld [vmem:[#allocation2 + $0x1974] ss:$8 sps:$4 sm:$0xff]   ;;  %v7831_v35 = vcombine.low %v10787_v43, %v10787_v43 }
 0x2e3   :  { %v7106_v2 = vpop.f32.mrf.mxu1  ;;  %7399 = vmatprep.subr.bf16.mxu1 %v9996_v59  ;;  %v10072_v32 = vld [vmem:[#allocation2 + $0x1780] ss:$8 sps:$4 sm:$0xff]   ;;  %v10081_v59 = vld [vmem:[#allocation2 + $0x1874] ss:$8 sps:$4 sm:$0xff]   ;;  %v10079_v1 = vld [vmem:[#allocation2 + $0x1870] ss:$8 sps:$4 sm:$0xff]  }
 0x2e4   :  { %v10082_v2 = vld [vmem:[#allocation2 + $0x1970] ss:$8 sps:$4 sm:$0xff]   ;;  %v10087_v20 = vld [vmem:[#allocation2 + $0x1864] ss:$8 sps:$4 sm:$0xff]  }
 0x2e5   :  { %7359 = vmatpush1.bf16.msra.mxu0 %v9991_v39  ;;  %v10806_v39 = vld [vmem:[%s10904_s0 + $0xc0] sm:$0xff] }
 0x2e6   :  { %7400 = vmatpush1.bf16.msra.mxu1 %v9994_v63  ;;  %7360 = vmatprep.subr.bf16.mxu0 %v9999_v3  ;;  %v10811_v63 = vld [vmem:[%s10904_s0 + $0xc8] sm:$0xff]  ;;  %v7834_v43 = vcombine.high %v10806_v39, %v10806_v39 }
 0x2e7   :  { %7401 = vmatprep.subr.bf16.mxu1 %v10002_v4  ;;  %v10090_v3 = vld [vmem:[#allocation2 + $0x1964] ss:$8 sps:$4 sm:$0xff]   ;;  %v7836_v4 = vcombine.high %v10811_v63, %v10811_v63 }
 0x2e9   :  { %7361 = vmatpush1.bf16.msra.mxu0 %v9997_v5 }
 0x2ea   :  { %7402 = vmatpush1.bf16.msra.mxu1 %v10000_v42  ;;  %7362 = vmatprep.subr.bf16.mxu0 %v10005_v9 }
 0x2eb   :  { %7403 = vmatprep.subr.bf16.mxu1 %v10008_v10  ;;  %v10085_v10 = vld [vmem:[#allocation2 + $0x1860] ss:$8 sps:$4 sm:$0xff]  }
 0x2ed   :  { %7363 = vmatpush1.bf16.msra.mxu0 %v10003_v28  ;;  %v10088_v28 = vld [vmem:[#allocation2 + $0x1960] ss:$8 sps:$4 sm:$0xff]  }
 0x2ee   :  { %7404 = vmatpush1.bf16.msra.mxu1 %v10006_v11  ;;  %7364 = vmatprep.subr.bf16.mxu0 %v10011_v52 }
 0x2ef   :  { %7405 = vmatprep.subr.bf16.mxu1 %v10014_v51  ;;  %v10093_v51 = vld [vmem:[#allocation2 + $0x1854] ss:$8 sps:$4 sm:$0xff]  }
 0x2f1   :  { %7365 = vmatpush1.bf16.msra.mxu0 %v10009_v14  ;;  %v10096_v14 = vld [vmem:[#allocation2 + $0x1954] ss:$8 sps:$4 sm:$0xff]  }
 0x2f2   :  { %7406 = vmatpush1.bf16.msra.mxu1 %v10012_v15  ;;  %7366 = vmatprep.subr.bf16.mxu0 %v10017_v57 }
 0x2f3   :  { %7407 = vmatprep.subr.bf16.mxu1 %v10020_v16 }
 0x2f5   :  { %7367 = vmatpush1.bf16.msra.mxu0 %v10015_v58 }
 0x2f6   :  { %7408 = vmatpush1.bf16.msra.mxu1 %v10018_v55  ;;  %7368 = vmatprep.subr.bf16.mxu0 %v10023_v17  ;;  %v10094_v17 = vld [vmem:[#allocation2 + $0x1950] ss:$8 sps:$4 sm:$0xff]  }
 0x2f7   :  { %7409 = vmatprep.subr.bf16.mxu1 %v10026_v22 }
 0x2f9   :  { %7369 = vmatpush1.bf16.msra.mxu0 %v10021_v23 }
 0x2fa   :  { %7410 = vmatpush1.bf16.msra.mxu1 %v10024_v25  ;;  %7370 = vmatprep.subr.bf16.mxu0 %v10029_v0  ;;  %v10099_v25 = vld [vmem:[#allocation2 + $0x1844] ss:$8 sps:$4 sm:$0xff]  }
 0x2fb   :  { %7411 = vmatprep.subr.bf16.mxu1 %v10032_v19  ;;  %v10102_v0 = vld [vmem:[#allocation2 + $0x1944] ss:$8 sps:$4 sm:$0xff]   ;;  %v10097_v19 = vld [vmem:[#allocation2 + $0x1840] ss:$8 sps:$4 sm:$0xff]  }
 0x2fd   :  { %7371 = vmatpush2.bf16.msra.mxu0 %v10027_v44  ;;  %v10105_v44 = vld [vmem:[#allocation2 + $0x1834] ss:$8 sps:$4 sm:$0xff]  }
 0x2fe   :  { %7412 = vmatpush2.bf16.msra.mxu1 %v10030_v29  ;;  %7372 = vmatprep.subr.bf16.mxu0 %v10035_v8  ;;  %v10108_v29 = vld [vmem:[#allocation2 + $0x1934] ss:$8 sps:$4 sm:$0xff]   ;;  %v10103_v8 = vld [vmem:[#allocation2 + $0x1830] ss:$8 sps:$4 sm:$0xff]  }
 0x2ff   :  { %7413 = vmatprep.subr.bf16.mxu1 %v10038_v30  ;;  %v10106_v30 = vld [vmem:[#allocation2 + $0x1930] ss:$8 sps:$4 sm:$0xff]  }
 0x301   :  { %7373 = vmatpush2.bf16.msra.mxu0 %v10033_v31  ;;  %v10111_v31 = vld [vmem:[#allocation2 + $0x1824] ss:$8 sps:$4 sm:$0xff]  }
 0x302   :  { %7414 = vmatpush2.bf16.msra.mxu1 %v10036_v7  ;;  %7374 = vmatprep.subr.bf16.mxu0 %v10041_v36  ;;  %v10114_v7 = vld [vmem:[#allocation2 + $0x1924] ss:$8 sps:$4 sm:$0xff]   ;;  %v10109_v36 = vld [vmem:[#allocation2 + $0x1820] ss:$8 sps:$4 sm:$0xff]  }
 0x303   :  { %7415 = vmatprep.subr.bf16.mxu1 %v10044_v37  ;;  %v10112_v37 = vld [vmem:[#allocation2 + $0x1920] ss:$8 sps:$4 sm:$0xff]  }
 0x305   :  { %7375 = vmatpush2.bf16.msra.mxu0 %v10039_v50  ;;  %v10117_v50 = vld [vmem:[#allocation2 + $0x1814] ss:$8 sps:$4 sm:$0xff]  }
 0x306   :  { %7416 = vmatpush2.bf16.msra.mxu1 %v10042_v38  ;;  %7376 = vmatprep.subr.bf16.mxu0 %v10047_v13  ;;  %v10120_v38 = vld [vmem:[#allocation2 + $0x1914] ss:$8 sps:$4 sm:$0xff]   ;;  %v10115_v13 = vld [vmem:[#allocation2 + $0x1810] ss:$8 sps:$4 sm:$0xff]  }
 0x307   :  { %7417 = vmatprep.subr.bf16.mxu1 %v10050_v12  ;;  %v10118_v12 = vld [vmem:[#allocation2 + $0x1910] ss:$8 sps:$4 sm:$0xff]  }
 0x309   :  { %7377 = vmatpush2.bf16.msra.mxu0 %v10045_v21  ;;  %v10123_v21 = vld [vmem:[#allocation2 + $0x1804] ss:$8 sps:$4 sm:$0xff]  }
 0x30a   :  { %7418 = vmatpush2.bf16.msra.mxu1 %v10048_v24  ;;  %7378 = vmatprep.subr.bf16.mxu0 %v10053_v40  ;;  %v10126_v24 = vld [vmem:[#allocation2 + $0x1904] ss:$8 sps:$4 sm:$0xff]   ;;  %v10121_v40 = vld [vmem:[#allocation2 + $0x1800] ss:$8 sps:$4 sm:$0xff]  }
 0x30b   :  { %7419 = vmatprep.subr.bf16.mxu1 %v10056_v41  ;;  %v10124_v41 = vld [vmem:[#allocation2 + $0x1900] ss:$8 sps:$4 sm:$0xff]  }
 0x30d   :  { %7379 = vmatpush2.bf16.msra.mxu0 %v10051_v45  ;;  %v10129_v45 = vld [vmem:[#allocation2 + $0x18f4] ss:$8 sps:$4 sm:$0xff]  }
 0x30e   :  { %7420 = vmatpush2.bf16.msra.mxu1 %v10054_v46  ;;  %7380 = vmatprep.subr.bf16.mxu0 %v10059_v26  ;;  %v10132_v46 = vld [vmem:[#allocation2 + $0x19f4] ss:$8 sps:$4 sm:$0xff]   ;;  %v10127_v26 = vld [vmem:[#allocation2 + $0x18f0] ss:$8 sps:$4 sm:$0xff]  }
 0x30f   :  { %7421 = vmatprep.subr.bf16.mxu1 %v10062_v47  ;;  %v10130_v47 = vld [vmem:[#allocation2 + $0x19f0] ss:$8 sps:$4 sm:$0xff]  }
 0x311   :  { %7381 = vmatpush2.bf16.msra.mxu0 %v10057_v27  ;;  %v10135_v27 = vld [vmem:[#allocation2 + $0x18e4] ss:$8 sps:$4 sm:$0xff]  }
 0x312   :  { %7422 = vmatpush2.bf16.msra.mxu1 %v10060_v48  ;;  %7382 = vmatprep.subr.bf16.mxu0 %v10065_v49  ;;  %v10138_v48 = vld [vmem:[#allocation2 + $0x19e4] ss:$8 sps:$4 sm:$0xff]   ;;  %v10133_v49 = vld [vmem:[#allocation2 + $0x18e0] ss:$8 sps:$4 sm:$0xff]  }
 0x313   :  { %7423 = vmatprep.subr.bf16.mxu1 %v10068_v18  ;;  %v10136_v18 = vld [vmem:[#allocation2 + $0x19e0] ss:$8 sps:$4 sm:$0xff]  }
 0x315   :  { %7383 = vmatpush2.bf16.msra.mxu0 %v10063_v53  ;;  %v10141_v53 = vld [vmem:[#allocation2 + $0x18d4] ss:$8 sps:$4 sm:$0xff]  }
 0x316   :  { %7424 = vmatpush2.bf16.msra.mxu1 %v10066_v54  ;;  %7384 = vmatprep.subr.bf16.mxu0 %v10071_v6  ;;  %v10144_v54 = vld [vmem:[#allocation2 + $0x19d4] ss:$8 sps:$4 sm:$0xff]   ;;  %v10139_v6 = vld [vmem:[#allocation2 + $0x18d0] ss:$8 sps:$4 sm:$0xff]  }
 0x317   :  { %7425 = vmatprep.subr.bf16.mxu1 %v10074_v56  ;;  %v10142_v56 = vld [vmem:[#allocation2 + $0x19d0] ss:$8 sps:$4 sm:$0xff]  }
 0x319   :  { %7385 = vmatpush2.bf16.msra.mxu0 %v10069_v33  ;;  %v10147_v33 = vld [vmem:[#allocation2 + $0x18c4] ss:$8 sps:$4 sm:$0xff]  }
 0x31a   :  { %7426 = vmatpush2.bf16.msra.mxu1 %v10072_v32  ;;  %7436 = vmatprep.subr.bf16.mxu0 %v10081_v59  ;;  %v10150_v32 = vld [vmem:[#allocation2 + $0x19c4] ss:$8 sps:$4 sm:$0xff]   ;;  %v10145_v59 = vld [vmem:[#allocation2 + $0x18c0] ss:$8 sps:$4 sm:$0xff]  }
 0x31b   :  { %7477 = vmatprep.subr.bf16.mxu1 %v10084_v34  ;;  %v10148_v34 = vld [vmem:[#allocation2 + $0x19c0] ss:$8 sps:$4 sm:$0xff]  }
 0x31c   :  { %v7142_v5 = vpop.f32.mrf.mxu0  ;;  %7387 = vmatmul.mubr.bf16.vlgmr.msra.gmra.mxu0 %v7829_v61  ;;  %v10153_v61 = vld [vmem:[#allocation2 + $0x18b4] ss:$8 sps:$4 sm:$0xff]  }
 0x31d   :  { %v7183_v42 = vpop.f32.mrf.mxu1  ;;  %7428 = vmatmul.mubr.bf16.vlgmr.msra.gmra.mxu1 %v7831_v35  ;;  %v7143_v9 = vadd.f32 %v7142_v5, %v10794_v60  ;;  %7437 = vmatpush1.bf16.msra.mxu0 %v10079_v1  ;;  %v10091_v60 = vld [vmem:[#allocation2 + $0x1850] ss:$8 sps:$4 sm:$0xff]   ;;  %v10156_v35 = vld [vmem:[#allocation2 + $0x19b4] ss:$8 sps:$4 sm:$0xff]  }
 0x31e   :  { %7478 = vmatpush1.bf16.msra.mxu1 %v10082_v2  ;;  %v7144_v11 = vpop.f32.mrf.mxu0  ;;  %7438 = vmatprep.subr.bf16.mxu0 %v10087_v20  ;;  %v10151_v1 = vld [vmem:[#allocation2 + $0x18b0] ss:$8 sps:$4 sm:$0xff]   ;;  %v10159_v20 = vld [vmem:[#allocation2 + $0x18a4] ss:$8 sps:$4 sm:$0xff]   ;;  %v10165_v5 = vld [vmem:[#allocation2 + $0x1894] ss:$8 sps:$4 sm:$0xff]  }
 0x31f   :  { %v7185_v52 = vpop.f32.mrf.mxu1  ;;  %7479 = vmatprep.subr.bf16.mxu1 %v10090_v3  ;;  %v10818_v15 = vadd.f32 %v7183_v42, %v7143_v9  ;;  %v7145_v57 = vadd.f32 %v7144_v11, %v10797_v62  ;;  %7468 = vmatprep.mubr.bf16.mxu0 %v7834_v43  ;;  %v10100_v62 = vld [vmem:[#allocation2 + $0x1940] ss:$8 sps:$4 sm:$0xff]   ;;  %v10154_v2 = vld [vmem:[#allocation2 + $0x19b0] ss:$8 sps:$4 sm:$0xff]   ;;  %v10162_v3 = vld [vmem:[#allocation2 + $0x19a4] ss:$8 sps:$4 sm:$0xff]  }
 0x320   :  { %7509 = vmatprep.mubr.bf16.mxu1 %v7836_v4  ;;  %v7146_v16 = vpop.f32.mrf.mxu0  ;;  %v10157_v43 = vld [vmem:[#allocation2 + $0x18a0] ss:$8 sps:$4 sm:$0xff]   ;;  %v10168_v42 = vld [vmem:[#allocation2 + $0x1994] ss:$8 sps:$4 sm:$0xff]   ;;  %v10163_v9 = vld [vmem:[#allocation2 + $0x1890] ss:$8 sps:$4 sm:$0xff]  }
 0x321   :  { %v7187_v58 = vpop.f32.mrf.mxu1  ;;  %v10821_v55 = vadd.f32 %v7185_v52, %v7145_v57  ;;  %7439 = vmatpush1.bf16.msra.mxu0 %v10085_v10  ;;  %v10160_v4 = vld [vmem:[#allocation2 + $0x19a0] ss:$8 sps:$4 sm:$0xff]   ;;  %v10166_v10 = vld [vmem:[#allocation2 + $0x1990] ss:$8 sps:$4 sm:$0xff]   ;;  %v10174_v11 = vld [vmem:[#allocation2 + $0x1984] ss:$8 sps:$4 sm:$0xff]   ;;  %v7833_v16 = vcombine.low %v10806_v39, %v10806_v39 }
 0x322   :  { %7480 = vmatpush1.bf16.msra.mxu1 %v10088_v28  ;;  %v7147_v22 = vpop.f32.mrf.mxu0  ;;  %7440 = vmatprep.subr.bf16.mxu0 %v10093_v51  ;;  %v10171_v28 = vld [vmem:[#allocation2 + $0x1884] ss:$8 sps:$4 sm:$0xff]   ;;  %v10169_v52 = vld [vmem:[#allocation2 + $0x1880] ss:$8 sps:$4 sm:$0xff]   ;;  %v10184_v57 = vld [vmem:[#allocation2 + $0x1b74] ss:$8 sps:$4 sm:$0xff]   ;;  %v7835_v58 = vcombine.low %v10811_v63, %v10811_v63 }
 0x323   :  { %v7188_v23 = vpop.f32.mrf.mxu1  ;;  %7481 = vmatprep.subr.bf16.mxu1 %v10096_v14  ;;  %v10172_v51 = vld [vmem:[#allocation2 + $0x1980] ss:$8 sps:$4 sm:$0xff]   ;;  %v10181_v14 = vld [vmem:[#allocation2 + $0x1a74] ss:$8 sps:$4 sm:$0xff]   ;;  %v10179_v22 = vld [vmem:[#allocation2 + $0x1a70] ss:$8 sps:$4 sm:$0xff]  }
 0x324   :  { %v10182_v23 = vld [vmem:[#allocation2 + $0x1b70] ss:$8 sps:$4 sm:$0xff]   ;;  %v10187_v39 = vld [vmem:[#allocation2 + $0x1a64] ss:$8 sps:$4 sm:$0xff]  }
 0x325   :  { %7441 = vmatpush1.bf16.msra.mxu0 %v10091_v60  ;;  %v10830_v60 = vld [vmem:[%s10904_s0 + $0xd0] sm:$0xff] }
 0x326   :  { %7482 = vmatpush1.bf16.msra.mxu1 %v10094_v17  ;;  %7442 = vmatprep.subr.bf16.mxu0 %v10099_v25  ;;  %v10835_v17 = vld [vmem:[%s10904_s0 + $0xd8] sm:$0xff]  ;;  %v10190_v25 = vld [vmem:[#allocation2 + $0x1b64] ss:$8 sps:$4 sm:$0xff]   ;;  %v7838_v63 = vcombine.high %v10830_v60, %v10830_v60 }
 0x327   :  { %7483 = vmatprep.subr.bf16.mxu1 %v10102_v0  ;;  %v7840_v0 = vcombine.high %v10835_v17, %v10835_v17 }
 0x329   :  { %7443 = vmatpush1.bf16.msra.mxu0 %v10097_v19 }
 0x32a   :  { %7484 = vmatpush1.bf16.msra.mxu1 %v10100_v62  ;;  %7444 = vmatprep.subr.bf16.mxu0 %v10105_v44 }
 0x32b   :  { %7485 = vmatprep.subr.bf16.mxu1 %v10108_v29  ;;  %v10185_v29 = vld [vmem:[#allocation2 + $0x1a60] ss:$8 sps:$4 sm:$0xff]  }
 0x32d   :  { %7445 = vmatpush1.bf16.msra.mxu0 %v10103_v8  ;;  %v10188_v8 = vld [vmem:[#allocation2 + $0x1b60] ss:$8 sps:$4 sm:$0xff]  }
 0x32e   :  { %7486 = vmatpush1.bf16.msra.mxu1 %v10106_v30  ;;  %7446 = vmatprep.subr.bf16.mxu0 %v10111_v31 }
 0x32f   :  { %7487 = vmatprep.subr.bf16.mxu1 %v10114_v7  ;;  %v10193_v7 = vld [vmem:[#allocation2 + $0x1a54] ss:$8 sps:$4 sm:$0xff]  }
 0x331   :  { %7447 = vmatpush1.bf16.msra.mxu0 %v10109_v36  ;;  %v10196_v36 = vld [vmem:[#allocation2 + $0x1b54] ss:$8 sps:$4 sm:$0xff]  }
 0x332   :  { %7488 = vmatpush1.bf16.msra.mxu1 %v10112_v37  ;;  %7448 = vmatprep.subr.bf16.mxu0 %v10117_v50 }
 0x333   :  { %7489 = vmatprep.subr.bf16.mxu1 %v10120_v38 }
 0x335   :  { %7449 = vmatpush1.bf16.msra.mxu0 %v10115_v13 }
 0x336   :  { %7490 = vmatpush1.bf16.msra.mxu1 %v10118_v12  ;;  %7450 = vmatprep.subr.bf16.mxu0 %v10123_v21  ;;  %v10194_v21 = vld [vmem:[#allocation2 + $0x1b50] ss:$8 sps:$4 sm:$0xff]  }
 0x337   :  { %7491 = vmatprep.subr.bf16.mxu1 %v10126_v24 }
 0x339   :  { %7451 = vmatpush1.bf16.msra.mxu0 %v10121_v40 }
 0x33a   :  { %7492 = vmatpush1.bf16.msra.mxu1 %v10124_v41  ;;  %7452 = vmatprep.subr.bf16.mxu0 %v10129_v45  ;;  %v10199_v41 = vld [vmem:[#allocation2 + $0x1a44] ss:$8 sps:$4 sm:$0xff]  }
 0x33b   :  { %7493 = vmatprep.subr.bf16.mxu1 %v10132_v46  ;;  %v10202_v45 = vld [vmem:[#allocation2 + $0x1b44] ss:$8 sps:$4 sm:$0xff]   ;;  %v10197_v46 = vld [vmem:[#allocation2 + $0x1a40] ss:$8 sps:$4 sm:$0xff]  }
 0x33d   :  { %7453 = vmatpush2.bf16.msra.mxu0 %v10127_v26  ;;  %v10205_v26 = vld [vmem:[#allocation2 + $0x1a34] ss:$8 sps:$4 sm:$0xff]  }
 0x33e   :  { %7494 = vmatpush2.bf16.msra.mxu1 %v10130_v47  ;;  %7454 = vmatprep.subr.bf16.mxu0 %v10135_v27  ;;  %v10208_v47 = vld [vmem:[#allocation2 + $0x1b34] ss:$8 sps:$4 sm:$0xff]   ;;  %v10203_v27 = vld [vmem:[#allocation2 + $0x1a30] ss:$8 sps:$4 sm:$0xff]  }
 0x33f   :  { %7495 = vmatprep.subr.bf16.mxu1 %v10138_v48  ;;  %v10206_v48 = vld [vmem:[#allocation2 + $0x1b30] ss:$8 sps:$4 sm:$0xff]  }
 0x341   :  { %7455 = vmatpush2.bf16.msra.mxu0 %v10133_v49  ;;  %v10211_v49 = vld [vmem:[#allocation2 + $0x1a24] ss:$8 sps:$4 sm:$0xff]  }
 0x342   :  { %7496 = vmatpush2.bf16.msra.mxu1 %v10136_v18  ;;  %7456 = vmatprep.subr.bf16.mxu0 %v10141_v53  ;;  %v10214_v18 = vld [vmem:[#allocation2 + $0x1b24] ss:$8 sps:$4 sm:$0xff]   ;;  %v10209_v53 = vld [vmem:[#allocation2 + $0x1a20] ss:$8 sps:$4 sm:$0xff]  }
 0x343   :  { %7497 = vmatprep.subr.bf16.mxu1 %v10144_v54  ;;  %v10212_v54 = vld [vmem:[#allocation2 + $0x1b20] ss:$8 sps:$4 sm:$0xff]  }
 0x345   :  { %7457 = vmatpush2.bf16.msra.mxu0 %v10139_v6  ;;  %v10217_v6 = vld [vmem:[#allocation2 + $0x1a14] ss:$8 sps:$4 sm:$0xff]  }
 0x346   :  { %7498 = vmatpush2.bf16.msra.mxu1 %v10142_v56  ;;  %7458 = vmatprep.subr.bf16.mxu0 %v10147_v33  ;;  %v10220_v56 = vld [vmem:[#allocation2 + $0x1b14] ss:$8 sps:$4 sm:$0xff]   ;;  %v10215_v33 = vld [vmem:[#allocation2 + $0x1a10] ss:$8 sps:$4 sm:$0xff]  }
 0x347   :  { %7499 = vmatprep.subr.bf16.mxu1 %v10150_v32  ;;  %v10218_v32 = vld [vmem:[#allocation2 + $0x1b10] ss:$8 sps:$4 sm:$0xff]  }
 0x349   :  { %7459 = vmatpush2.bf16.msra.mxu0 %v10145_v59  ;;  %v10223_v59 = vld [vmem:[#allocation2 + $0x1a04] ss:$8 sps:$4 sm:$0xff]  }
 0x34a   :  { %7500 = vmatpush2.bf16.msra.mxu1 %v10148_v34  ;;  %7460 = vmatprep.subr.bf16.mxu0 %v10153_v61  ;;  %v10226_v34 = vld [vmem:[#allocation2 + $0x1b04] ss:$8 sps:$4 sm:$0xff]   ;;  %v10221_v61 = vld [vmem:[#allocation2 + $0x1a00] ss:$8 sps:$4 sm:$0xff]  }
 0x34b   :  { %7501 = vmatprep.subr.bf16.mxu1 %v10156_v35  ;;  %v10224_v35 = vld [vmem:[#allocation2 + $0x1b00] ss:$8 sps:$4 sm:$0xff]  }
 0x34d   :  { %7461 = vmatpush2.bf16.msra.mxu0 %v10151_v1  ;;  %v10229_v1 = vld [vmem:[#allocation2 + $0x1af4] ss:$8 sps:$4 sm:$0xff]  }
 0x34e   :  { %7502 = vmatpush2.bf16.msra.mxu1 %v10154_v2  ;;  %7462 = vmatprep.subr.bf16.mxu0 %v10159_v20  ;;  %v10232_v2 = vld [vmem:[#allocation2 + $0x1bf4] ss:$8 sps:$4 sm:$0xff]   ;;  %v10227_v20 = vld [vmem:[#allocation2 + $0x1af0] ss:$8 sps:$4 sm:$0xff]  }
 0x34f   :  { %7503 = vmatprep.subr.bf16.mxu1 %v10162_v3  ;;  %v10230_v3 = vld [vmem:[#allocation2 + $0x1bf0] ss:$8 sps:$4 sm:$0xff]  }
 0x351   :  { %7463 = vmatpush2.bf16.msra.mxu0 %v10157_v43  ;;  %v10235_v43 = vld [vmem:[#allocation2 + $0x1ae4] ss:$8 sps:$4 sm:$0xff]  }
 0x352   :  { %7504 = vmatpush2.bf16.msra.mxu1 %v10160_v4  ;;  %7464 = vmatprep.subr.bf16.mxu0 %v10165_v5  ;;  %v10238_v4 = vld [vmem:[#allocation2 + $0x1be4] ss:$8 sps:$4 sm:$0xff]   ;;  %v10233_v5 = vld [vmem:[#allocation2 + $0x1ae0] ss:$8 sps:$4 sm:$0xff]  }
 0x353   :  { %7505 = vmatprep.subr.bf16.mxu1 %v10168_v42  ;;  %v10236_v42 = vld [vmem:[#allocation2 + $0x1be0] ss:$8 sps:$4 sm:$0xff]  }
 0x355   :  { %7465 = vmatpush2.bf16.msra.mxu0 %v10163_v9  ;;  %v10241_v9 = vld [vmem:[#allocation2 + $0x1ad4] ss:$8 sps:$4 sm:$0xff]  }
 0x356   :  { %7506 = vmatpush2.bf16.msra.mxu1 %v10166_v10  ;;  %7466 = vmatprep.subr.bf16.mxu0 %v10171_v28  ;;  %v10244_v10 = vld [vmem:[#allocation2 + $0x1bd4] ss:$8 sps:$4 sm:$0xff]   ;;  %v10239_v28 = vld [vmem:[#allocation2 + $0x1ad0] ss:$8 sps:$4 sm:$0xff]  }
 0x357   :  { %7507 = vmatprep.subr.bf16.mxu1 %v10174_v11  ;;  %v10242_v11 = vld [vmem:[#allocation2 + $0x1bd0] ss:$8 sps:$4 sm:$0xff]  }
 0x359   :  { %7467 = vmatpush2.bf16.msra.mxu0 %v10169_v52  ;;  %v10247_v52 = vld [vmem:[#allocation2 + $0x1ac4] ss:$8 sps:$4 sm:$0xff]  }
 0x35a   :  { %7508 = vmatpush2.bf16.msra.mxu1 %v10172_v51  ;;  %7518 = vmatprep.subr.bf16.mxu0 %v10181_v14  ;;  %v10250_v51 = vld [vmem:[#allocation2 + $0x1bc4] ss:$8 sps:$4 sm:$0xff]   ;;  %v10245_v14 = vld [vmem:[#allocation2 + $0x1ac0] ss:$8 sps:$4 sm:$0xff]  }
 0x35b   :  { %7559 = vmatprep.subr.bf16.mxu1 %v10184_v57  ;;  %v10248_v57 = vld [vmem:[#allocation2 + $0x1bc0] ss:$8 sps:$4 sm:$0xff]  }
 0x35c   :  { %v7224_v19 = vpop.f32.mrf.mxu0  ;;  %7469 = vmatmul.mubr.bf16.vlgmr.msra.gmra.mxu0 %v7833_v16  ;;  %v10253_v16 = vld [vmem:[#allocation2 + $0x1ab4] ss:$8 sps:$4 sm:$0xff]  }
 0x35d   :  { %v7265_v62 = vpop.f32.mrf.mxu1  ;;  %7510 = vmatmul.mubr.bf16.vlgmr.msra.gmra.mxu1 %v7835_v58  ;;  %v7225_v44 = vadd.f32 %v7224_v19, %v10818_v15  ;;  %7519 = vmatpush1.bf16.msra.mxu0 %v10179_v22  ;;  %v10191_v15 = vld [vmem:[#allocation2 + $0x1a50] ss:$8 sps:$4 sm:$0xff]   ;;  %v10256_v58 = vld [vmem:[#allocation2 + $0x1bb4] ss:$8 sps:$4 sm:$0xff]  }
 0x35e   :  { %7560 = vmatpush1.bf16.msra.mxu1 %v10182_v23  ;;  %v7226_v30 = vpop.f32.mrf.mxu0  ;;  %7520 = vmatprep.subr.bf16.mxu0 %v10187_v39  ;;  %v10251_v22 = vld [vmem:[#allocation2 + $0x1ab0] ss:$8 sps:$4 sm:$0xff]   ;;  %v10259_v39 = vld [vmem:[#allocation2 + $0x1aa4] ss:$8 sps:$4 sm:$0xff]   ;;  %v10265_v19 = vld [vmem:[#allocation2 + $0x1a94] ss:$8 sps:$4 sm:$0xff]  }
 0x35f   :  { %v7267_v31 = vpop.f32.mrf.mxu1  ;;  %7561 = vmatprep.subr.bf16.mxu1 %v10190_v25  ;;  %v10842_v37 = vadd.f32 %v7265_v62, %v7225_v44  ;;  %v7227_v50 = vadd.f32 %v7226_v30, %v10821_v55  ;;  %7550 = vmatprep.mubr.bf16.mxu0 %v7838_v63  ;;  %v10200_v55 = vld [vmem:[#allocation2 + $0x1b40] ss:$8 sps:$4 sm:$0xff]   ;;  %v10254_v23 = vld [vmem:[#allocation2 + $0x1bb0] ss:$8 sps:$4 sm:$0xff]   ;;  %v10262_v25 = vld [vmem:[#allocation2 + $0x1ba4] ss:$8 sps:$4 sm:$0xff]  }
 0x360   :  { %7591 = vmatprep.mubr.bf16.mxu1 %v7840_v0  ;;  %v7228_v38 = vpop.f32.mrf.mxu0  ;;  %v10257_v63 = vld [vmem:[#allocation2 + $0x1aa0] ss:$8 sps:$4 sm:$0xff]   ;;  %v10268_v62 = vld [vmem:[#allocation2 + $0x1b94] ss:$8 sps:$4 sm:$0xff]   ;;  %v10263_v44 = vld [vmem:[#allocation2 + $0x1a90] ss:$8 sps:$4 sm:$0xff]  }
 0x361   :  { %v7269_v13 = vpop.f32.mrf.mxu1  ;;  %v10845_v12 = vadd.f32 %v7267_v31, %v7227_v50  ;;  %7521 = vmatpush1.bf16.msra.mxu0 %v10185_v29  ;;  %v10260_v0 = vld [vmem:[#allocation2 + $0x1ba0] ss:$8 sps:$4 sm:$0xff]   ;;  %v10266_v29 = vld [vmem:[#allocation2 + $0x1b90] ss:$8 sps:$4 sm:$0xff]   ;;  %v10274_v30 = vld [vmem:[#allocation2 + $0x1b84] ss:$8 sps:$4 sm:$0xff]   ;;  %v7837_v38 = vcombine.low %v10830_v60, %v10830_v60 }
 0x362   :  { %7562 = vmatpush1.bf16.msra.mxu1 %v10188_v8  ;;  %v7229_v24 = vpop.f32.mrf.mxu0  ;;  %7522 = vmatprep.subr.bf16.mxu0 %v10193_v7  ;;  %v10271_v8 = vld [vmem:[#allocation2 + $0x1a84] ss:$8 sps:$4 sm:$0xff]   ;;  %v10269_v31 = vld [vmem:[#allocation2 + $0x1a80] ss:$8 sps:$4 sm:$0xff]   ;;  %v10284_v50 = vld [vmem:[#allocation2 + $0x1d74] ss:$8 sps:$4 sm:$0xff]   ;;  %v7839_v13 = vcombine.low %v10835_v17, %v10835_v17 }
 0x363   :  { %v7270_v40 = vpop.f32.mrf.mxu1  ;;  %7563 = vmatprep.subr.bf16.mxu1 %v10196_v36  ;;  %v10272_v7 = vld [vmem:[#allocation2 + $0x1b80] ss:$8 sps:$4 sm:$0xff]   ;;  %v10281_v36 = vld [vmem:[#allocation2 + $0x1c74] ss:$8 sps:$4 sm:$0xff]   ;;  %v10279_v24 = vld [vmem:[#allocation2 + $0x1c70] ss:$8 sps:$4 sm:$0xff]  }
 0x364   :  { %v10282_v40 = vld [vmem:[#allocation2 + $0x1d70] ss:$8 sps:$4 sm:$0xff]   ;;  %v10287_v60 = vld [vmem:[#allocation2 + $0x1c64] ss:$8 sps:$4 sm:$0xff]  }
 0x365   :  { %7523 = vmatpush1.bf16.msra.mxu0 %v10191_v15  ;;  %v10854_v15 = vld [vmem:[%s10904_s0 + $0xe0] sm:$0xff] }
 0x366   :  { %7564 = vmatpush1.bf16.msra.mxu1 %v10194_v21  ;;  %7524 = vmatprep.subr.bf16.mxu0 %v10199_v41  ;;  %v10859_v21 = vld [vmem:[%s10904_s0 + $0xe8] sm:$0xff]  ;;  %v7842_v17 = vcombine.high %v10854_v15, %v10854_v15 }
 0x367   :  { %7565 = vmatprep.subr.bf16.mxu1 %v10202_v45  ;;  %v10290_v41 = vld [vmem:[#allocation2 + $0x1d64] ss:$8 sps:$4 sm:$0xff]   ;;  %v7844_v45 = vcombine.high %v10859_v21, %v10859_v21 }
 0x369   :  { %7525 = vmatpush1.bf16.msra.mxu0 %v10197_v46 }
 0x36a   :  { %7566 = vmatpush1.bf16.msra.mxu1 %v10200_v55  ;;  %7526 = vmatprep.subr.bf16.mxu0 %v10205_v26 }
 0x36b   :  { %7567 = vmatprep.subr.bf16.mxu1 %v10208_v47  ;;  %v10285_v47 = vld [vmem:[#allocation2 + $0x1c60] ss:$8 sps:$4 sm:$0xff]  }
 0x36d   :  { %7527 = vmatpush1.bf16.msra.mxu0 %v10203_v27  ;;  %v10288_v27 = vld [vmem:[#allocation2 + $0x1d60] ss:$8 sps:$4 sm:$0xff]  }
 0x36e   :  { %7568 = vmatpush1.bf16.msra.mxu1 %v10206_v48  ;;  %7528 = vmatprep.subr.bf16.mxu0 %v10211_v49 }
 0x36f   :  { %7569 = vmatprep.subr.bf16.mxu1 %v10214_v18  ;;  %v10293_v18 = vld [vmem:[#allocation2 + $0x1c54] ss:$8 sps:$4 sm:$0xff]  }
 0x371   :  { %7529 = vmatpush1.bf16.msra.mxu0 %v10209_v53  ;;  %v10296_v53 = vld [vmem:[#allocation2 + $0x1d54] ss:$8 sps:$4 sm:$0xff]  }
 0x372   :  { %7570 = vmatpush1.bf16.msra.mxu1 %v10212_v54  ;;  %7530 = vmatprep.subr.bf16.mxu0 %v10217_v6 }
 0x373   :  { %7571 = vmatprep.subr.bf16.mxu1 %v10220_v56 }
 0x375   :  { %7531 = vmatpush1.bf16.msra.mxu0 %v10215_v33 }
 0x376   :  { %7572 = vmatpush1.bf16.msra.mxu1 %v10218_v32  ;;  %7532 = vmatprep.subr.bf16.mxu0 %v10223_v59  ;;  %v10294_v59 = vld [vmem:[#allocation2 + $0x1d50] ss:$8 sps:$4 sm:$0xff]  }
 0x377   :  { %7573 = vmatprep.subr.bf16.mxu1 %v10226_v34 }
 0x379   :  { %7533 = vmatpush1.bf16.msra.mxu0 %v10221_v61 }
 0x37a   :  { %7574 = vmatpush1.bf16.msra.mxu1 %v10224_v35  ;;  %7534 = vmatprep.subr.bf16.mxu0 %v10229_v1  ;;  %v10299_v35 = vld [vmem:[#allocation2 + $0x1c44] ss:$8 sps:$4 sm:$0xff]  }
 0x37b   :  { %7575 = vmatprep.subr.bf16.mxu1 %v10232_v2  ;;  %v10302_v1 = vld [vmem:[#allocation2 + $0x1d44] ss:$8 sps:$4 sm:$0xff]   ;;  %v10297_v2 = vld [vmem:[#allocation2 + $0x1c40] ss:$8 sps:$4 sm:$0xff]  }
 0x37d   :  { %7535 = vmatpush2.bf16.msra.mxu0 %v10227_v20  ;;  %v10305_v20 = vld [vmem:[#allocation2 + $0x1c34] ss:$8 sps:$4 sm:$0xff]  }
 0x37e   :  { %7576 = vmatpush2.bf16.msra.mxu1 %v10230_v3  ;;  %7536 = vmatprep.subr.bf16.mxu0 %v10235_v43  ;;  %v10308_v3 = vld [vmem:[#allocation2 + $0x1d34] ss:$8 sps:$4 sm:$0xff]   ;;  %v10303_v43 = vld [vmem:[#allocation2 + $0x1c30] ss:$8 sps:$4 sm:$0xff]  }
 0x37f   :  { %7577 = vmatprep.subr.bf16.mxu1 %v10238_v4  ;;  %v10306_v4 = vld [vmem:[#allocation2 + $0x1d30] ss:$8 sps:$4 sm:$0xff]  }
 0x381   :  { %7537 = vmatpush2.bf16.msra.mxu0 %v10233_v5  ;;  %v10311_v5 = vld [vmem:[#allocation2 + $0x1c24] ss:$8 sps:$4 sm:$0xff]  }
 0x382   :  { %7578 = vmatpush2.bf16.msra.mxu1 %v10236_v42  ;;  %7538 = vmatprep.subr.bf16.mxu0 %v10241_v9  ;;  %v10314_v42 = vld [vmem:[#allocation2 + $0x1d24] ss:$8 sps:$4 sm:$0xff]   ;;  %v10309_v9 = vld [vmem:[#allocation2 + $0x1c20] ss:$8 sps:$4 sm:$0xff]  }
 0x383   :  { %7579 = vmatprep.subr.bf16.mxu1 %v10244_v10  ;;  %v10312_v10 = vld [vmem:[#allocation2 + $0x1d20] ss:$8 sps:$4 sm:$0xff]  }
 0x385   :  { %7539 = vmatpush2.bf16.msra.mxu0 %v10239_v28  ;;  %v10317_v28 = vld [vmem:[#allocation2 + $0x1c14] ss:$8 sps:$4 sm:$0xff]  }
 0x386   :  { %7580 = vmatpush2.bf16.msra.mxu1 %v10242_v11  ;;  %7540 = vmatprep.subr.bf16.mxu0 %v10247_v52  ;;  %v10320_v11 = vld [vmem:[#allocation2 + $0x1d14] ss:$8 sps:$4 sm:$0xff]   ;;  %v10315_v52 = vld [vmem:[#allocation2 + $0x1c10] ss:$8 sps:$4 sm:$0xff]  }
 0x387   :  { %7581 = vmatprep.subr.bf16.mxu1 %v10250_v51  ;;  %v10318_v51 = vld [vmem:[#allocation2 + $0x1d10] ss:$8 sps:$4 sm:$0xff]  }
 0x389   :  { %7541 = vmatpush2.bf16.msra.mxu0 %v10245_v14  ;;  %v10323_v14 = vld [vmem:[#allocation2 + $0x1c04] ss:$8 sps:$4 sm:$0xff]  }
 0x38a   :  { %7582 = vmatpush2.bf16.msra.mxu1 %v10248_v57  ;;  %7542 = vmatprep.subr.bf16.mxu0 %v10253_v16  ;;  %v10326_v57 = vld [vmem:[#allocation2 + $0x1d04] ss:$8 sps:$4 sm:$0xff]   ;;  %v10321_v16 = vld [vmem:[#allocation2 + $0x1c00] ss:$8 sps:$4 sm:$0xff]  }
 0x38b   :  { %7583 = vmatprep.subr.bf16.mxu1 %v10256_v58  ;;  %v10324_v58 = vld [vmem:[#allocation2 + $0x1d00] ss:$8 sps:$4 sm:$0xff]  }
 0x38d   :  { %7543 = vmatpush2.bf16.msra.mxu0 %v10251_v22  ;;  %v10329_v22 = vld [vmem:[#allocation2 + $0x1cf4] ss:$8 sps:$4 sm:$0xff]  }
 0x38e   :  { %7584 = vmatpush2.bf16.msra.mxu1 %v10254_v23  ;;  %7544 = vmatprep.subr.bf16.mxu0 %v10259_v39  ;;  %v10332_v23 = vld [vmem:[#allocation2 + $0x1df4] ss:$8 sps:$4 sm:$0xff]   ;;  %v10327_v39 = vld [vmem:[#allocation2 + $0x1cf0] ss:$8 sps:$4 sm:$0xff]  }
 0x38f   :  { %7585 = vmatprep.subr.bf16.mxu1 %v10262_v25  ;;  %v10330_v25 = vld [vmem:[#allocation2 + $0x1df0] ss:$8 sps:$4 sm:$0xff]  }
 0x391   :  { %7545 = vmatpush2.bf16.msra.mxu0 %v10257_v63  ;;  %v10335_v63 = vld [vmem:[#allocation2 + $0x1ce4] ss:$8 sps:$4 sm:$0xff]  }
 0x392   :  { %7586 = vmatpush2.bf16.msra.mxu1 %v10260_v0  ;;  %7546 = vmatprep.subr.bf16.mxu0 %v10265_v19  ;;  %v10338_v0 = vld [vmem:[#allocation2 + $0x1de4] ss:$8 sps:$4 sm:$0xff]   ;;  %v10333_v19 = vld [vmem:[#allocation2 + $0x1ce0] ss:$8 sps:$4 sm:$0xff]  }
 0x393   :  { %7587 = vmatprep.subr.bf16.mxu1 %v10268_v62  ;;  %v10336_v62 = vld [vmem:[#allocation2 + $0x1de0] ss:$8 sps:$4 sm:$0xff]  }
 0x395   :  { %7547 = vmatpush2.bf16.msra.mxu0 %v10263_v44  ;;  %v10341_v44 = vld [vmem:[#allocation2 + $0x1cd4] ss:$8 sps:$4 sm:$0xff]  }
 0x396   :  { %7588 = vmatpush2.bf16.msra.mxu1 %v10266_v29  ;;  %7548 = vmatprep.subr.bf16.mxu0 %v10271_v8  ;;  %v10344_v29 = vld [vmem:[#allocation2 + $0x1dd4] ss:$8 sps:$4 sm:$0xff]   ;;  %v10339_v8 = vld [vmem:[#allocation2 + $0x1cd0] ss:$8 sps:$4 sm:$0xff]  }
 0x397   :  { %7589 = vmatprep.subr.bf16.mxu1 %v10274_v30  ;;  %v10342_v30 = vld [vmem:[#allocation2 + $0x1dd0] ss:$8 sps:$4 sm:$0xff]  }
 0x399   :  { %7549 = vmatpush2.bf16.msra.mxu0 %v10269_v31  ;;  %v10347_v31 = vld [vmem:[#allocation2 + $0x1cc4] ss:$8 sps:$4 sm:$0xff]  }
 0x39a   :  { %7590 = vmatpush2.bf16.msra.mxu1 %v10272_v7  ;;  %7600 = vmatprep.subr.bf16.mxu0 %v10281_v36  ;;  %v10350_v7 = vld [vmem:[#allocation2 + $0x1dc4] ss:$8 sps:$4 sm:$0xff]   ;;  %v10345_v36 = vld [vmem:[#allocation2 + $0x1cc0] ss:$8 sps:$4 sm:$0xff]  }
 0x39b   :  { %7641 = vmatprep.subr.bf16.mxu1 %v10284_v50  ;;  %v10348_v50 = vld [vmem:[#allocation2 + $0x1dc0] ss:$8 sps:$4 sm:$0xff]  }
 0x39c   :  { %v7306_v46 = vpop.f32.mrf.mxu0  ;;  %7551 = vmatmul.mubr.bf16.vlgmr.msra.gmra.mxu0 %v7837_v38  ;;  %v10353_v38 = vld [vmem:[#allocation2 + $0x1cb4] ss:$8 sps:$4 sm:$0xff]  }
 0x39d   :  { %v7347_v55 = vpop.f32.mrf.mxu1  ;;  %7592 = vmatmul.mubr.bf16.vlgmr.msra.gmra.mxu1 %v7839_v13  ;;  %v7307_v26 = vadd.f32 %v7306_v46, %v10842_v37  ;;  %7601 = vmatpush1.bf16.msra.mxu0 %v10279_v24  ;;  %v10291_v37 = vld [vmem:[#allocation2 + $0x1c50] ss:$8 sps:$4 sm:$0xff]   ;;  %v10356_v13 = vld [vmem:[#allocation2 + $0x1db4] ss:$8 sps:$4 sm:$0xff]  }
 0x39e   :  { %7642 = vmatpush1.bf16.msra.mxu1 %v10282_v40  ;;  %v7308_v48 = vpop.f32.mrf.mxu0  ;;  %7602 = vmatprep.subr.bf16.mxu0 %v10287_v60  ;;  %v10351_v24 = vld [vmem:[#allocation2 + $0x1cb0] ss:$8 sps:$4 sm:$0xff]   ;;  %v10359_v60 = vld [vmem:[#allocation2 + $0x1ca4] ss:$8 sps:$4 sm:$0xff]   ;;  %v10365_v46 = vld [vmem:[#allocation2 + $0x1c94] ss:$8 sps:$4 sm:$0xff]  }
 0x39f   :  { %v7349_v49 = vpop.f32.mrf.mxu1  ;;  %7643 = vmatprep.subr.bf16.mxu1 %v10290_v41  ;;  %v10866_v54 = vadd.f32 %v7347_v55, %v7307_v26  ;;  %v7309_v6 = vadd.f32 %v7308_v48, %v10845_v12  ;;  %7632 = vmatprep.mubr.bf16.mxu0 %v7842_v17  ;;  %v10300_v12 = vld [vmem:[#allocation2 + $0x1d40] ss:$8 sps:$4 sm:$0xff]   ;;  %v10354_v40 = vld [vmem:[#allocation2 + $0x1db0] ss:$8 sps:$4 sm:$0xff]   ;;  %v10362_v41 = vld [vmem:[#allocation2 + $0x1da4] ss:$8 sps:$4 sm:$0xff]  }
 0x3a0   :  { %7673 = vmatprep.mubr.bf16.mxu1 %v7844_v45  ;;  %v7310_v56 = vpop.f32.mrf.mxu0  ;;  %v10357_v17 = vld [vmem:[#allocation2 + $0x1ca0] ss:$8 sps:$4 sm:$0xff]   ;;  %v10368_v55 = vld [vmem:[#allocation2 + $0x1d94] ss:$8 sps:$4 sm:$0xff]   ;;  %v10363_v26 = vld [vmem:[#allocation2 + $0x1c90] ss:$8 sps:$4 sm:$0xff]  }
 0x3a1   :  { %v7351_v33 = vpop.f32.mrf.mxu1  ;;  %v10869_v32 = vadd.f32 %v7349_v49, %v7309_v6  ;;  %7603 = vmatpush1.bf16.msra.mxu0 %v10285_v47  ;;  %v10360_v45 = vld [vmem:[#allocation2 + $0x1da0] ss:$8 sps:$4 sm:$0xff]   ;;  %v10366_v47 = vld [vmem:[#allocation2 + $0x1d90] ss:$8 sps:$4 sm:$0xff]   ;;  %v10374_v48 = vld [vmem:[#allocation2 + $0x1d84] ss:$8 sps:$4 sm:$0xff]   ;;  %v7841_v56 = vcombine.low %v10854_v15, %v10854_v15 }
 0x3a2   :  { %7644 = vmatpush1.bf16.msra.mxu1 %v10288_v27  ;;  %v7311_v34 = vpop.f32.mrf.mxu0  ;;  %7604 = vmatprep.subr.bf16.mxu0 %v10293_v18  ;;  %v10371_v27 = vld [vmem:[#allocation2 + $0x1c84] ss:$8 sps:$4 sm:$0xff]   ;;  %v10369_v49 = vld [vmem:[#allocation2 + $0x1c80] ss:$8 sps:$4 sm:$0xff]   ;;  %v10384_v6 = vld [vmem:[#allocation2 + $0x1f74] ss:$8 sps:$4 sm:$0xff]   ;;  %v7843_v33 = vcombine.low %v10859_v21, %v10859_v21 }
 0x3a3   :  { %v7352_v61 = vpop.f32.mrf.mxu1  ;;  %7645 = vmatprep.subr.bf16.mxu1 %v10296_v53  ;;  %v10372_v18 = vld [vmem:[#allocation2 + $0x1d80] ss:$8 sps:$4 sm:$0xff]   ;;  %v10381_v53 = vld [vmem:[#allocation2 + $0x1e74] ss:$8 sps:$4 sm:$0xff]   ;;  %v10379_v34 = vld [vmem:[#allocation2 + $0x1e70] ss:$8 sps:$4 sm:$0xff]  }
 0x3a4   :  { %v10382_v61 = vld [vmem:[#allocation2 + $0x1f70] ss:$8 sps:$4 sm:$0xff]   ;;  %v10387_v15 = vld [vmem:[#allocation2 + $0x1e64] ss:$8 sps:$4 sm:$0xff]  }
 0x3a5   :  { %7605 = vmatpush1.bf16.msra.mxu0 %v10291_v37  ;;  %v10878_v37 = vld [vmem:[%s10904_s0 + $0xf0] sm:$0xff] }
 0x3a6   :  { %7646 = vmatpush1.bf16.msra.mxu1 %v10294_v59  ;;  %7606 = vmatprep.subr.bf16.mxu0 %v10299_v35  ;;  %v10883_v59 = vld [vmem:[%s10904_s0 + $0xf8] sm:$0xff]  ;;  %v10390_v35 = vld [vmem:[#allocation2 + $0x1f64] ss:$8 sps:$4 sm:$0xff]   ;;  %v7846_v21 = vcombine.high %v10878_v37, %v10878_v37 }
 0x3a7   :  { %7647 = vmatprep.subr.bf16.mxu1 %v10302_v1  ;;  %v7848_v1 = vcombine.high %v10883_v59, %v10883_v59 }
 0x3a9   :  { %7607 = vmatpush1.bf16.msra.mxu0 %v10297_v2 }
 0x3aa   :  { %7648 = vmatpush1.bf16.msra.mxu1 %v10300_v12  ;;  %7608 = vmatprep.subr.bf16.mxu0 %v10305_v20 }
 0x3ab   :  { %7649 = vmatprep.subr.bf16.mxu1 %v10308_v3  ;;  %v10385_v3 = vld [vmem:[#allocation2 + $0x1e60] ss:$8 sps:$4 sm:$0xff]  }
 0x3ad   :  { %7609 = vmatpush1.bf16.msra.mxu0 %v10303_v43  ;;  %v10388_v43 = vld [vmem:[#allocation2 + $0x1f60] ss:$8 sps:$4 sm:$0xff]  }
 0x3ae   :  { %7650 = vmatpush1.bf16.msra.mxu1 %v10306_v4  ;;  %7610 = vmatprep.subr.bf16.mxu0 %v10311_v5 }
 0x3af   :  { %7651 = vmatprep.subr.bf16.mxu1 %v10314_v42  ;;  %v10393_v42 = vld [vmem:[#allocation2 + $0x1e54] ss:$8 sps:$4 sm:$0xff]  }
 0x3b1   :  { %7611 = vmatpush1.bf16.msra.mxu0 %v10309_v9  ;;  %v10396_v9 = vld [vmem:[#allocation2 + $0x1f54] ss:$8 sps:$4 sm:$0xff]  }
 0x3b2   :  { %7652 = vmatpush1.bf16.msra.mxu1 %v10312_v10  ;;  %7612 = vmatprep.subr.bf16.mxu0 %v10317_v28 }
 0x3b3   :  { %7653 = vmatprep.subr.bf16.mxu1 %v10320_v11 }
 0x3b5   :  { %7613 = vmatpush1.bf16.msra.mxu0 %v10315_v52 }
 0x3b6   :  { %7654 = vmatpush1.bf16.msra.mxu1 %v10318_v51  ;;  %7614 = vmatprep.subr.bf16.mxu0 %v10323_v14  ;;  %v10394_v14 = vld [vmem:[#allocation2 + $0x1f50] ss:$8 sps:$4 sm:$0xff]  }
 0x3b7   :  { %7655 = vmatprep.subr.bf16.mxu1 %v10326_v57 }
 0x3b9   :  { %7615 = vmatpush1.bf16.msra.mxu0 %v10321_v16 }
 0x3ba   :  { %7656 = vmatpush1.bf16.msra.mxu1 %v10324_v58  ;;  %7616 = vmatprep.subr.bf16.mxu0 %v10329_v22  ;;  %v10399_v58 = vld [vmem:[#allocation2 + $0x1e44] ss:$8 sps:$4 sm:$0xff]  }
 0x3bb   :  { %7657 = vmatprep.subr.bf16.mxu1 %v10332_v23  ;;  %v10402_v22 = vld [vmem:[#allocation2 + $0x1f44] ss:$8 sps:$4 sm:$0xff]   ;;  %v10397_v23 = vld [vmem:[#allocation2 + $0x1e40] ss:$8 sps:$4 sm:$0xff]  }
 0x3bd   :  { %7617 = vmatpush2.bf16.msra.mxu0 %v10327_v39  ;;  %v10405_v39 = vld [vmem:[#allocation2 + $0x1e34] ss:$8 sps:$4 sm:$0xff]  }
 0x3be   :  { %7658 = vmatpush2.bf16.msra.mxu1 %v10330_v25  ;;  %7618 = vmatprep.subr.bf16.mxu0 %v10335_v63  ;;  %v10408_v25 = vld [vmem:[#allocation2 + $0x1f34] ss:$8 sps:$4 sm:$0xff]   ;;  %v10403_v63 = vld [vmem:[#allocation2 + $0x1e30] ss:$8 sps:$4 sm:$0xff]  }
 0x3bf   :  { %7659 = vmatprep.subr.bf16.mxu1 %v10338_v0  ;;  %v10406_v0 = vld [vmem:[#allocation2 + $0x1f30] ss:$8 sps:$4 sm:$0xff]  }
 0x3c1   :  { %7619 = vmatpush2.bf16.msra.mxu0 %v10333_v19  ;;  %v10411_v19 = vld [vmem:[#allocation2 + $0x1e24] ss:$8 sps:$4 sm:$0xff]  }
 0x3c2   :  { %7660 = vmatpush2.bf16.msra.mxu1 %v10336_v62  ;;  %7620 = vmatprep.subr.bf16.mxu0 %v10341_v44  ;;  %v10414_v62 = vld [vmem:[#allocation2 + $0x1f24] ss:$8 sps:$4 sm:$0xff]   ;;  %v10409_v44 = vld [vmem:[#allocation2 + $0x1e20] ss:$8 sps:$4 sm:$0xff]  }
 0x3c3   :  { %7661 = vmatprep.subr.bf16.mxu1 %v10344_v29  ;;  %v10412_v29 = vld [vmem:[#allocation2 + $0x1f20] ss:$8 sps:$4 sm:$0xff]  }
 0x3c5   :  { %7621 = vmatpush2.bf16.msra.mxu0 %v10339_v8  ;;  %v10417_v8 = vld [vmem:[#allocation2 + $0x1e14] ss:$8 sps:$4 sm:$0xff]  }
 0x3c6   :  { %7662 = vmatpush2.bf16.msra.mxu1 %v10342_v30  ;;  %7622 = vmatprep.subr.bf16.mxu0 %v10347_v31  ;;  %v10420_v30 = vld [vmem:[#allocation2 + $0x1f14] ss:$8 sps:$4 sm:$0xff]   ;;  %v10415_v31 = vld [vmem:[#allocation2 + $0x1e10] ss:$8 sps:$4 sm:$0xff]  }
 0x3c7   :  { %7663 = vmatprep.subr.bf16.mxu1 %v10350_v7  ;;  %v10418_v7 = vld [vmem:[#allocation2 + $0x1f10] ss:$8 sps:$4 sm:$0xff]  }
 0x3c9   :  { %7623 = vmatpush2.bf16.msra.mxu0 %v10345_v36  ;;  %v10423_v36 = vld [vmem:[#allocation2 + $0x1e04] ss:$8 sps:$4 sm:$0xff]  }
 0x3ca   :  { %7664 = vmatpush2.bf16.msra.mxu1 %v10348_v50  ;;  %7624 = vmatprep.subr.bf16.mxu0 %v10353_v38  ;;  %v10426_v50 = vld [vmem:[#allocation2 + $0x1f04] ss:$8 sps:$4 sm:$0xff]   ;;  %v10421_v38 = vld [vmem:[#allocation2 + $0x1e00] ss:$8 sps:$4 sm:$0xff]  }
 0x3cb   :  { %7665 = vmatprep.subr.bf16.mxu1 %v10356_v13  ;;  %v10424_v13 = vld [vmem:[#allocation2 + $0x1f00] ss:$8 sps:$4 sm:$0xff]  }
 0x3cd   :  { %7625 = vmatpush2.bf16.msra.mxu0 %v10351_v24  ;;  %v10429_v24 = vld [vmem:[#allocation2 + $0x1ef4] ss:$8 sps:$4 sm:$0xff]  }
 0x3ce   :  { %7666 = vmatpush2.bf16.msra.mxu1 %v10354_v40  ;;  %7626 = vmatprep.subr.bf16.mxu0 %v10359_v60  ;;  %v10432_v40 = vld [vmem:[#allocation2 + $0x1ff4] ss:$8 sps:$4 sm:$0xff]   ;;  %v10427_v60 = vld [vmem:[#allocation2 + $0x1ef0] ss:$8 sps:$4 sm:$0xff]  }
 0x3cf   :  { %7667 = vmatprep.subr.bf16.mxu1 %v10362_v41  ;;  %v10430_v41 = vld [vmem:[#allocation2 + $0x1ff0] ss:$8 sps:$4 sm:$0xff]  }
 0x3d1   :  { %7627 = vmatpush2.bf16.msra.mxu0 %v10357_v17  ;;  %v10435_v17 = vld [vmem:[#allocation2 + $0x1ee4] ss:$8 sps:$4 sm:$0xff]  }
 0x3d2   :  { %7668 = vmatpush2.bf16.msra.mxu1 %v10360_v45  ;;  %7628 = vmatprep.subr.bf16.mxu0 %v10365_v46  ;;  %v10438_v45 = vld [vmem:[#allocation2 + $0x1fe4] ss:$8 sps:$4 sm:$0xff]   ;;  %v10433_v46 = vld [vmem:[#allocation2 + $0x1ee0] ss:$8 sps:$4 sm:$0xff]  }
 0x3d3   :  { %7669 = vmatprep.subr.bf16.mxu1 %v10368_v55  ;;  %v10436_v55 = vld [vmem:[#allocation2 + $0x1fe0] ss:$8 sps:$4 sm:$0xff]  }
 0x3d5   :  { %7629 = vmatpush2.bf16.msra.mxu0 %v10363_v26  ;;  %v10441_v26 = vld [vmem:[#allocation2 + $0x1ed4] ss:$8 sps:$4 sm:$0xff]  }
 0x3d6   :  { %7670 = vmatpush2.bf16.msra.mxu1 %v10366_v47  ;;  %7630 = vmatprep.subr.bf16.mxu0 %v10371_v27  ;;  %v10444_v47 = vld [vmem:[#allocation2 + $0x1fd4] ss:$8 sps:$4 sm:$0xff]   ;;  %v10439_v27 = vld [vmem:[#allocation2 + $0x1ed0] ss:$8 sps:$4 sm:$0xff]  }
 0x3d7   :  { %7671 = vmatprep.subr.bf16.mxu1 %v10374_v48  ;;  %v10442_v48 = vld [vmem:[#allocation2 + $0x1fd0] ss:$8 sps:$4 sm:$0xff]  }
 0x3d9   :  { %7631 = vmatpush2.bf16.msra.mxu0 %v10369_v49  ;;  %v10447_v49 = vld [vmem:[#allocation2 + $0x1ec4] ss:$8 sps:$4 sm:$0xff]  }
 0x3da   :  { %7672 = vmatpush2.bf16.msra.mxu1 %v10372_v18  ;;  %7682 = vmatprep.subr.bf16.mxu0 %v10381_v53  ;;  %v10450_v18 = vld [vmem:[#allocation2 + $0x1fc4] ss:$8 sps:$4 sm:$0xff]   ;;  %v10445_v53 = vld [vmem:[#allocation2 + $0x1ec0] ss:$8 sps:$4 sm:$0xff]  }
 0x3db   :  { %7723 = vmatprep.subr.bf16.mxu1 %v10384_v6  ;;  %v10448_v6 = vld [vmem:[#allocation2 + $0x1fc0] ss:$8 sps:$4 sm:$0xff]  }
 0x3dc   :  { %v7388_v2 = vpop.f32.mrf.mxu0  ;;  %7633 = vmatmul.mubr.bf16.vlgmr.msra.gmra.mxu0 %v7841_v56  ;;  %v10453_v56 = vld [vmem:[#allocation2 + $0x1eb4] ss:$8 sps:$4 sm:$0xff]  }
 0x3dd   :  { %v7429_v12 = vpop.f32.mrf.mxu1  ;;  %7674 = vmatmul.mubr.bf16.vlgmr.msra.gmra.mxu1 %v7843_v33  ;;  %v7389_v20 = vadd.f32 %v7388_v2, %v10866_v54  ;;  %7683 = vmatpush1.bf16.msra.mxu0 %v10379_v34  ;;  %v10391_v54 = vld [vmem:[#allocation2 + $0x1e50] ss:$8 sps:$4 sm:$0xff]   ;;  %v10456_v33 = vld [vmem:[#allocation2 + $0x1fb4] ss:$8 sps:$4 sm:$0xff]  }
 0x3de   :  { %7724 = vmatpush1.bf16.msra.mxu1 %v10382_v61  ;;  %v7390_v4 = vpop.f32.mrf.mxu0  ;;  %7684 = vmatprep.subr.bf16.mxu0 %v10387_v15  ;;  %v10451_v34 = vld [vmem:[#allocation2 + $0x1eb0] ss:$8 sps:$4 sm:$0xff]   ;;  %v10459_v15 = vld [vmem:[#allocation2 + $0x1ea4] ss:$8 sps:$4 sm:$0xff]   ;;  %v10465_v2 = vld [vmem:[#allocation2 + $0x1e94] ss:$8 sps:$4 sm:$0xff]  }
 0x3df   :  { %v7431_v5 = vpop.f32.mrf.mxu1  ;;  %7725 = vmatprep.subr.bf16.mxu1 %v10390_v35  ;;  %v10890_v10 = vadd.f32 %v7429_v12, %v7389_v20  ;;  %v7391_v28 = vadd.f32 %v7390_v4, %v10869_v32  ;;  %7714 = vmatprep.mubr.bf16.mxu0 %v7846_v21  ;;  %v10400_v32 = vld [vmem:[#allocation2 + $0x1f40] ss:$8 sps:$4 sm:$0xff]   ;;  %v10454_v61 = vld [vmem:[#allocation2 + $0x1fb0] ss:$8 sps:$4 sm:$0xff]   ;;  %v10462_v35 = vld [vmem:[#allocation2 + $0x1fa4] ss:$8 sps:$4 sm:$0xff]  }
 0x3e0   :  { %7755 = vmatprep.mubr.bf16.mxu1 %v7848_v1  ;;  %v7392_v11 = vpop.f32.mrf.mxu0  ;;  %v10457_v21 = vld [vmem:[#allocation2 + $0x1ea0] ss:$8 sps:$4 sm:$0xff]   ;;  %v10468_v12 = vld [vmem:[#allocation2 + $0x1f94] ss:$8 sps:$4 sm:$0xff]   ;;  %v10463_v20 = vld [vmem:[#allocation2 + $0x1e90] ss:$8 sps:$4 sm:$0xff]  }
 0x3e1   :  { %v7433_v52 = vpop.f32.mrf.mxu1  ;;  %v10893_v51 = vadd.f32 %v7431_v5, %v7391_v28  ;;  %7685 = vmatpush1.bf16.msra.mxu0 %v10385_v3  ;;  %v10460_v1 = vld [vmem:[#allocation2 + $0x1fa0] ss:$8 sps:$4 sm:$0xff]   ;;  %v10466_v3 = vld [vmem:[#allocation2 + $0x1f90] ss:$8 sps:$4 sm:$0xff]   ;;  %v10474_v4 = vld [vmem:[#allocation2 + $0x1f84] ss:$8 sps:$4 sm:$0xff]   ;;  %v7847_v28 = vcombine.low %v10883_v59, %v10883_v59 }
 0x3e2   :  { %7726 = vmatpush1.bf16.msra.mxu1 %v10388_v43  ;;  %v7393_v57 = vpop.f32.mrf.mxu0  ;;  %7686 = vmatprep.subr.bf16.mxu0 %v10393_v42  ;;  %v10471_v43 = vld [vmem:[#allocation2 + $0x1e84] ss:$8 sps:$4 sm:$0xff]   ;;  %v10469_v5 = vld [vmem:[#allocation2 + $0x1e80] ss:$8 sps:$4 sm:$0xff]  }
 0x3e3   :  { %v7434_v16 = vpop.f32.mrf.mxu1  ;;  %7727 = vmatprep.subr.bf16.mxu1 %v10396_v9  ;;  %v10472_v42 = vld [vmem:[#allocation2 + $0x1f80] ss:$8 sps:$4 sm:$0xff]   ;;  %v7845_v9 = vcombine.low %v10878_v37, %v10878_v37 }
 0x3e5   :  { %7687 = vmatpush1.bf16.msra.mxu0 %v10391_v54 }
 0x3e6   :  { %7728 = vmatpush1.bf16.msra.mxu1 %v10394_v14  ;;  %7688 = vmatprep.subr.bf16.mxu0 %v10399_v58 }
 0x3e7   :  { %7729 = vmatprep.subr.bf16.mxu1 %v10402_v22 }
 0x3e9   :  { %7689 = vmatpush1.bf16.msra.mxu0 %v10397_v23 }
 0x3ea   :  { %7730 = vmatpush1.bf16.msra.mxu1 %v10400_v32  ;;  %7690 = vmatprep.subr.bf16.mxu0 %v10405_v39 }
 0x3eb   :  { %7731 = vmatprep.subr.bf16.mxu1 %v10408_v25 }
 0x3ed   :  { %7691 = vmatpush1.bf16.msra.mxu0 %v10403_v63 }
 0x3ee   :  { %7732 = vmatpush1.bf16.msra.mxu1 %v10406_v0  ;;  %7692 = vmatprep.subr.bf16.mxu0 %v10411_v19 }
 0x3ef   :  { %7733 = vmatprep.subr.bf16.mxu1 %v10414_v62 }
 0x3f1   :  { %7693 = vmatpush1.bf16.msra.mxu0 %v10409_v44 }
 0x3f2   :  { %7734 = vmatpush1.bf16.msra.mxu1 %v10412_v29  ;;  %7694 = vmatprep.subr.bf16.mxu0 %v10417_v8 }
 0x3f3   :  { %7735 = vmatprep.subr.bf16.mxu1 %v10420_v30 }
 0x3f5   :  { %7695 = vmatpush1.bf16.msra.mxu0 %v10415_v31 }
 0x3f6   :  { %7736 = vmatpush1.bf16.msra.mxu1 %v10418_v7  ;;  %7696 = vmatprep.subr.bf16.mxu0 %v10423_v36 }
 0x3f7   :  { %7737 = vmatprep.subr.bf16.mxu1 %v10426_v50 }
 0x3f9   :  { %7697 = vmatpush1.bf16.msra.mxu0 %v10421_v38 }
 0x3fa   :  { %7738 = vmatpush1.bf16.msra.mxu1 %v10424_v13  ;;  %7698 = vmatprep.subr.bf16.mxu0 %v10429_v24 }
 0x3fb   :  { %7739 = vmatprep.subr.bf16.mxu1 %v10432_v40 }
 0x3fd   :  { %7699 = vmatpush2.bf16.msra.mxu0 %v10427_v60 }
 0x3fe   :  { %7740 = vmatpush2.bf16.msra.mxu1 %v10430_v41  ;;  %7700 = vmatprep.subr.bf16.mxu0 %v10435_v17 }
 0x3ff   :  { %7741 = vmatprep.subr.bf16.mxu1 %v10438_v45 }
 0x401   :  { %7701 = vmatpush2.bf16.msra.mxu0 %v10433_v46 }
 0x402   :  { %7742 = vmatpush2.bf16.msra.mxu1 %v10436_v55  ;;  %7702 = vmatprep.subr.bf16.mxu0 %v10441_v26 }
 0x403   :  { %7743 = vmatprep.subr.bf16.mxu1 %v10444_v47 }
 0x405   :  { %7703 = vmatpush2.bf16.msra.mxu0 %v10439_v27 }
 0x406   :  { %7744 = vmatpush2.bf16.msra.mxu1 %v10442_v48  ;;  %7704 = vmatprep.subr.bf16.mxu0 %v10447_v49 }
 0x407   :  { %7745 = vmatprep.subr.bf16.mxu1 %v10450_v18 }
 0x409   :  { %7705 = vmatpush2.bf16.msra.mxu0 %v10445_v53 }
 0x40a   :  { %7746 = vmatpush2.bf16.msra.mxu1 %v10448_v6  ;;  %7706 = vmatprep.subr.bf16.mxu0 %v10453_v56 }
 0x40b   :  { %7747 = vmatprep.subr.bf16.mxu1 %v10456_v33 }
 0x40d   :  { %7707 = vmatpush2.bf16.msra.mxu0 %v10451_v34 }
 0x40e   :  { %7748 = vmatpush2.bf16.msra.mxu1 %v10454_v61  ;;  %7708 = vmatprep.subr.bf16.mxu0 %v10459_v15 }
 0x40f   :  { %7749 = vmatprep.subr.bf16.mxu1 %v10462_v35 }
 0x411   :  { %7709 = vmatpush2.bf16.msra.mxu0 %v10457_v21 }
 0x412   :  { %7750 = vmatpush2.bf16.msra.mxu1 %v10460_v1  ;;  %7710 = vmatprep.subr.bf16.mxu0 %v10465_v2 }
 0x413   :  { %7751 = vmatprep.subr.bf16.mxu1 %v10468_v12 }
 0x415   :  { %7711 = vmatpush2.bf16.msra.mxu0 %v10463_v20 }
 0x416   :  { %7752 = vmatpush2.bf16.msra.mxu1 %v10466_v3  ;;  %7712 = vmatprep.subr.bf16.mxu0 %v10471_v43 }
 0x417   :  { %7753 = vmatprep.subr.bf16.mxu1 %v10474_v4 }
 0x419   :  { %7713 = vmatpush2.bf16.msra.mxu0 %v10469_v5 }
 0x41a   :  { %7754 = vmatpush2.bf16.msra.mxu1 %v10472_v42 }
 0x41c   :  { %v7470_v11 = vpop.f32.mrf.mxu0  ;;  %7715 = vmatmul.mubr.bf16.vlgmr.msra.gmra.mxu0 %v7845_v9 }
 0x41d   :  { %v7511_v52 = vpop.f32.mrf.mxu1  ;;  %7756 = vmatmul.mubr.bf16.vlgmr.msra.gmra.mxu1 %v7847_v28  ;;  %v7471_v54 = vadd.f32 %v7470_v11, %v10890_v10 }
 0x41e   :  { %v7472_v14 = vpop.f32.mrf.mxu0 }
 0x41f   :  { %v7513_v57 = vpop.f32.mrf.mxu1  ;;  %v7512_v16 = vadd.f32 %v7511_v52, %v7471_v54  ;;  %v7473_v58 = vadd.f32 %v7472_v14, %v10893_v51 }
 0x420   :  { %v7474_v22 = vpop.f32.mrf.mxu0 }
 0x421   :  { %v7515_v23 = vpop.f32.mrf.mxu1  ;;  %v7514_v32 = vadd.f32 %v7513_v57, %v7473_v58 }
 0x422   :  { %v7475_v37 = vpop.f32.mrf.mxu0 }
 0x423   :  { %v7516_v39 = vpop.f32.mrf.mxu1 }
 0x45c   :  { %v7552_v25 = vpop.f32.mrf.mxu0 }
 0x45d   :  { %v7593_v59 = vpop.f32.mrf.mxu1  ;;  %v7553_v63 = vadd.f32 %v7552_v25, %v7512_v16 }
 0x45e   :  { %v7554_v0 = vpop.f32.mrf.mxu0 }
 0x45f   :  { %v7595_v19 = vpop.f32.mrf.mxu1  ;;  %v7594_v62 = vadd.f32 %v7593_v59, %v7553_v63  ;;  %v7555_v44 = vadd.f32 %v7554_v0, %v7514_v32 }
 0x460   :  { %v7556_v29 = vpop.f32.mrf.mxu0 }
 0x461   :  { %v7597_v8 = vpop.f32.mrf.mxu1  ;;  %v7596_v10 = vadd.f32 %v7595_v19, %v7555_v44 }
 0x462   :  { %v7557_v30 = vpop.f32.mrf.mxu0 }
 0x463   :  { %v7598_v31 = vpop.f32.mrf.mxu1 }
 0x49c   :  { %v7634_v7 = vpop.f32.mrf.mxu0 }
 0x49d   :  { %v7675_v36 = vpop.f32.mrf.mxu1  ;;  %v7635_v51 = vadd.f32 %v7634_v7, %v7594_v62 }
 0x49e   :  { %v7636_v50 = vpop.f32.mrf.mxu0 }
 0x49f   :  { %v7677_v38 = vpop.f32.mrf.mxu1  ;;  %v7676_v13 = vadd.f32 %v7675_v36, %v7635_v51  ;;  %v7637_v17 = vadd.f32 %v7636_v50, %v7596_v10 }
 0x4a0   :  { %v7638_v24 = vpop.f32.mrf.mxu0 }
 0x4a1   :  { %v7679_v40 = vpop.f32.mrf.mxu1  ;;  %v7678_v55 = vadd.f32 %v7677_v38, %v7637_v17 }
 0x4a2   :  { %v7639_v60 = vpop.f32.mrf.mxu0 }
 0x4a3   :  { %v7680_v41 = vpop.f32.mrf.mxu1 }
 0x4dc   :  { %v7716_v45 = vpop.f32.mrf.mxu0 }
 0x4dd   :  { %v7757_v46 = vpop.f32.mrf.mxu1  ;;  %v7717_v26 = vadd.f32 %v7716_v45, %v7676_v13 }
 0x4de   :  { %v7718_v47 = vpop.f32.mrf.mxu0 }
 0x4df   :  { %v7759_v27 = vpop.f32.mrf.mxu1  ;;  %v7758_v48 = vadd.f32 %v7757_v46, %v7717_v26  ;;  %v7719_v49 = vadd.f32 %v7718_v47, %v7678_v55 }
 0x4e0   :  { %v7720_v18 = vpop.f32.mrf.mxu0 }
 0x4e1   :  { %v7761_v53 = vpop.f32.mrf.mxu1  ;;  %v7766_v6 = vmul.f32 0.01, %v7758_v48  ;;  %v7760_v56 = vadd.f32 %v7759_v27, %v7719_v49  ;;  %vm7764_vm0 = vcmp.ge.f32.partialorder %v7758_v48, 0.0 }
 0x4e2   :  { %v7721_v33 = vpop.f32.mrf.mxu0 }
 0x4e3   :  { %v7762_v34 = vpop.f32.mrf.mxu1  ;;  %vm7765_vm1 = vcmp.ge.f32.partialorder %v7760_v56, 0.0  ;;  %v7767_v61 = vmul.f32 0.01, %v7760_v56  ;;  %v7768_v15 = vsel %vm7764_vm0, %v7758_v48, %v7766_v6 }
 0x4e5   :  { %v7769_v35 = vsel %vm7765_vm1, %v7760_v56, %v7767_v61 }
 0x4e6   :  { %v8874_v21 = vpack.c.bf16 %v7769_v35, %v7768_v15 }
 0x4e8   :  { %7778 = vst [vmem:[%s10907_s3] sm:$0xff] %v8874_v21 }
 0x4e9   :  { %7783 = vsyncpa [#allocation3], 1 }
 0x4ea   :  { %7784 = vsyncpa [#allocation5], 1 }

</bundles_post_ra>
